<compile_context>
chip_gen: v6e
topology: v6e:2x2x1
jax: 0.10.0
libtpu: 0.0.40
codegen_flags: <defaults>
</compile_context>

<pallas_src>
import numpy as np
import jax
import jax.numpy as jnp
from jax import lax
from jax.experimental import pallas as pl
from jax.experimental.pallas import tpu as pltpu


def _round_up(x, m):
    return ((x + m - 1) // m) * m


# ------------------------------ Pallas kernel -------------------------------

def _bottleneck_kernel(x_ref, w1_ref, w2_ref, w3_ref,
                       s1_ref, b1_ref, s2_ref, b2_ref, s3_ref, b3_ref,
                       o_ref, h1p_ref):
    # x_ref  : (1, H, W, Cp)  bf16   input image tile (channels padded to 128k)
    # w1_ref : (Cp, Wp)       bf16   1x1 conv1 weight
    # w2_ref : (9, Wp, Wp)    bf16   3x3 conv2 weight, tap-major (kh*3+kw)
    # w3_ref : (Wp, Cp)       bf16   1x1 conv3 weight
    # s*/b*  : (1, Wp|Cp)     f32    folded BatchNorm scale / bias
    # o_ref  : (1, H, W, Cp)  f32    output tile
    # h1p_ref: (H+2, W+2, Wp) f32    VMEM scratch: zero-padded h1 (conv2 halo)
    _, H, W, Cp = x_ref.shape
    Wp = w1_ref.shape[1]
    M = H * W

    x2d = x_ref[...].reshape(M, Cp)                      # bf16, (M, Cp)

    # ---- conv1 (1x1) + bn1 + relu -------------------------------------------
    a1 = jnp.dot(x2d, w1_ref[...], preferred_element_type=jnp.float32)
    h1 = jnp.maximum(a1 * s1_ref[...] + b1_ref[...], 0.0)        # f32 (M, Wp)

    # Stage h1 into the zero-padded halo scratch (borders stay zero = conv pad).
    h1p_ref[...] = jnp.zeros(h1p_ref.shape, h1p_ref.dtype)
    h1p_ref[1:H + 1, 1:W + 1, :] = h1.reshape(H, W, Wp)

    # ---- conv2 (3x3, pad 1) + bn2 + relu : 9 shifted MXU matmuls -------------
    acc2 = jnp.zeros((M, Wp), jnp.float32)
    for dh in range(3):
        for dw in range(3):
            win = h1p_ref[dh:dh + H, dw:dw + W, :].reshape(M, Wp)
            acc2 = acc2 + jnp.dot(win.astype(jnp.bfloat16),
                                  w2_ref[dh * 3 + dw],
                                  preferred_element_type=jnp.float32)
    h2 = jnp.maximum(acc2 * s2_ref[...] + b2_ref[...], 0.0)       # f32 (M, Wp)

    # ---- conv3 (1x1) + bn3 + residual + relu ---------------------------------
    a3 = jnp.dot(h2.astype(jnp.bfloat16), w3_ref[...],
                 preferred_element_type=jnp.float32)
    y = a3 * s3_ref[...] + b3_ref[...] + x2d.astype(jnp.float32)
    o_ref[...] = jnp.maximum(y, 0.0).reshape(1, H, W, Cp).astype(o_ref.dtype)


# ----------------------------- Bottleneck forward ----------------------------

def bottleneck_forward(x_nchw, params):
    N, Cin, H, W = x_nchw.shape
    Cp = params["Cp"]
    Wp = params["Wp"]
    out_ch = params["out_ch"]

    # NCHW -> NHWC + channel zero-pad to a lane-dense multiple of 128.
    # (In a full network one would keep NHWC / padded channels end-to-end.)
    x_nhwc = jnp.transpose(x_nchw, (0, 2, 3, 1))
    x_p = jnp.pad(x_nhwc, ((0, 0), (0, 0), (0, 0), (0, Cp - Cin)))
    x_p = x_p.astype(jnp.bfloat16)

    flops = 2 * N * H * W * (Cp * Wp + 9 * Wp * Wp + Wp * Cp)
    bytes_accessed = (N * H * W * Cp * 2          # x (bf16)
                      + N * H * W * Cp * 4        # out (f32)
                      + (Cp * Wp + 9 * Wp * Wp + Wp * Cp) * 2   # weights (bf16)
                      + 4 * Wp * 4 + 2 * Cp * 4)                # BN scale/bias

    const2 = lambda b: (0, 0)
    out = pl.pallas_call(
        _bottleneck_kernel,
        out_shape=jax.ShapeDtypeStruct((N, H, W, Cp), jnp.float32),
        grid=(N,),
        in_specs=[
            pl.BlockSpec((1, H, W, Cp), lambda b: (b, 0, 0, 0)),   # x
            pl.BlockSpec((Cp, Wp), const2),                        # w1 (resident)
            pl.BlockSpec((9, Wp, Wp), lambda b: (0, 0, 0)),        # w2 (resident)
            pl.BlockSpec((Wp, Cp), const2),                        # w3 (resident)
            pl.BlockSpec((1, Wp), const2), pl.BlockSpec((1, Wp), const2),  # s1,b1
            pl.BlockSpec((1, Wp), const2), pl.BlockSpec((1, Wp), const2),  # s2,b2
            pl.BlockSpec((1, Cp), const2), pl.BlockSpec((1, Cp), const2),  # s3,b3
        ],
        out_specs=pl.BlockSpec((1, H, W, Cp), lambda b: (b, 0, 0, 0)),
        scratch_shapes=[pltpu.VMEM((H + 2, W + 2, Wp), jnp.float32)],
        compiler_params=pltpu.CompilerParams(
            dimension_semantics=("parallel",),
            vmem_limit_bytes=32 * 1024 * 1024),
        cost_estimate=pl.CostEstimate(
            flops=flops, transcendentals=0, bytes_accessed=bytes_accessed),
    )(x_p, params["w1"], params["w2"], params["w3"],
      params["s1"], params["b1"], params["s2"], params["b2"],
      params["s3"], params["b3"])

    out = out[..., :out_ch]
    return jnp.transpose(out, (0, 3, 1, 2))


# --------------------------------- parameters --------------------------------

def make_params(key, inplanes, planes, base_width=64, groups=1):
    width = int(planes * (base_width / 64.0)) * groups
    out_ch = planes * 4  # expansion = 4
    assert inplanes == out_ch, "identity residual requires inplanes == planes*4"

    Cp = _round_up(max(inplanes, out_ch), 128)   # padded in/out channel dim
    Wp = _round_up(width, 128)                   # padded bottleneck width

    ks = jax.random.split(key, 15)

    def conv_w(k, cout, cin, kh, kw):
        fan_in = cin * kh * kw
        return jax.random.normal(k, (cout, cin, kh, kw), jnp.float32) / np.sqrt(fan_in)

    # PyTorch-shaped (OIHW) weights
    w1_t = conv_w(ks[0], width, inplanes, 1, 1)
    w2_t = conv_w(ks[1], width, width, 3, 3)
    w3_t = conv_w(ks[2], out_ch, width, 1, 1)

    def bn(kg, kb, km, kv, c):
        gamma = 1.0 + 0.1 * jax.random.normal(kg, (c,), jnp.float32)
        beta = 0.1 * jax.random.normal(kb, (c,), jnp.float32)
        mean = 0.1 * jax.random.normal(km, (c,), jnp.float32)
        var = jnp.abs(jax.random.normal(kv, (c,), jnp.float32)) + 0.5
        eps = 1e-5
        scale = gamma / jnp.sqrt(var + eps)
        bias = beta - mean * scale
        return scale, bias

    s1, b1 = bn(ks[3], ks[4], ks[5], ks[6], width)
    s2, b2 = bn(ks[7], ks[8], ks[9], ks[10], width)
    s3, b3 = bn(ks[11], ks[12], ks[13], ks[14], out_ch)

    # Padded, kernel-layout, bf16 weights (zero pad => exact zeros in pad lanes).
    w1 = jnp.zeros((Cp, Wp), jnp.float32).at[:inplanes, :width].set(w1_t[:, :, 0, 0].T)
    w2 = jnp.zeros((9, Wp, Wp), jnp.float32).at[:, :width, :width].set(
        jnp.transpose(w2_t, (2, 3, 1, 0)).reshape(9, width, width))
    w3 = jnp.zeros((Wp, Cp), jnp.float32).at[:width, :out_ch].set(w3_t[:, :, 0, 0].T)

    def padv(v, n):
        return jnp.zeros((1, n), jnp.float32).at[0, :v.shape[0]].set(v)

    return {
        "w1": w1.astype(jnp.bfloat16),
        "w2": w2.astype(jnp.bfloat16),
        "w3": w3.astype(jnp.bfloat16),
        "s1": padv(s1, Wp), "b1": padv(b1, Wp),
        "s2": padv(s2, Wp), "b2": padv(b2, Wp),
        "s3": padv(s3, Cp), "b3": padv(b3, Cp),
        "Cp": Cp, "Wp": Wp, "out_ch": out_ch,
        # torch-layout weights / unpadded BN params for the reference check
        "w1_t": w1_t, "w2_t": w2_t, "w3_t": w3_t,
        "s1_v": s1, "b1_v": b1, "s2_v": s2, "b2_v": b2, "s3_v": s3, "b3_v": b3,
    }


# ------------------------------ JAX reference ---------------------------------
# Mirrors the kernel's mixed precision: bf16 conv operands, f32 accumulation,
# f32 BN/ReLU epilogue.

def reference_forward(x, p):
    bf16 = jnp.bfloat16

    def conv(h, w, pad):
        return lax.conv_general_dilated(
            h.astype(bf16), w.astype(bf16),
            window_strides=(1, 1), padding=((pad, pad), (pad, pad)),
            dimension_numbers=("NCHW", "OIHW", "NCHW"),
            preferred_element_type=jnp.float32)

    def affine(h, s, b):
        return h * s[None, :, None, None] + b[None, :, None, None]

    xq = x.astype(bf16).astype(jnp.float32)
    h = jnp.maximum(affine(conv(xq, p["w1_t"], 0), p["s1_v"], p["b1_v"]), 0.0)
    h = jnp.maximum(affine(conv(h, p["w2_t"], 1), p["s2_v"], p["b2_v"]), 0.0)
    o = affine(conv(h, p["w3_t"], 0), p["s3_v"], p["b3_v"]) + xq
    return jnp.maximum(o, 0.0)


# ----------------------------------- main --------------------------------------

if __name__ == "__main__":
    # inplanes == planes * 4 so the identity residual is valid (downsample=None).
    N, inplanes, planes, H, W = 2, 128, 32, 16, 16
    key = jax.random.PRNGKey(0)
    kx, kp = jax.random.split(key)
    x = jax.random.normal(kx, (N, inplanes, H, W), jnp.float32)
    params = make_params(kp, inplanes, planes)

    fwd = jax.jit(lambda xx: bottleneck_forward(xx, params))
    out = jax.block_until_ready(fwd(x))

    ref = jax.block_until_ready(reference_forward(x, params))
    assert out.shape == (N, planes * 4, H, W)
    out_np, ref_np = np.asarray(out), np.asarray(ref)
    if not np.allclose(out_np, ref_np, rtol=1e-2, atol=1e-2):
        raise AssertionError(
            "Pallas Bottleneck mismatch, max abs err = %g"
            % float(np.max(np.abs(out_np - ref_np))))

    print("KERNEL_OK")
</pallas_src>

<mosaic_0001>
module attributes {stable_mosaic.version = 11 : i64} {
  func.func @_bottleneck_kernel(%arg0: i32, %arg1: memref<1x16x16x128xbf16, #tpu.memory_space<vmem>>, %arg2: memref<128x128xbf16, #tpu.memory_space<vmem>>, %arg3: memref<9x128x128xbf16, #tpu.memory_space<vmem>>, %arg4: memref<128x128xbf16, #tpu.memory_space<vmem>>, %arg5: memref<1x128xf32, #tpu.memory_space<vmem>>, %arg6: memref<1x128xf32, #tpu.memory_space<vmem>>, %arg7: memref<1x128xf32, #tpu.memory_space<vmem>>, %arg8: memref<1x128xf32, #tpu.memory_space<vmem>>, %arg9: memref<1x128xf32, #tpu.memory_space<vmem>>, %arg10: memref<1x128xf32, #tpu.memory_space<vmem>>, %arg11: memref<1x16x16x128xf32, #tpu.memory_space<vmem>>, %arg12: memref<18x18x128xf32, #tpu.memory_space<vmem>>) attributes {dimension_semantics = [#tpu.dimension_semantics<parallel>], iteration_bounds = array<i64: 2>, scalar_prefetch = 0 : i64, scratch_operands = 1 : i64, tpu.core_type = #tpu.core_type<tc>, window_params = [{transform_indices = @transform_0, window_bounds = array<i64: 1, 16, 16, 128>}, {pipeline_mode = #tpu.pipeline_mode<synchronous>, transform_indices = @transform_1, window_bounds = array<i64: 128, 128>}, {pipeline_mode = #tpu.pipeline_mode<synchronous>, transform_indices = @transform_2, window_bounds = array<i64: 9, 128, 128>}, {pipeline_mode = #tpu.pipeline_mode<synchronous>, transform_indices = @transform_3, window_bounds = array<i64: 128, 128>}, {pipeline_mode = #tpu.pipeline_mode<synchronous>, transform_indices = @transform_4, window_bounds = array<i64: 1, 128>}, {pipeline_mode = #tpu.pipeline_mode<synchronous>, transform_indices = @transform_5, window_bounds = array<i64: 1, 128>}, {pipeline_mode = #tpu.pipeline_mode<synchronous>, transform_indices = @transform_6, window_bounds = array<i64: 1, 128>}, {pipeline_mode = #tpu.pipeline_mode<synchronous>, transform_indices = @transform_7, window_bounds = array<i64: 1, 128>}, {pipeline_mode = #tpu.pipeline_mode<synchronous>, transform_indices = @transform_8, window_bounds = array<i64: 1, 128>}, {pipeline_mode = #tpu.pipeline_mode<synchronous>, transform_indices = @transform_9, window_bounds = array<i64: 1, 128>}, {transform_indices = @transform_10, window_bounds = array<i64: 1, 16, 16, 128>}]} {
    %c0 = arith.constant 0 : index
    %c0_0 = arith.constant 0 : index
    %c0_1 = arith.constant 0 : index
    %c0_2 = arith.constant 0 : index
    %0 = vector.load %arg1[%c0, %c0_0, %c0_1, %c0_2] : memref<1x16x16x128xbf16, #tpu.memory_space<vmem>>, vector<1x16x16x128xbf16>
    %1 = vector.shape_cast %0 : vector<1x16x16x128xbf16> to vector<256x128xbf16>
    %c0_3 = arith.constant 0 : index
    %c0_4 = arith.constant 0 : index
    %2 = vector.load %arg2[%c0_3, %c0_4] : memref<128x128xbf16, #tpu.memory_space<vmem>>, vector<128x128xbf16>
    %cst = arith.constant dense<0.000000e+00> : vector<256x128xf32>
    %3 = tpu.matmul %1, %2, %cst {dimension_numbers = #tpu.dot_dimension_numbers<[1], [0], [0], [1], [0, 0, 1, 1], [], []>} : vector<256x128xbf16>, vector<128x128xbf16>, vector<256x128xf32> -> vector<256x128xf32>
    %c0_5 = arith.constant 0 : index
    %c0_6 = arith.constant 0 : index
    %4 = vector.load %arg5[%c0_5, %c0_6] : memref<1x128xf32, #tpu.memory_space<vmem>>, vector<1x128xf32>
    %5 = vector.broadcast %4 : vector<1x128xf32> to vector<256x128xf32>
    %6 = arith.mulf %3, %5 : vector<256x128xf32>
    %c0_7 = arith.constant 0 : index
    %c0_8 = arith.constant 0 : index
    %7 = vector.load %arg6[%c0_7, %c0_8] : memref<1x128xf32, #tpu.memory_space<vmem>>, vector<1x128xf32>
    %8 = vector.broadcast %7 : vector<1x128xf32> to vector<256x128xf32>
    %9 = arith.addf %6, %8 : vector<256x128xf32>
    %cst_9 = arith.constant 0.000000e+00 : f32
    %10 = vector.broadcast %cst_9 : f32 to vector<256x128xf32>
    %11 = arith.maximumf %9, %10 : vector<256x128xf32>
    %cst_10 = arith.constant 0.000000e+00 : f32
    %12 = vector.broadcast %cst_10 : f32 to vector<18x18x128xf32>
    %c0_11 = arith.constant 0 : index
    %c0_12 = arith.constant 0 : index
    %c0_13 = arith.constant 0 : index
    %13 = vector.load %arg12[%c0_11, %c0_12, %c0_13] : memref<18x18x128xf32, #tpu.memory_space<vmem>>, vector<18x18x128xf32>
    tpu.vector_store %arg12[%c0_11, %c0_12, %c0_13], %12 {strides = array<i32>} : memref<18x18x128xf32, #tpu.memory_space<vmem>>, vector<18x18x128xf32>,
    %14 = vector.shape_cast %11 : vector<256x128xf32> to vector<16x16x128xf32>
    %c1 = arith.constant 1 : index
    %c1_14 = arith.constant 1 : index
    %c0_15 = arith.constant 0 : index
    %15 = vector.load %arg12[%c1, %c1_14, %c0_15] : memref<18x18x128xf32, #tpu.memory_space<vmem>>, vector<16x16x128xf32>
    tpu.vector_store %arg12[%c1, %c1_14, %c0_15], %14 {strides = array<i32>} : memref<18x18x128xf32, #tpu.memory_space<vmem>>, vector<16x16x128xf32>,
    %cst_16 = arith.constant 0.000000e+00 : f32
    %16 = vector.broadcast %cst_16 : f32 to vector<256x128xf32>
    %c0_17 = arith.constant 0 : index
    %c0_18 = arith.constant 0 : index
    %c0_19 = arith.constant 0 : index
    %17 = vector.load %arg12[%c0_17, %c0_18, %c0_19] : memref<18x18x128xf32, #tpu.memory_space<vmem>>, vector<16x16x128xf32>
    %18 = vector.shape_cast %17 : vector<16x16x128xf32> to vector<256x128xf32>
    %19 = arith.truncf %18 : vector<256x128xf32> to vector<256x128xbf16>
    %c0_20 = arith.constant 0 : index
    %c0_21 = arith.constant 0 : index
    %c0_22 = arith.constant 0 : index
    %20 = vector.load %arg3[%c0_20, %c0_21, %c0_22] : memref<9x128x128xbf16, #tpu.memory_space<vmem>>, vector<1x128x128xbf16>
    %21 = vector.shape_cast %20 : vector<1x128x128xbf16> to vector<128x128xbf16>
    %cst_23 = arith.constant dense<0.000000e+00> : vector<256x128xf32>
    %22 = tpu.matmul %19, %21, %cst_23 {dimension_numbers = #tpu.dot_dimension_numbers<[1], [0], [0], [1], [0, 0, 1, 1], [], []>} : vector<256x128xbf16>, vector<128x128xbf16>, vector<256x128xf32> -> vector<256x128xf32>
    %23 = arith.addf %16, %22 : vector<256x128xf32>
    %c0_24 = arith.constant 0 : index
    %c1_25 = arith.constant 1 : index
    %c0_26 = arith.constant 0 : index
    %24 = vector.load %arg12[%c0_24, %c1_25, %c0_26] : memref<18x18x128xf32, #tpu.memory_space<vmem>>, vector<16x16x128xf32>
    %25 = vector.shape_cast %24 : vector<16x16x128xf32> to vector<256x128xf32>
    %26 = arith.truncf %25 : vector<256x128xf32> to vector<256x128xbf16>
    %c1_27 = arith.constant 1 : index
    %c0_28 = arith.constant 0 : index
    %c0_29 = arith.constant 0 : index
    %27 = vector.load %arg3[%c1_27, %c0_28, %c0_29] : memref<9x128x128xbf16, #tpu.memory_space<vmem>>, vector<1x128x128xbf16>
    %28 = vector.shape_cast %27 : vector<1x128x128xbf16> to vector<128x128xbf16>
    %cst_30 = arith.constant dense<0.000000e+00> : vector<256x128xf32>
    %29 = tpu.matmul %26, %28, %cst_30 {dimension_numbers = #tpu.dot_dimension_numbers<[1], [0], [0], [1], [0, 0, 1, 1], [], []>} : vector<256x128xbf16>, vector<128x128xbf16>, vector<256x128xf32> -> vector<256x128xf32>
    %30 = arith.addf %23, %29 : vector<256x128xf32>
    %c0_31 = arith.constant 0 : index
    %c2 = arith.constant 2 : index
    %c0_32 = arith.constant 0 : index
    %31 = vector.load %arg12[%c0_31, %c2, %c0_32] : memref<18x18x128xf32, #tpu.memory_space<vmem>>, vector<16x16x128xf32>
    %32 = vector.shape_cast %31 : vector<16x16x128xf32> to vector<256x128xf32>
    %33 = arith.truncf %32 : vector<256x128xf32> to vector<256x128xbf16>
    %c2_33 = arith.constant 2 : index
    %c0_34 = arith.constant 0 : index
    %c0_35 = arith.constant 0 : index
    %34 = vector.load %arg3[%c2_33, %c0_34, %c0_35] : memref<9x128x128xbf16, #tpu.memory_space<vmem>>, vector<1x128x128xbf16>
    %35 = vector.shape_cast %34 : vector<1x128x128xbf16> to vector<128x128xbf16>
    %cst_36 = arith.constant dense<0.000000e+00> : vector<256x128xf32>
    %36 = tpu.matmul %33, %35, %cst_36 {dimension_numbers = #tpu.dot_dimension_numbers<[1], [0], [0], [1], [0, 0, 1, 1], [], []>} : vector<256x128xbf16>, vector<128x128xbf16>, vector<256x128xf32> -> vector<256x128xf32>
    %37 = arith.addf %30, %36 : vector<256x128xf32>
    %c1_37 = arith.constant 1 : index
    %c0_38 = arith.constant 0 : index
    %c0_39 = arith.constant 0 : index
    %38 = vector.load %arg12[%c1_37, %c0_38, %c0_39] : memref<18x18x128xf32, #tpu.memory_space<vmem>>, vector<16x16x128xf32>
    %39 = vector.shape_cast %38 : vector<16x16x128xf32> to vector<256x128xf32>
    %40 = arith.truncf %39 : vector<256x128xf32> to vector<256x128xbf16>
    %c3 = arith.constant 3 : index
    %c0_40 = arith.constant 0 : index
    %c0_41 = arith.constant 0 : index
    %41 = vector.load %arg3[%c3, %c0_40, %c0_41] : memref<9x128x128xbf16, #tpu.memory_space<vmem>>, vector<1x128x128xbf16>
    %42 = vector.shape_cast %41 : vector<1x128x128xbf16> to vector<128x128xbf16>
    %cst_42 = arith.constant dense<0.000000e+00> : vector<256x128xf32>
    %43 = tpu.matmul %40, %42, %cst_42 {dimension_numbers = #tpu.dot_dimension_numbers<[1], [0], [0], [1], [0, 0, 1, 1], [], []>} : vector<256x128xbf16>, vector<128x128xbf16>, vector<256x128xf32> -> vector<256x128xf32>
    %44 = arith.addf %37, %43 : vector<256x128xf32>
    %c1_43 = arith.constant 1 : index
    %c1_44 = arith.constant 1 : index
    %c0_45 = arith.constant 0 : index
    %45 = vector.load %arg12[%c1_43, %c1_44, %c0_45] : memref<18x18x128xf32, #tpu.memory_space<vmem>>, vector<16x16x128xf32>
    %46 = vector.shape_cast %45 : vector<16x16x128xf32> to vector<256x128xf32>
    %47 = arith.truncf %46 : vector<256x128xf32> to vector<256x128xbf16>
    %c4 = arith.constant 4 : index
    %c0_46 = arith.constant 0 : index
    %c0_47 = arith.constant 0 : index
    %48 = vector.load %arg3[%c4, %c0_46, %c0_47] : memref<9x128x128xbf16, #tpu.memory_space<vmem>>, vector<1x128x128xbf16>
    %49 = vector.shape_cast %48 : vector<1x128x128xbf16> to vector<128x128xbf16>
    %cst_48 = arith.constant dense<0.000000e+00> : vector<256x128xf32>
    %50 = tpu.matmul %47, %49, %cst_48 {dimension_numbers = #tpu.dot_dimension_numbers<[1], [0], [0], [1], [0, 0, 1, 1], [], []>} : vector<256x128xbf16>, vector<128x128xbf16>, vector<256x128xf32> -> vector<256x128xf32>
    %51 = arith.addf %44, %50 : vector<256x128xf32>
    %c1_49 = arith.constant 1 : index
    %c2_50 = arith.constant 2 : index
    %c0_51 = arith.constant 0 : index
    %52 = vector.load %arg12[%c1_49, %c2_50, %c0_51] : memref<18x18x128xf32, #tpu.memory_space<vmem>>, vector<16x16x128xf32>
    %53 = vector.shape_cast %52 : vector<16x16x128xf32> to vector<256x128xf32>
    %54 = arith.truncf %53 : vector<256x128xf32> to vector<256x128xbf16>
    %c5 = arith.constant 5 : index
    %c0_52 = arith.constant 0 : index
    %c0_53 = arith.constant 0 : index
    %55 = vector.load %arg3[%c5, %c0_52, %c0_53] : memref<9x128x128xbf16, #tpu.memory_space<vmem>>, vector<1x128x128xbf16>
    %56 = vector.shape_cast %55 : vector<1x128x128xbf16> to vector<128x128xbf16>
    %cst_54 = arith.constant dense<0.000000e+00> : vector<256x128xf32>
    %57 = tpu.matmul %54, %56, %cst_54 {dimension_numbers = #tpu.dot_dimension_numbers<[1], [0], [0], [1], [0, 0, 1, 1], [], []>} : vector<256x128xbf16>, vector<128x128xbf16>, vector<256x128xf32> -> vector<256x128xf32>
    %58 = arith.addf %51, %57 : vector<256x128xf32>
    %c2_55 = arith.constant 2 : index
    %c0_56 = arith.constant 0 : index
    %c0_57 = arith.constant 0 : index
    %59 = vector.load %arg12[%c2_55, %c0_56, %c0_57] : memref<18x18x128xf32, #tpu.memory_space<vmem>>, vector<16x16x128xf32>
    %60 = vector.shape_cast %59 : vector<16x16x128xf32> to vector<256x128xf32>
    %61 = arith.truncf %60 : vector<256x128xf32> to vector<256x128xbf16>
    %c6 = arith.constant 6 : index
    %c0_58 = arith.constant 0 : index
    %c0_59 = arith.constant 0 : index
    %62 = vector.load %arg3[%c6, %c0_58, %c0_59] : memref<9x128x128xbf16, #tpu.memory_space<vmem>>, vector<1x128x128xbf16>
    %63 = vector.shape_cast %62 : vector<1x128x128xbf16> to vector<128x128xbf16>
    %cst_60 = arith.constant dense<0.000000e+00> : vector<256x128xf32>
    %64 = tpu.matmul %61, %63, %cst_60 {dimension_numbers = #tpu.dot_dimension_numbers<[1], [0], [0], [1], [0, 0, 1, 1], [], []>} : vector<256x128xbf16>, vector<128x128xbf16>, vector<256x128xf32> -> vector<256x128xf32>
    %65 = arith.addf %58, %64 : vector<256x128xf32>
    %c2_61 = arith.constant 2 : index
    %c1_62 = arith.constant 1 : index
    %c0_63 = arith.constant 0 : index
    %66 = vector.load %arg12[%c2_61, %c1_62, %c0_63] : memref<18x18x128xf32, #tpu.memory_space<vmem>>, vector<16x16x128xf32>
    %67 = vector.shape_cast %66 : vector<16x16x128xf32> to vector<256x128xf32>
    %68 = arith.truncf %67 : vector<256x128xf32> to vector<256x128xbf16>
    %c7 = arith.constant 7 : index
    %c0_64 = arith.constant 0 : index
    %c0_65 = arith.constant 0 : index
    %69 = vector.load %arg3[%c7, %c0_64, %c0_65] : memref<9x128x128xbf16, #tpu.memory_space<vmem>>, vector<1x128x128xbf16>
    %70 = vector.shape_cast %69 : vector<1x128x128xbf16> to vector<128x128xbf16>
    %cst_66 = arith.constant dense<0.000000e+00> : vector<256x128xf32>
    %71 = tpu.matmul %68, %70, %cst_66 {dimension_numbers = #tpu.dot_dimension_numbers<[1], [0], [0], [1], [0, 0, 1, 1], [], []>} : vector<256x128xbf16>, vector<128x128xbf16>, vector<256x128xf32> -> vector<256x128xf32>
    %72 = arith.addf %65, %71 : vector<256x128xf32>
    %c2_67 = arith.constant 2 : index
    %c2_68 = arith.constant 2 : index
    %c0_69 = arith.constant 0 : index
    %73 = vector.load %arg12[%c2_67, %c2_68, %c0_69] : memref<18x18x128xf32, #tpu.memory_space<vmem>>, vector<16x16x128xf32>
    %74 = vector.shape_cast %73 : vector<16x16x128xf32> to vector<256x128xf32>
    %75 = arith.truncf %74 : vector<256x128xf32> to vector<256x128xbf16>
    %c8 = arith.constant 8 : index
    %c0_70 = arith.constant 0 : index
    %c0_71 = arith.constant 0 : index
    %76 = vector.load %arg3[%c8, %c0_70, %c0_71] : memref<9x128x128xbf16, #tpu.memory_space<vmem>>, vector<1x128x128xbf16>
    %77 = vector.shape_cast %76 : vector<1x128x128xbf16> to vector<128x128xbf16>
    %cst_72 = arith.constant dense<0.000000e+00> : vector<256x128xf32>
    %78 = tpu.matmul %75, %77, %cst_72 {dimension_numbers = #tpu.dot_dimension_numbers<[1], [0], [0], [1], [0, 0, 1, 1], [], []>} : vector<256x128xbf16>, vector<128x128xbf16>, vector<256x128xf32> -> vector<256x128xf32>
    %79 = arith.addf %72, %78 : vector<256x128xf32>
    %c0_73 = arith.constant 0 : index
    %c0_74 = arith.constant 0 : index
    %80 = vector.load %arg7[%c0_73, %c0_74] : memref<1x128xf32, #tpu.memory_space<vmem>>, vector<1x128xf32>
    %81 = vector.broadcast %80 : vector<1x128xf32> to vector<256x128xf32>
    %82 = arith.mulf %79, %81 : vector<256x128xf32>
    %c0_75 = arith.constant 0 : index
    %c0_76 = arith.constant 0 : index
    %83 = vector.load %arg8[%c0_75, %c0_76] : memref<1x128xf32, #tpu.memory_space<vmem>>, vector<1x128xf32>
    %84 = vector.broadcast %83 : vector<1x128xf32> to vector<256x128xf32>
    %85 = arith.addf %82, %84 : vector<256x128xf32>
    %cst_77 = arith.constant 0.000000e+00 : f32
    %86 = vector.broadcast %cst_77 : f32 to vector<256x128xf32>
    %87 = arith.maximumf %85, %86 : vector<256x128xf32>
    %88 = arith.truncf %87 : vector<256x128xf32> to vector<256x128xbf16>
    %c0_78 = arith.constant 0 : index
    %c0_79 = arith.constant 0 : index
    %89 = vector.load %arg4[%c0_78, %c0_79] : memref<128x128xbf16, #tpu.memory_space<vmem>>, vector<128x128xbf16>
    %cst_80 = arith.constant dense<0.000000e+00> : vector<256x128xf32>
    %90 = tpu.matmul %88, %89, %cst_80 {dimension_numbers = #tpu.dot_dimension_numbers<[1], [0], [0], [1], [0, 0, 1, 1], [], []>} : vector<256x128xbf16>, vector<128x128xbf16>, vector<256x128xf32> -> vector<256x128xf32>
    %c0_81 = arith.constant 0 : index
    %c0_82 = arith.constant 0 : index
    %91 = vector.load %arg9[%c0_81, %c0_82] : memref<1x128xf32, #tpu.memory_space<vmem>>, vector<1x128xf32>
    %92 = vector.broadcast %91 : vector<1x128xf32> to vector<256x128xf32>
    %93 = arith.mulf %90, %92 : vector<256x128xf32>
    %c0_83 = arith.constant 0 : index
    %c0_84 = arith.constant 0 : index
    %94 = vector.load %arg10[%c0_83, %c0_84] : memref<1x128xf32, #tpu.memory_space<vmem>>, vector<1x128xf32>
    %95 = vector.broadcast %94 : vector<1x128xf32> to vector<256x128xf32>
    %96 = arith.addf %93, %95 : vector<256x128xf32>
    %97 = arith.extf %1 : vector<256x128xbf16> to vector<256x128xf32>
    %98 = arith.addf %96, %97 : vector<256x128xf32>
    %cst_85 = arith.constant 0.000000e+00 : f32
    %99 = vector.broadcast %cst_85 : f32 to vector<256x128xf32>
    %100 = arith.maximumf %98, %99 : vector<256x128xf32>
    %101 = vector.shape_cast %100 : vector<256x128xf32> to vector<1x16x16x128xf32>
    %c0_86 = arith.constant 0 : index
    %c0_87 = arith.constant 0 : index
    %c0_88 = arith.constant 0 : index
    %c0_89 = arith.constant 0 : index
    %102 = vector.load %arg11[%c0_86, %c0_87, %c0_88, %c0_89] : memref<1x16x16x128xf32, #tpu.memory_space<vmem>>, vector<1x16x16x128xf32>
    tpu.vector_store %arg11[%c0_86, %c0_87, %c0_88, %c0_89], %101 {strides = array<i32>} : memref<1x16x16x128xf32, #tpu.memory_space<vmem>>, vector<1x16x16x128xf32>,
    return
  }
  func.func @transform_0(%arg0: i32) -> (i32, i32, i32, i32) {
    %c0_i32 = arith.constant 0 : i32
    %c0_i32_0 = arith.constant 0 : i32
    %c0_i32_1 = arith.constant 0 : i32
    %c0_i32_2 = arith.constant 0 : i32
    return %arg0, %c0_i32, %c0_i32_0, %c0_i32_1 : i32, i32, i32, i32
  }
  func.func @transform_1(%arg0: i32) -> (i32, i32) {
    %c0_i32 = arith.constant 0 : i32
    %c0_i32_0 = arith.constant 0 : i32
    %c0_i32_1 = arith.constant 0 : i32
    return %c0_i32, %c0_i32_0 : i32, i32
  }
  func.func @transform_2(%arg0: i32) -> (i32, i32, i32) {
    %c0_i32 = arith.constant 0 : i32
    %c0_i32_0 = arith.constant 0 : i32
    %c0_i32_1 = arith.constant 0 : i32
    %c0_i32_2 = arith.constant 0 : i32
    return %c0_i32, %c0_i32_0, %c0_i32_1 : i32, i32, i32
  }
  func.func @transform_3(%arg0: i32) -> (i32, i32) {
    %c0_i32 = arith.constant 0 : i32
    %c0_i32_0 = arith.constant 0 : i32
    %c0_i32_1 = arith.constant 0 : i32
    return %c0_i32, %c0_i32_0 : i32, i32
  }
  func.func @transform_4(%arg0: i32) -> (i32, i32) {
    %c0_i32 = arith.constant 0 : i32
    %c0_i32_0 = arith.constant 0 : i32
    %c0_i32_1 = arith.constant 0 : i32
    return %c0_i32, %c0_i32_0 : i32, i32
  }
  func.func @transform_5(%arg0: i32) -> (i32, i32) {
    %c0_i32 = arith.constant 0 : i32
    %c0_i32_0 = arith.constant 0 : i32
    %c0_i32_1 = arith.constant 0 : i32
    return %c0_i32, %c0_i32_0 : i32, i32
  }
  func.func @transform_6(%arg0: i32) -> (i32, i32) {
    %c0_i32 = arith.constant 0 : i32
    %c0_i32_0 = arith.constant 0 : i32
    %c0_i32_1 = arith.constant 0 : i32
    return %c0_i32, %c0_i32_0 : i32, i32
  }
  func.func @transform_7(%arg0: i32) -> (i32, i32) {
    %c0_i32 = arith.constant 0 : i32
    %c0_i32_0 = arith.constant 0 : i32
    %c0_i32_1 = arith.constant 0 : i32
    return %c0_i32, %c0_i32_0 : i32, i32
  }
  func.func @transform_8(%arg0: i32) -> (i32, i32) {
    %c0_i32 = arith.constant 0 : i32
    %c0_i32_0 = arith.constant 0 : i32
    %c0_i32_1 = arith.constant 0 : i32
    return %c0_i32, %c0_i32_0 : i32, i32
  }
  func.func @transform_9(%arg0: i32) -> (i32, i32) {
    %c0_i32 = arith.constant 0 : i32
    %c0_i32_0 = arith.constant 0 : i32
    %c0_i32_1 = arith.constant 0 : i32
    return %c0_i32, %c0_i32_0 : i32, i32
  }
  func.func @transform_10(%arg0: i32) -> (i32, i32, i32, i32) {
    %c0_i32 = arith.constant 0 : i32
    %c0_i32_0 = arith.constant 0 : i32
    %c0_i32_1 = arith.constant 0 : i32
    %c0_i32_2 = arith.constant 0 : i32
    return %arg0, %c0_i32, %c0_i32_0, %c0_i32_1 : i32, i32, i32, i32
  }
}

</mosaic_0001>

<bundles_post_ra>
// kernel: _lambda_.1
= control target key start
LH: loop header
LB: loop body
LE: loop exit
PB: predicated region body
PF: predicated region fallthrough
CT: control target
= control target key end

     0   :  { %15 = vsyncpa [#allocation4], 0  ;;  %s7096_s0 = inlined_call_operand.vmem [shape: bf16[2,16,16,128], index: 0, kind: input, shape index: {}]   ;;  %s7097_s1 = inlined_call_operand.vmem [shape: bf16[128,128], index: 1, kind: input, shape index: {}]   ;;  %s7098_s2 = inlined_call_operand.vmem [shape: bf16[9,128,128], index: 2, kind: input, shape index: {}]   ;;  %s7099_s3 = inlined_call_operand.vmem [shape: bf16[128,128], index: 3, kind: input, shape index: {}]   ;;  %s7100_s4 = inlined_call_operand.vmem [shape: f32[1,128], index: 4, kind: input, shape index: {}]   ;;  %s7101_s5 = inlined_call_operand.vmem [shape: f32[1,128], index: 5, kind: input, shape index: {}]   ;;  %s7102_s6 = inlined_call_operand.vmem [shape: f32[1,128], index: 6, kind: input, shape index: {}]   ;;  %s7103_s7 = inlined_call_operand.vmem [shape: f32[1,128], index: 7, kind: input, shape index: {}]   ;;  %s7104_s8 = inlined_call_operand.vmem [shape: f32[1,128], index: 8, kind: input, shape index: {}]   ;;  %s7105_s9 = inlined_call_operand.vmem [shape: f32[1,128], index: 9, kind: input, shape index: {}]   ;;  %s7106_s10 = inlined_call_operand.hbm [shape: f32[2,16,16,128], index: 10, kind: output, shape index: {}]  }
   0x1   :  { %17 = vsyncpa [#allocation4 + $0x1], 0  ;;  %s5593_s13 = smov 0   ;;  %s5595_s14 = smov 0  }
   0x2   :  { %s5597_s15 = smov 0   ;;  %s5599_s16 = smov 0  }
   0x3 LB: > { %s5614_s17 = sadd.s32 4294967295, %s5531_s16   ;;  %s4232_s18 = sadd.s32 4294967294, %s5531_s16   ;;  %s5531_s16 = sphi %s5599_s16, %s7138_s16   ;;  %s5527_s15 = sphi %s5597_s15, %s7137_s15   ;;  %s5523_s14 = sphi %s5595_s14, %s7136_s14   ;;  %s5519_s13 = sphi %s5593_s13, %s7135_s13  }
   0x4   : > { %s5618_s19 = sadd.s32 1, %s5531_s16   ;;  %s245_s20 = sadd.s32 1, %s5527_s15 }
   0x5   : > { %s242_s21 = ssub.s32 %s5531_s16, %s5618_s19  ;;  %p255_p0 = scmp.ne.s32.totalorder %s5527_s15, %s5523_s14 }
   0x6   : > { %p243_p1 = scmp.eq.s32.totalorder %s242_s21, 0  ;;  %p256_p2 = scmp.eq.s32.totalorder %s5614_s17, 1 }
   0x7   : > { %p261_p3 = scmp.ne.s32.totalorder %s5523_s14, %s5519_s13  ;;  %p262_p4 = scmp.eq.s32.totalorder %s4232_s18, 1 }
   0x8   : > { %s5629_s22 = scalar_select %p243_p1, %s5527_s15, %s245_s20  }
   0x9   : > { %p5631_p5 = por %p256_p2, %p255_p0  ;;  %p5635_p6 = por %p262_p4, %p261_p3 }
   0xa   : > { %p4235_p7 = scmp.ge.s32.totalorder %s5531_s16, 1  ;;  %p315_p8 = scmp.lt.s32.totalorder %s5531_s16, 3 }
   0xc   : > { %p316_p9 = pnand %p4235_p7, %p315_p8 }
   0xe   : > { %319 = sbr.rel (%p316_p9) target bundleno = 1004 (0x3ec), region = 60 }
  0x13   : > { %v5334_v0 = vld [vmem:[%s7097_s1 + $0x38] sm:$0xff]   ;;  %p353_p10 = scmp.lt.s32.totalorder %s5614_s17, 1  ;;  %v5335_v1 = vld [vmem:[%s7097_s1 + $0x30] sm:$0xff]   ;;  %v5336_v2 = vld [vmem:[%s7097_s1 + $0x28] sm:$0xff]   ;;  %v5533_v34 = vmov 0.0   ;;  %v5534_v44 = vmov 0.0|0.0  }
  0x14   : > { %4748 = vmatprep.subr.bf16.mxu0 %v5334_v0  ;;  %5276 = vmatprep.subr.bf16.mxu1 %v5334_v0  ;;  %v5337_v3 = vld [vmem:[%s7097_s1 + $0x20] sm:$0xff]   ;;  %v5338_v5 = vld [vmem:[%s7097_s1 + $0x18] sm:$0xff]   ;;  %v5339_v7 = vld [vmem:[%s7097_s1 + $0x10] sm:$0xff]   ;;  %828 = vst [vmem:[#allocation2 + $0x30] sm:$0xff] %v5533_v34  ;;  %s350_s25 = sand.u32 1, %s5523_s14   ;;  %s5535_s26 = smov [#allocation3]  }
  0x15   : > { %s354_s29 = scalar_select %p353_p10, %s5614_s17, 1  ;;  %4749 = vmatpush3.bf16.msra.mxu0 %v5334_v0  ;;  %5284 = vmatpush3.bf16.msra.mxu1 %v5334_v0  ;;  %v5340_v8 = vld [vmem:[%s7097_s1 + $0x8] sm:$0xff]   ;;  %v5341_v9 = vld [vmem:[%s7097_s1] sm:$0xff]   ;;  %v5359_v13 = vld [vmem:[%s7098_s2 + $0x38] sm:$0xff]   ;;  %829 = vst [vmem:[#allocation2 + $0x38] sm:$0xff] %v5533_v34 }
  0x16   : > { %4750 = vmatprep.subr.bf16.mxu0 %v5335_v1  ;;  %5277 = vmatprep.subr.bf16.mxu1 %v5335_v1  ;;  %v5358_v15 = vld [vmem:[%s7098_s2 + $0x78] sm:$0xff]   ;;  %v5360_v16 = vld [vmem:[%s7098_s2 + $0x70] sm:$0xff]   ;;  %v5362_v22 = vld [vmem:[%s7098_s2 + $0x68] sm:$0xff]   ;;  %822 = vst [vmem:[#allocation2] sm:$0xff] %v5533_v34  ;;  %s4236_s28 = sshll.u32 %s350_s25, 8  ;;  %s7056_s20 = scalar_lea.sflag [#allocation4], %s350_s25 }
  0x17   : > { %s4482_s12 = sshll.u32 %s354_s29, 7  ;;  %v5361_v17 = vld [vmem:[%s7098_s2 + $0x30] sm:$0xff]   ;;  %v5363_v23 = vld [vmem:[%s7098_s2 + $0x28] sm:$0xff]   ;;  %v5364_v30 = vld [vmem:[%s7098_s2 + $0x60] sm:$0xff]   ;;  %823 = vst [vmem:[#allocation2 + $0x8] sm:$0xff] %v5533_v34  ;;  %s6940_s29 = scalar_lea.vmem [#allocation3], %s4236_s28 }
  0x18   : > { %s5655_s21 = scalar_lea.vmem %s7096_s0, %s4482_s12  ;;  %v5366_v31 = vld [vmem:[%s7098_s2 + $0x58] sm:$0xff]   ;;  %v5365_v32 = vld [vmem:[%s7098_s2 + $0x20] sm:$0xff]   ;;  %v5368_v33 = vld [vmem:[%s7098_s2 + $0x50] sm:$0xff]   ;;  %824 = vst [vmem:[#allocation2 + $0x10] sm:$0x3] %v5533_v34  ;;  %s4170_s30 = sshll.u32 %s6940_s29, 4  ;;  %s7050_s30 = int_to_ptr.vmem [resolvable:$true] %s4170_s30 }
  0x19   : > { %4751 = vmatpush3.bf16.msra.mxu0 %v5335_v1  ;;  %5285 = vmatpush3.bf16.msra.mxu1 %v5335_v1  ;;  %v359_v4 = vld [vmem:[%s5655_s21] sm:$0xff]   ;;  %v361_v10 = vld [vmem:[%s5655_s21 + $0x8] sm:$0xff]   ;;  %v363_v11 = vld [vmem:[%s5655_s21 + $0x10] sm:$0xff]   ;;  %825 = vst [vmem:[#allocation2 + $0x18] sm:$0xff] %v5533_v34  ;;  %s5475_s27 = sshll.u32 %s5535_s26, 4  ;;  %s5476_s27 = int_to_ptr.vmem [resolvable:$false] %s5475_s27 }
  0x1a   : > { %4752 = vmatprep.subr.bf16.mxu0 %v5336_v2  ;;  %5278 = vmatprep.subr.bf16.mxu1 %v5336_v2  ;;  %v375_v6 = vld [vmem:[%s5655_s21 + $0x40] sm:$0xff]   ;;  %v377_v12 = vld [vmem:[%s5655_s21 + $0x48] sm:$0xff]   ;;  %v379_v14 = vld [vmem:[%s5655_s21 + $0x50] sm:$0xff]   ;;  %826 = vst [vmem:[#allocation2 + $0x20] sm:$0xff] %v5533_v34  ;;  %s5477_s28 = scalar_lea.vmem %s5476_s27, 8192  ;;  %p5478_p0 = scmp.lt.s32.totalorder %s7050_s30, %s5476_s27 }
  0x1b   : > { %4764 = vmatprep.mubr.bf16.mxu0 %v359_v4  ;;  %4780 = vmatprep.mubr.bf16.mxu1 %v375_v6  ;;  %v365_v18 = vld [vmem:[%s5655_s21 + $0x18] sm:$0xff]   ;;  %v367_v19 = vld [vmem:[%s5655_s21 + $0x20] sm:$0xff]   ;;  %v369_v24 = vld [vmem:[%s5655_s21 + $0x28] sm:$0xff]   ;;  %827 = vst [vmem:[#allocation2 + $0x28] sm:$0x3] %v5533_v34 }
  0x1c   : > { %v381_v20 = vld [vmem:[%s5655_s21 + $0x58] sm:$0xff]   ;;  %v383_v21 = vld [vmem:[%s5655_s21 + $0x60] sm:$0xff]   ;;  %v371_v25 = vld [vmem:[%s5655_s21 + $0x30] sm:$0xff]   ;;  %830 = vst [vmem:[#allocation2 + $0x40] sm:$0x3] %v5533_v34 }
  0x1d   : > { %4753 = vmatpush3.bf16.msra.mxu0 %v5336_v2  ;;  %5286 = vmatpush3.bf16.msra.mxu1 %v5336_v2  ;;  %v385_v26 = vld [vmem:[%s5655_s21 + $0x68] sm:$0xff]   ;;  %v387_v27 = vld [vmem:[%s5655_s21 + $0x70] sm:$0xff]   ;;  %v373_v28 = vld [vmem:[%s5655_s21 + $0x38] sm:$0xff]   ;;  %831 = vst [vmem:[#allocation2 + $0x48] sm:$0xff] %v5533_v34 }
  0x1e   : > { %4754 = vmatprep.subr.bf16.mxu0 %v5337_v3  ;;  %5279 = vmatprep.subr.bf16.mxu1 %v5337_v3  ;;  %v389_v29 = vld [vmem:[%s5655_s21 + $0x78] sm:$0xff]   ;;  %832 = vst [vmem:[#allocation2 + $0x50] sm:$0xff] %v5533_v34  ;;  %833 = vst [vmem:[#allocation2 + $0x58] sm:$0x3] %v5533_v34  ;;  %v5370_v36 = vld [vmem:[%s7098_s2 + $0x48] sm:$0xff]  }
  0x1f   : > { %834 = vst [vmem:[#allocation2 + $0x60] sm:$0xff] %v5533_v34  ;;  %835 = vst [vmem:[#allocation2 + $0x68] sm:$0xff] %v5533_v34  ;;  %v5367_v35 = vld [vmem:[%s7098_s2 + $0x18] sm:$0xff]   ;;  %v5369_v37 = vld [vmem:[%s7098_s2 + $0x10] sm:$0xff]  }
  0x20   : > { %836 = vst [vmem:[#allocation2 + $0x70] sm:$0x3] %v5533_v34  ;;  %837 = vst [vmem:[#allocation2 + $0x78] sm:$0xff] %v5533_v34  ;;  %v5372_v38 = vld [vmem:[%s7098_s2 + $0x40] sm:$0xff]   ;;  %v974_v40 = vld [vmem:[#allocation2 + $0x9] sm:$0xff] }
  0x21   : > { %4755 = vmatpush3.bf16.msra.mxu0 %v5337_v3  ;;  %5287 = vmatpush3.bf16.msra.mxu1 %v5337_v3  ;;  %838 = vst [vmem:[#allocation2 + $0x80] sm:$0xff] %v5533_v34  ;;  %839 = vst [vmem:[#allocation2 + $0x88] sm:$0x3] %v5533_v34  ;;  %v973_v39 = vld [vmem:[#allocation2 + $0x1] sm:$0xff]  ;;  %v5739_v45 = vld [vmem:[%s7098_s2 + $0xb8] sm:$0xff]  }
  0x22   : > { %4756 = vmatprep.subr.bf16.mxu0 %v5338_v5  ;;  %5280 = vmatprep.subr.bf16.mxu1 %v5338_v5  ;;  %840 = vst [vmem:[#allocation2 + $0x90] sm:$0xff] %v5533_v34  ;;  %841 = vst [vmem:[#allocation2 + $0x98] sm:$0xff] %v5533_v34  ;;  %v1005_v41 = vpack.c.bf16 %v974_v40, %v973_v39  ;;  %v5371_v42 = vld [vmem:[%s7098_s2 + $0x8] sm:$0xff]   ;;  %v5373_v43 = vld [vmem:[%s7098_s2] sm:$0xff]  }
  0x23   : > { %842 = vst [vmem:[#allocation2 + $0xa0] sm:$0x3] %v5533_v34  ;;  %843 = vst [vmem:[#allocation2 + $0xa8] sm:$0xff] %v5533_v34  ;;  %v5745_v46 = vld [vmem:[%s7098_s2 + $0xf8] sm:$0xff]   ;;  %v5751_v47 = vld [vmem:[%s7100_s4] ss:$0 sm:$0xff] }
  0x24   : > { %844 = vst [vmem:[#allocation2 + $0xb0] sm:$0xff] %v5533_v34  ;;  %845 = vst [vmem:[#allocation2 + $0xb8] sm:$0x3] %v5533_v34  ;;  %v5756_v49 = vld [vmem:[%s7101_s5] ss:$0 sm:$0xff] }
  0x25   : > { %4757 = vmatpush3.bf16.msra.mxu0 %v5338_v5  ;;  %5288 = vmatpush3.bf16.msra.mxu1 %v5338_v5  ;;  %846 = vst [vmem:[#allocation2 + $0xc0] sm:$0xff] %v5533_v34  ;;  %847 = vst [vmem:[#allocation2 + $0xc8] sm:$0xff] %v5533_v34 }
  0x26   : > { %4758 = vmatprep.subr.bf16.mxu0 %v5339_v7  ;;  %5281 = vmatprep.subr.bf16.mxu1 %v5339_v7  ;;  %848 = vst [vmem:[#allocation2 + $0xd0] sm:$0x3] %v5533_v34  ;;  %849 = vst [vmem:[#allocation2 + $0xd8] sm:$0xff] %v5533_v34 }
  0x27   : > { %850 = vst [vmem:[#allocation2 + $0xe0] sm:$0xff] %v5533_v34  ;;  %851 = vst [vmem:[#allocation2 + $0xe8] sm:$0x3] %v5533_v34 }
  0x28   : > { %852 = vst [vmem:[#allocation2 + $0xf0] sm:$0xff] %v5533_v34  ;;  %853 = vst [vmem:[#allocation2 + $0xf8] sm:$0xff] %v5533_v34 }
  0x29   : > { %4759 = vmatpush3.bf16.msra.mxu0 %v5339_v7  ;;  %5289 = vmatpush3.bf16.msra.mxu1 %v5339_v7  ;;  %854 = vst [vmem:[#allocation2 + $0x100] sm:$0x3] %v5533_v34  ;;  %855 = vst [vmem:[#allocation2 + $0x108] sm:$0xff] %v5533_v34 }
  0x2a   : > { %4760 = vmatprep.subr.bf16.mxu0 %v5340_v8  ;;  %5282 = vmatprep.subr.bf16.mxu1 %v5340_v8  ;;  %856 = vst [vmem:[#allocation2 + $0x110] sm:$0xff] %v5533_v34  ;;  %857 = vst [vmem:[#allocation2 + $0x118] sm:$0x3] %v5533_v34 }
  0x2b   : > { %858 = vst [vmem:[#allocation2 + $0x120] sm:$0xff] %v5533_v34  ;;  %859 = vst [vmem:[#allocation2 + $0x128] sm:$0xff] %v5533_v34 }
  0x2c   : > { %860 = vst [vmem:[#allocation2 + $0x130] sm:$0x3] %v5533_v34  ;;  %861 = vst [vmem:[#allocation2 + $0x138] sm:$0xff] %v5533_v34 }
  0x2d   : > { %4761 = vmatpush3.bf16.msra.mxu0 %v5340_v8  ;;  %5290 = vmatpush3.bf16.msra.mxu1 %v5340_v8  ;;  %862 = vst [vmem:[#allocation2 + $0x140] sm:$0xff] %v5533_v34  ;;  %863 = vst [vmem:[#allocation2 + $0x148] sm:$0x3] %v5533_v34 }
  0x2e   : > { %4762 = vmatprep.subr.bf16.mxu0 %v5341_v9  ;;  %5283 = vmatprep.subr.bf16.mxu1 %v5341_v9  ;;  %864 = vst [vmem:[#allocation2 + $0x150] sm:$0xff] %v5533_v34  ;;  %865 = vst [vmem:[#allocation2 + $0x158] sm:$0xff] %v5533_v34 }
  0x2f   : > { %866 = vst [vmem:[#allocation2 + $0x160] sm:$0x3] %v5533_v34  ;;  %867 = vst [vmem:[#allocation2 + $0x168] sm:$0xff] %v5533_v34 }
  0x30   : > { %868 = vst [vmem:[#allocation2 + $0x170] sm:$0xff] %v5533_v34  ;;  %869 = vst [vmem:[#allocation2 + $0x178] sm:$0x3] %v5533_v34 }
  0x31   : > { %4763 = vmatpush3.bf16.msra.mxu0 %v5341_v9  ;;  %5291 = vmatpush3.bf16.msra.mxu1 %v5341_v9  ;;  %870 = vst [vmem:[#allocation2 + $0x180] sm:$0xff] %v5533_v34  ;;  %871 = vst [vmem:[#allocation2 + $0x188] sm:$0xff] %v5533_v34 }
  0x32   : > { %4844 = vmatprep.subr.bf16.mxu0 %v5359_v13  ;;  %4796 = vmatprep.subr.bf16.mxu1 %v5358_v15  ;;  %872 = vst [vmem:[#allocation2 + $0x190] sm:$0x3] %v5533_v34  ;;  %873 = vst [vmem:[#allocation2 + $0x198] sm:$0xff] %v5533_v34 }
  0x33   : > { %874 = vst [vmem:[#allocation2 + $0x1a0] sm:$0xff] %v5533_v34  ;;  %875 = vst [vmem:[#allocation2 + $0x1a8] sm:$0x3] %v5533_v34 }
  0x34   : > { %4765 = vmatmul.mubr.bf16.vlgmr.msra.gmra.mxu0 %v361_v10  ;;  %4781 = vmatmul.mubr.bf16.vlgmr.msra.gmra.mxu1 %v377_v12 }
  0x35   : > { %4768 = vmatprep.mubr.bf16.mxu0 %v363_v11  ;;  %4784 = vmatprep.mubr.bf16.mxu1 %v379_v14 }
  0x36   : > { %4797 = vmatpush3.bf16.msra.mxu1 %v5358_v15  ;;  %4845 = vmatpush3.bf16.msra.mxu0 %v5359_v13 }
  0x37   : > { %4798 = vmatprep.subr.bf16.mxu1 %v5360_v16  ;;  %4846 = vmatprep.subr.bf16.mxu0 %v5361_v17 }
  0x3a   : > { %4799 = vmatpush3.bf16.msra.mxu1 %v5360_v16  ;;  %4847 = vmatpush3.bf16.msra.mxu0 %v5361_v17 }
  0x3b   : > { %4800 = vmatprep.subr.bf16.mxu1 %v5362_v22  ;;  %4848 = vmatprep.subr.bf16.mxu0 %v5363_v23 }
  0x3c   : > { %4769 = vmatmul.mubr.bf16.gmra.mxu0 %v365_v18  ;;  %4785 = vmatmul.mubr.bf16.gmra.mxu1 %v381_v20 }
  0x3d   : > { %4772 = vmatprep.mubr.bf16.mxu0 %v367_v19  ;;  %4788 = vmatprep.mubr.bf16.mxu1 %v383_v21 }
  0x3e   : > { %4801 = vmatpush3.bf16.msra.mxu1 %v5362_v22  ;;  %4849 = vmatpush3.bf16.msra.mxu0 %v5363_v23 }
  0x3f   : > { %4802 = vmatprep.subr.bf16.mxu1 %v5364_v30  ;;  %4850 = vmatprep.subr.bf16.mxu0 %v5365_v32 }
  0x42   : > { %4803 = vmatpush3.bf16.msra.mxu1 %v5364_v30  ;;  %4851 = vmatpush3.bf16.msra.mxu0 %v5365_v32  ;;  %v5375_v32 = vld [vmem:[%s7098_s2 + $0xb0] sm:$0xff]  }
  0x43   : > { %4804 = vmatprep.subr.bf16.mxu1 %v5366_v31  ;;  %4852 = vmatprep.subr.bf16.mxu0 %v5367_v35 }
  0x44   : > { %4773 = vmatmul.mubr.bf16.gmra.mxu0 %v369_v24  ;;  %4789 = vmatmul.mubr.bf16.gmra.mxu1 %v385_v26 }
  0x45   : > { %4776 = vmatprep.mubr.bf16.mxu0 %v371_v25  ;;  %4792 = vmatprep.mubr.bf16.mxu1 %v387_v27 }
  0x46   : > { %4805 = vmatpush3.bf16.msra.mxu1 %v5366_v31  ;;  %4853 = vmatpush3.bf16.msra.mxu0 %v5367_v35 }
  0x47   : > { %4806 = vmatprep.subr.bf16.mxu1 %v5368_v33  ;;  %4854 = vmatprep.subr.bf16.mxu0 %v5369_v37 }
  0x4a   : > { %4807 = vmatpush3.bf16.msra.mxu1 %v5368_v33  ;;  %4855 = vmatpush3.bf16.msra.mxu0 %v5369_v37 }
  0x4b   : > { %4808 = vmatprep.subr.bf16.mxu1 %v5370_v36  ;;  %4856 = vmatprep.subr.bf16.mxu0 %v5371_v42 }
  0x4c   : > { %4777 = vmatmul.mubr.bf16.gmra.mxu0 %v373_v28  ;;  %4793 = vmatmul.mubr.bf16.gmra.mxu1 %v389_v29 }
  0x4d   : > { %4812 = vmatprep.mubr.bf16.mxu1 %v1005_v41  ;;  %4860 = vmatprep.mubr.bf16.mxu0 %v5534_v44 }
  0x4e   : > { %4809 = vmatpush3.bf16.msra.mxu1 %v5370_v36  ;;  %4857 = vmatpush3.bf16.msra.mxu0 %v5371_v42 }
  0x4f   : > { %4810 = vmatprep.subr.bf16.mxu1 %v5372_v38  ;;  %4858 = vmatprep.subr.bf16.mxu0 %v5373_v43 }
  0x52   : > { %4811 = vmatpush3.bf16.msra.mxu1 %v5372_v38  ;;  %4859 = vmatpush3.bf16.msra.mxu0 %v5373_v43 }
  0x53   : > { %4892 = vmatprep.subr.bf16.mxu1 %v5739_v45  ;;  %4940 = vmatprep.subr.bf16.mxu0 %v5745_v46 }
  0xf4   : > { %v4766_v48 = vpop.f32.mrf.mxu0  ;;  %v4782_v51 = vpop.f32.mrf.mxu1 }
  0xf5   : > { %v721_v50 = vmul.f32 %v4766_v48, %v5751_v47  ;;  %v737_v53 = vmul.f32 %v4782_v51, %v5751_v47 }
  0xf6   : > { %v585_v52 = vpop.f32.mrf.mxu0  ;;  %v649_v56 = vpop.f32.mrf.mxu1 }
  0xf7   : > { %v760_v54 = vadd.f32 %v5756_v49, %v721_v50  ;;  %v719_v55 = vmul.f32 %v5751_v47, %v585_v52  ;;  %v5763_v58 = vadd.f32 %v5756_v49, %v737_v53  ;;  %v735_v59 = vmul.f32 %v5751_v47, %v649_v56 }
  0xf8   : > { %v4767_v57 = vpop.f32.mrf.mxu0  ;;  %v4783_v63 = vpop.f32.mrf.mxu1 }
  0xf9   : > { %v792_v60 = vmax.f32 %v760_v54, 0.0  ;;  %v758_v61 = vadd.f32 %v5756_v49, %v719_v55  ;;  %v722_v62 = vmul.f32 %v4767_v57, %v5751_v47  ;;  %v808_v1 = vmax.f32 %v5763_v58, 0.0  ;;  %v5996_v58 = vld [vmem:[%s7098_s2 + $0x178] sm:$0xff]  }
  0xfa   : > { %v588_v0 = vpop.f32.mrf.mxu0  ;;  %v5770_v2 = vadd.f32 %v5756_v49, %v735_v59  ;;  %v738_v3 = vmul.f32 %v4783_v63, %v5751_v47  ;;  %v652_v7 = vpop.f32.mrf.mxu1 }
  0xfb   : > { %879 = vst [vmem:[#allocation2 + $0x31] sm:$0xff] %v792_v60  ;;  %v790_v4 = vmax.f32 %v758_v61, 0.0  ;;  %v761_v5 = vadd.f32 %v5756_v49, %v722_v62  ;;  %v720_v6 = vmul.f32 %v5751_v47, %v588_v0  ;;  %895 = vst [vmem:[#allocation2 + $0xf1] sm:$0xff] %v808_v1  ;;  %v736_v11 = vmul.f32 %v5751_v47, %v652_v7 }
  0xfc   : > { %v4770_v8 = vpop.f32.mrf.mxu0  ;;  %v806_v9 = vmax.f32 %v5770_v2, 0.0  ;;  %v5779_v10 = vadd.f32 %v5756_v49, %v738_v3  ;;  %v4786_v15 = vpop.f32.mrf.mxu1 }
  0xfd   : > { %877 = vst [vmem:[#allocation2 + $0x19] sm:$0xff] %v790_v4  ;;  %v793_v12 = vmax.f32 %v761_v5, 0.0  ;;  %v759_v13 = vadd.f32 %v5756_v49, %v720_v6  ;;  %v725_v14 = vmul.f32 %v4770_v8, %v5751_v47  ;;  %v5788_v18 = vadd.f32 %v5756_v49, %v736_v11 }
  0xfe   : > { %v601_v16 = vpop.f32.mrf.mxu0  ;;  %893 = vst [vmem:[#allocation2 + $0xd9] sm:$0xff] %v806_v9  ;;  %v809_v17 = vmax.f32 %v5779_v10, 0.0  ;;  %v741_v19 = vmul.f32 %v4786_v15, %v5751_v47  ;;  %v665_v23 = vpop.f32.mrf.mxu1 }
  0xff   : > { %880 = vst [vmem:[#allocation2 + $0x39] sm:$0xff] %v793_v12  ;;  %v791_v20 = vmax.f32 %v759_v13, 0.0  ;;  %v5792_v21 = vadd.f32 %v5756_v49, %v725_v14  ;;  %v723_v22 = vmul.f32 %v5751_v47, %v601_v16  ;;  %v807_v25 = vmax.f32 %v5788_v18, 0.0 }
 0x100   : > { %v4771_v24 = vpop.f32.mrf.mxu0  ;;  %896 = vst [vmem:[#allocation2 + $0xf9] sm:$0xff] %v809_v17  ;;  %v5799_v26 = vadd.f32 %v5756_v49, %v741_v19  ;;  %v739_v27 = vmul.f32 %v5751_v47, %v665_v23  ;;  %v4787_v33 = vpop.f32.mrf.mxu1  ;;  %v1007_v35 = vpack.c.bf16 %v793_v12, %v792_v60 }
 0x101   : > { %878 = vst [vmem:[#allocation2 + $0x21] sm:$0xff] %v791_v20  ;;  %v796_v28 = vmax.f32 %v5792_v21, 0.0  ;;  %v762_v29 = vadd.f32 %v5756_v49, %v723_v22  ;;  %v726_v30 = vmul.f32 %v4771_v24, %v5751_v47  ;;  %v1006_v31 = vpack.c.bf16 %v791_v20, %v790_v4  ;;  %894 = vst [vmem:[#allocation2 + $0xe1] sm:$0xff] %v807_v25 }
 0x102   : > { %v604_v34 = vpop.f32.mrf.mxu0  ;;  %v812_v36 = vmax.f32 %v5799_v26, 0.0  ;;  %v5812_v37 = vadd.f32 %v5756_v49, %v739_v27  ;;  %v742_v38 = vmul.f32 %v4787_v33, %v5751_v47  ;;  %v668_v42 = vpop.f32.mrf.mxu1  ;;  %v913_v0 = vld [vmem:[#allocation2 + $0x30] sm:$0xff] }
 0x103   : > { %883 = vst [vmem:[#allocation2 + $0x61] sm:$0xff] %v796_v28  ;;  %v794_v39 = vmax.f32 %v762_v29, 0.0  ;;  %v765_v40 = vadd.f32 %v5756_v49, %v726_v30  ;;  %v724_v41 = vmul.f32 %v5751_v47, %v604_v34  ;;  %4813 = vmatmul.mubr.bf16.vlgmr.msra.gmra.mxu1 %v1006_v31  ;;  %v740_v50 = vmul.f32 %v5751_v47, %v668_v42  ;;  %v5377_v29 = vld [vmem:[%s7098_s2 + $0xa0] sm:$0xff]   ;;  %v929_v18 = vld [vmem:[#allocation2 + $0xf0] sm:$0xff] }
 0x104   : > { %v4774_v43 = vpop.f32.mrf.mxu0  ;;  %4893 = vmatpush3.bf16.msra.mxu1 %v5739_v45  ;;  %4816 = vmatprep.mubr.bf16.mxu1 %v1007_v35  ;;  %899 = vst [vmem:[#allocation2 + $0x121] sm:$0xff] %v812_v36  ;;  %v810_v44 = vmax.f32 %v5812_v37, 0.0  ;;  %v5824_v48 = vadd.f32 %v5756_v49, %v742_v38  ;;  %v5376_v45 = vld [vmem:[%s7098_s2 + $0xa8] sm:$0xff]   ;;  %v4790_v54 = vpop.f32.mrf.mxu1  ;;  %v911_v5 = vld [vmem:[#allocation2 + $0x18] sm:$0xff]  ;;  %v5380_v35 = vld [vmem:[%s7098_s2 + $0xf0] sm:$0xff]  }
 0x105   : > { %881 = vst [vmem:[#allocation2 + $0x49] sm:$0xff] %v794_v39  ;;  %v797_v51 = vmax.f32 %v765_v40, 0.0  ;;  %v763_v52 = vadd.f32 %v5756_v49, %v724_v41  ;;  %v729_v53 = vmul.f32 %v4774_v43, %v5751_v47  ;;  %4894 = vmatprep.subr.bf16.mxu1 %v5375_v32  ;;  %v779_v59 = vadd.f32 %v5756_v49, %v740_v50  ;;  %v927_v2 = vld [vmem:[#allocation2 + $0xd8] sm:$0xff] }
 0x106   : > { %v617_v55 = vpop.f32.mrf.mxu0  ;;  %v914_v56 = vld [vmem:[#allocation2 + $0x38] sm:$0xff]  ;;  %897 = vst [vmem:[#allocation2 + $0x109] sm:$0xff] %v810_v44  ;;  %v813_v57 = vmax.f32 %v5824_v48, 0.0  ;;  %v745_v60 = vmul.f32 %v4790_v54, %v5751_v47  ;;  %v681_v3 = vpop.f32.mrf.mxu1  ;;  %v1456_v48 = vld [vmem:[#allocation2 + $0x2] sm:$0xff] }
 0x107   : > { %884 = vst [vmem:[#allocation2 + $0x69] sm:$0xff] %v797_v51  ;;  %v795_v61 = vmax.f32 %v763_v52, 0.0  ;;  %v5838_v62 = vadd.f32 %v5756_v49, %v729_v53  ;;  %v727_v63 = vmul.f32 %v5751_v47, %v617_v55  ;;  %v5841_v7 = vpack.c.bf16 %v914_v56, %v913_v0  ;;  %v5378_v55 = vld [vmem:[%s7098_s2 + $0x98] sm:$0xff]  }
 0x108   : > { %v4775_v4 = vpop.f32.mrf.mxu0  ;;  %v912_v6 = vld [vmem:[#allocation2 + $0x20] sm:$0xff]  ;;  %4895 = vmatpush3.bf16.msra.mxu1 %v5375_v32  ;;  %900 = vst [vmem:[#allocation2 + $0x129] sm:$0xff] %v813_v57  ;;  %v5845_v8 = vmax.f32 %v779_v59, 0.0  ;;  %v5848_v11 = vadd.f32 %v5756_v49, %v745_v60  ;;  %v743_v12 = vmul.f32 %v5751_v47, %v681_v3  ;;  %v4791_v19 = vpop.f32.mrf.mxu1  ;;  %v1009_v33 = vpack.c.bf16 %v797_v51, %v796_v28 }
 0x109   : > { %882 = vst [vmem:[#allocation2 + $0x51] sm:$0xff] %v795_v61  ;;  %v800_v13 = vmax.f32 %v5838_v62, 0.0  ;;  %v5853_v14 = vadd.f32 %v5756_v49, %v727_v63  ;;  %v730_v15 = vmul.f32 %v4775_v4, %v5751_v47  ;;  %v5856_v16 = vpack.c.bf16 %v912_v6, %v911_v5  ;;  %4896 = vmatprep.subr.bf16.mxu1 %v5376_v45  ;;  %v5382_v63 = vld [vmem:[%s7098_s2 + $0xe8] sm:$0xff]  }
 0x10a   : > { %v620_v20 = vpop.f32.mrf.mxu0  ;;  %v1008_v22 = vpack.c.bf16 %v795_v61, %v794_v39  ;;  %898 = vst [vmem:[#allocation2 + $0x111] sm:$0xff] %v5845_v8  ;;  %v816_v23 = vmax.f32 %v5848_v11, 0.0  ;;  %v5861_v24 = vadd.f32 %v5756_v49, %v743_v12  ;;  %v746_v27 = vmul.f32 %v4791_v19, %v5751_v47  ;;  %v684_v34 = vpop.f32.mrf.mxu1  ;;  %v917_v60 = vld [vmem:[#allocation2 + $0x60] sm:$0xff] }
 0x10b   : > { %887 = vst [vmem:[#allocation2 + $0x91] sm:$0xff] %v800_v13  ;;  %v798_v30 = vmax.f32 %v5853_v14, 0.0  ;;  %v5871_v31 = vadd.f32 %v5756_v49, %v730_v15  ;;  %v728_v32 = vmul.f32 %v5751_v47, %v620_v20  ;;  %4861 = vmatmul.mubr.bf16.vlgmr.msra.gmra.mxu0 %v5856_v16  ;;  %v744_v21 = vmul.f32 %v5751_v47, %v684_v34 }
 0x10c   : > { %v4778_v38 = vpop.f32.mrf.mxu0  ;;  %4864 = vmatprep.mubr.bf16.mxu0 %v5841_v7  ;;  %4817 = vmatmul.mubr.bf16.gmra.mxu1 %v1008_v22  ;;  %903 = vst [vmem:[#allocation2 + $0x151] sm:$0xff] %v816_v23  ;;  %v814_v39 = vmax.f32 %v5861_v24, 0.0  ;;  %v5885_v40 = vadd.f32 %v5756_v49, %v746_v27  ;;  %v4794_v43 = vpop.f32.mrf.mxu1  ;;  %v915_v3 = vld [vmem:[#allocation2 + $0x48] sm:$0xff] }
 0x10d   : > { %885 = vst [vmem:[#allocation2 + $0x79] sm:$0xff] %v798_v30  ;;  %v801_v28 = vmax.f32 %v5871_v31, 0.0  ;;  %v767_v41 = vadd.f32 %v5756_v49, %v728_v32  ;;  %v733_v42 = vmul.f32 %v4778_v38, %v5751_v47  ;;  %4820 = vmatprep.mubr.bf16.mxu1 %v1009_v33  ;;  %4897 = vmatpush3.bf16.msra.mxu1 %v5376_v45  ;;  %v5381_v38 = vld [vmem:[%s7098_s2 + $0x90] sm:$0xff]  }
 0x10e   : > { %v633_v50 = vpop.f32.mrf.mxu0  ;;  %v918_v51 = vld [vmem:[#allocation2 + $0x68] sm:$0xff]  ;;  %901 = vst [vmem:[#allocation2 + $0x139] sm:$0xff] %v814_v39  ;;  %v817_v52 = vmax.f32 %v5885_v40, 0.0  ;;  %4898 = vmatprep.subr.bf16.mxu1 %v5377_v29  ;;  %v783_v53 = vadd.f32 %v5756_v49, %v744_v21  ;;  %v749_v54 = vmul.f32 %v4794_v43, %v5751_v47  ;;  %4941 = vmatpush3.bf16.msra.mxu0 %v5745_v46  ;;  %v697_v61 = vpop.f32.mrf.mxu1 }
 0x10f   : > { %888 = vst [vmem:[#allocation2 + $0x99] sm:$0xff] %v801_v28  ;;  %v799_v45 = vmax.f32 %v767_v41, 0.0  ;;  %v5901_v56 = vadd.f32 %v5756_v49, %v733_v42  ;;  %v731_v59 = vmul.f32 %v5751_v47, %v633_v50  ;;  %4942 = vmatprep.subr.bf16.mxu0 %v5380_v35  ;;  %v5907_v5 = vpack.c.bf16 %v918_v51, %v917_v60  ;;  %v934_v37 = vld [vmem:[#allocation2 + $0x128] sm:$0xff] }
 0x110   : > { %v4779_v0 = vpop.f32.mrf.mxu0  ;;  %v916_v4 = vld [vmem:[#allocation2 + $0x50] sm:$0xff]  ;;  %904 = vst [vmem:[#allocation2 + $0x159] sm:$0xff] %v817_v52  ;;  %v5911_v46 = vmax.f32 %v783_v53, 0.0  ;;  %v788_v6 = vadd.f32 %v5756_v49, %v749_v54  ;;  %v747_v12 = vmul.f32 %v5751_v47, %v697_v61  ;;  %v4795_v22 = vpop.f32.mrf.mxu1  ;;  %v1011_v41 = vpack.c.bf16 %v801_v28, %v800_v13  ;;  %v5384_v54 = vld [vmem:[%s7098_s2 + $0x88] sm:$0xff]  }
 0x111   : > { %886 = vst [vmem:[#allocation2 + $0x81] sm:$0xff] %v799_v45  ;;  %v804_v14 = vmax.f32 %v5901_v56, 0.0  ;;  %v770_v15 = vadd.f32 %v5756_v49, %v731_v59  ;;  %v734_v19 = vmul.f32 %v4779_v0, %v5751_v47  ;;  %v5918_v20 = vpack.c.bf16 %v916_v4, %v915_v3  ;;  %4899 = vmatpush3.bf16.msra.mxu1 %v5377_v29  ;;  %v5387_v3 = vld [vmem:[%s7098_s2 + $0x80] sm:$0xff]  }
 0x112   : > { %v636_v27 = vpop.f32.mrf.mxu0  ;;  %v1010_v31 = vpack.c.bf16 %v799_v45, %v798_v30  ;;  %902 = vst [vmem:[#allocation2 + $0x141] sm:$0xff] %v5911_v46  ;;  %v820_v32 = vmax.f32 %v788_v6, 0.0  ;;  %v5922_v33 = vadd.f32 %v5756_v49, %v747_v12  ;;  %v750_v34 = vmul.f32 %v4795_v22, %v5751_v47  ;;  %4900 = vmatprep.subr.bf16.mxu1 %v5378_v55  ;;  %v700_v42 = vpop.f32.mrf.mxu1  ;;  %v921_v61 = vld [vmem:[#allocation2 + $0x90] sm:$0xff]  ;;  %v5970_v12 = vld [vmem:[%s7098_s2 + $0x138] sm:$0xff]  }
 0x113   : > { %4943 = vmatpush3.bf16.msra.mxu0 %v5380_v35  ;;  %891 = vst [vmem:[#allocation2 + $0xc1] sm:$0xff] %v804_v14  ;;  %v802_v21 = vmax.f32 %v770_v15, 0.0  ;;  %v773_v29 = vadd.f32 %v5756_v49, %v734_v19  ;;  %v732_v30 = vmul.f32 %v5751_v47, %v636_v27  ;;  %v5383_v35 = vld [vmem:[%s7098_s2 + $0xe0] sm:$0xff]   ;;  %v748_v51 = vmul.f32 %v5751_v47, %v700_v42  ;;  %v5386_v6 = vld [vmem:[%s7098_s2 + $0xd0] sm:$0xff]  }
 0x114   : > { %4865 = vmatmul.mubr.bf16.gmra.mxu0 %v5918_v20  ;;  %4944 = vmatprep.subr.bf16.mxu0 %v5382_v63  ;;  %907 = vst [vmem:[#allocation2 + $0x181] sm:$0xff] %v820_v32  ;;  %v818_v43 = vmax.f32 %v5922_v33, 0.0  ;;  %v789_v50 = vadd.f32 %v5756_v49, %v750_v34  ;;  %v919_v56 = vld [vmem:[#allocation2 + $0x78] sm:$0xff]  ;;  %v1014_v34 = vpack.c.bf16 %v807_v25, %v806_v9  ;;  %v928_v9 = vld [vmem:[#allocation2 + $0xe0] sm:$0xff] }
 0x115   : > { %4868 = vmatprep.mubr.bf16.mxu0 %v5907_v5  ;;  %4821 = vmatmul.mubr.bf16.gmra.mxu1 %v1010_v31  ;;  %889 = vst [vmem:[#allocation2 + $0xa9] sm:$0xff] %v802_v21  ;;  %v805_v53 = vmax.f32 %v773_v29, 0.0  ;;  %v771_v62 = vadd.f32 %v5756_v49, %v732_v30  ;;  %v5944_v28 = vadd.f32 %v5756_v49, %v748_v51  ;;  %v930_v25 = vld [vmem:[#allocation2 + $0xf8] sm:$0xff]  ;;  %v931_v30 = vld [vmem:[#allocation2 + $0x108] sm:$0xff]  ;;  %v933_v42 = vld [vmem:[#allocation2 + $0x120] sm:$0xff] }
 0x116   : > { %4824 = vmatprep.mubr.bf16.mxu1 %v1011_v41  ;;  %4901 = vmatpush3.bf16.msra.mxu1 %v5378_v55  ;;  %905 = vst [vmem:[#allocation2 + $0x169] sm:$0xff] %v818_v43  ;;  %v821_v13 = vmax.f32 %v789_v50, 0.0  ;;  %v922_v45 = vld [vmem:[#allocation2 + $0x98] sm:$0xff]  ;;  %v6000_v10 = vpack.c.bf16 %v930_v25, %v929_v18  ;;  %v1017_v29 = vpack.c.bf16 %v813_v57, %v812_v36  ;;  %v932_v41 = vld [vmem:[#allocation2 + $0x110] sm:$0xff] }
 0x117   : > { %4902 = vmatprep.subr.bf16.mxu1 %v5381_v38  ;;  %4945 = vmatpush3.bf16.msra.mxu0 %v5382_v63  ;;  %892 = vst [vmem:[#allocation2 + $0xc9] sm:$0xff] %v805_v53  ;;  %v803_v47 = vmax.f32 %v771_v62, 0.0  ;;  %v5385_v55 = vld [vmem:[%s7098_s2 + $0xd8] sm:$0xff]   ;;  %v819_v49 = vmax.f32 %v5944_v28, 0.0  ;;  %v5955_v0 = vpack.c.bf16 %v922_v45, %v921_v61  ;;  %v1013_v4 = vpack.c.bf16 %v805_v53, %v804_v14  ;;  %v5388_v14 = vld [vmem:[%s7098_s2 + $0xc8] sm:$0xff]   ;;  %v937_v53 = vld [vmem:[#allocation2 + $0x150] sm:$0xff] }
 0x118   : > { %4946 = vmatprep.subr.bf16.mxu0 %v5383_v35  ;;  %v920_v59 = vld [vmem:[#allocation2 + $0x80] sm:$0xff]  ;;  %908 = vst [vmem:[#allocation2 + $0x189] sm:$0xff] %v821_v13  ;;  %v1018_v26 = vpack.c.bf16 %v5911_v46, %v814_v39  ;;  %v1019_v36 = vpack.c.bf16 %v817_v52, %v816_v23  ;;  %v935_v57 = vld [vmem:[#allocation2 + $0x138] sm:$0xff]  ;;  %v1457_v51 = vld [vmem:[#allocation2 + $0xa] sm:$0xff] }
 0x119   : > { %890 = vst [vmem:[#allocation2 + $0xb1] sm:$0xff] %v803_v47  ;;  %v5953_v60 = vpack.c.bf16 %v920_v59, %v919_v56  ;;  %v1012_v63 = vpack.c.bf16 %v803_v47, %v802_v21  ;;  %906 = vst [vmem:[#allocation2 + $0x171] sm:$0xff] %v819_v49  ;;  %v5389_v21 = vld [vmem:[%s7098_s2 + $0xc0] sm:$0xff]   ;;  %v938_v62 = vld [vmem:[#allocation2 + $0x158] sm:$0xff]  ;;  %v1488_v39 = vpack.c.bf16 %v1457_v51, %v1456_v48 }
 0x11a   : > { %4903 = vmatpush3.bf16.msra.mxu1 %v5381_v38  ;;  %v925_v31 = vld [vmem:[#allocation2 + $0xc0] sm:$0xff]  ;;  %v1015_v38 = vpack.c.bf16 %v809_v17, %v808_v1  ;;  %v5998_v1 = vpack.c.bf16 %v928_v9, %v927_v2  ;;  %v1016_v17 = vpack.c.bf16 %v5845_v8, %v810_v44  ;;  %v6014_v44 = vpack.c.bf16 %v934_v37, %v933_v42  ;;  %v1460_v47 = vld [vmem:[#allocation2 + $0x32] sm:$0xff]  ;;  %v5392_v56 = vld [vmem:[%s7098_s2 + $0x128] sm:$0xff]  }
 0x11b   : > { %4947 = vmatpush3.bf16.msra.mxu0 %v5383_v35  ;;  %4904 = vmatprep.subr.bf16.mxu1 %v5384_v54  ;;  %v6012_v35 = vpack.c.bf16 %v932_v41, %v931_v30  ;;  %v936_v50 = vld [vmem:[#allocation2 + $0x140] sm:$0xff]  ;;  %v6027_v13 = vpack.c.bf16 %v938_v62, %v937_v53  ;;  %v6033_v11 = vpack.c.bf16 %v819_v49, %v818_v43  ;;  %v5391_v43 = vld [vmem:[%s7098_s2 + $0x130] sm:$0xff]   ;;  %v5401_v9 = vld [vmem:[%s7098_s2 + $0x158] sm:$0xff]  }
 0x11c   : > { %4869 = vmatmul.mubr.bf16.gmra.mxu0 %v5953_v60  ;;  %4948 = vmatprep.subr.bf16.mxu0 %v5385_v55  ;;  %v923_v19 = vld [vmem:[#allocation2 + $0xa8] sm:$0xff]  ;;  %v6025_v24 = vpack.c.bf16 %v936_v50, %v935_v57  ;;  %v1458_v52 = vld [vmem:[#allocation2 + $0x1a] sm:$0xff]  ;;  %v1463_v49 = vld [vmem:[#allocation2 + $0x52] sm:$0xff] }
 0x11d   : > { %4872 = vmatprep.mubr.bf16.mxu0 %v5955_v0  ;;  %4825 = vmatmul.mubr.bf16.gmra.mxu1 %v1012_v63  ;;  %v939_v23 = vld [vmem:[#allocation2 + $0x168] sm:$0xff]  ;;  %v1461_v45 = vld [vmem:[#allocation2 + $0x3a] sm:$0xff]  ;;  %v1479_v50 = vld [vmem:[#allocation2 + $0x112] sm:$0xff] }
 0x11e   : > { %4828 = vmatprep.mubr.bf16.mxu1 %v1013_v4  ;;  %4905 = vmatpush3.bf16.msra.mxu1 %v5384_v54  ;;  %v926_v15 = vld [vmem:[#allocation2 + $0xc8] sm:$0xff]  ;;  %v6046_v28 = vpack.c.bf16 %v1461_v45, %v1460_v47  ;;  %v1474_v30 = vld [vmem:[#allocation2 + $0xda] sm:$0xff] }
 0x11f   : > { %4949 = vmatpush3.bf16.msra.mxu0 %v5385_v55  ;;  %4906 = vmatprep.subr.bf16.mxu1 %v5387_v3  ;;  %v5977_v32 = vpack.c.bf16 %v926_v15, %v925_v31  ;;  %v1459_v54 = vld [vmem:[#allocation2 + $0x22] sm:$0xff]  ;;  %v1462_v59 = vld [vmem:[#allocation2 + $0x4a] sm:$0xff]  ;;  %v1477_v37 = vld [vmem:[#allocation2 + $0xfa] sm:$0xff] }
 0x120   : > { %4950 = vmatprep.subr.bf16.mxu0 %v5386_v6  ;;  %v924_v22 = vld [vmem:[#allocation2 + $0xb0] sm:$0xff]  ;;  %v6040_v33 = vpack.c.bf16 %v1459_v54, %v1458_v52  ;;  %v1464_v61 = vld [vmem:[#allocation2 + $0x62] sm:$0xff]  ;;  %v1485_v52 = vld [vmem:[#allocation2 + $0x15a] sm:$0xff] }
 0x121   : > { %v5975_v27 = vpack.c.bf16 %v924_v22, %v923_v19  ;;  %v940_v40 = vld [vmem:[#allocation2 + $0x170] sm:$0xff]  ;;  %v1467_v15 = vld [vmem:[#allocation2 + $0x82] sm:$0xff]  ;;  %v1469_v19 = vld [vmem:[#allocation2 + $0x9a] sm:$0xff] }
 0x122   : > { %4907 = vmatpush3.bf16.msra.mxu1 %v5387_v3  ;;  %v6038_v55 = vpack.c.bf16 %v940_v40, %v939_v23  ;;  %v1465_v63 = vld [vmem:[#allocation2 + $0x6a] sm:$0xff]  ;;  %v6055_v3 = vpack.c.bf16 %v1463_v49, %v1462_v59  ;;  %v1471_v2 = vld [vmem:[#allocation2 + $0xb2] sm:$0xff]  ;;  %v1472_v18 = vld [vmem:[#allocation2 + $0xc2] sm:$0xff] }
 0x123   : > { %4951 = vmatpush3.bf16.msra.mxu0 %v5386_v6  ;;  %4988 = vmatprep.subr.bf16.mxu1 %v5970_v12  ;;  %v6061_v4 = vpack.c.bf16 %v1465_v63, %v1464_v61  ;;  %v5396_v6 = vld [vmem:[%s7098_s2 + $0x170] sm:$0xff]   ;;  %v1475_v41 = vld [vmem:[#allocation2 + $0xe2] sm:$0xff]  ;;  %v2071_v49 = vld [vmem:[#allocation2 + $0x39] sm:$0xff] }
 0x124   : > { %4873 = vmatmul.mubr.bf16.gmra.mxu0 %v5975_v27  ;;  %4952 = vmatprep.subr.bf16.mxu0 %v5388_v14  ;;  %v5397_v31 = vld [vmem:[%s7098_s2 + $0x110] sm:$0xff]   ;;  %v5404_v42 = vld [vmem:[%s7098_s2 + $0x148] sm:$0xff]   ;;  %v5405_v48 = vld [vmem:[%s7098_s2 + $0x140] sm:$0xff]  }
 0x125   : > { %4876 = vmatprep.mubr.bf16.mxu0 %v5977_v32  ;;  %4829 = vmatmul.mubr.bf16.gmra.mxu1 %v1014_v34  ;;  %v1478_v57 = vld [vmem:[#allocation2 + $0x10a] sm:$0xff]  ;;  %v1480_v51 = vld [vmem:[#allocation2 + $0x122] sm:$0xff]  ;;  %v1484_v40 = vld [vmem:[#allocation2 + $0x152] sm:$0xff] }
 0x126   : > { %4832 = vmatprep.mubr.bf16.mxu1 %v1015_v38  ;;  %v5399_v38 = vld [vmem:[%s7098_s2 + $0x160] sm:$0xff]   ;;  %v1481_v53 = vld [vmem:[#allocation2 + $0x12a] sm:$0xff]  ;;  %v6135_v62 = vpack.c.bf16 %v1479_v50, %v1478_v57  ;;  %v6147_v47 = vpack.c.bf16 %v1485_v52, %v1484_v40 }
 0x127   : > { %4953 = vmatpush3.bf16.msra.mxu0 %v5388_v14  ;;  %v5398_v14 = vld [vmem:[%s7098_s2 + $0x168] sm:$0xff]   ;;  %v2073_v61 = vld [vmem:[#allocation2 + $0x51] sm:$0xff]  ;;  %v5421_v40 = vld [vmem:[%s7098_s2 + $0x1c0] sm:$0xff]  }
 0x128   : > { %4954 = vmatprep.subr.bf16.mxu0 %v5389_v21  ;;  %v1483_v23 = vld [vmem:[#allocation2 + $0x142] sm:$0xff]  ;;  %v5418_v50 = vld [vmem:[%s7098_s2 + $0x1d0] sm:$0xff]  }
 0x129   : > { %v2069_v45 = vld [vmem:[#allocation2 + $0x21] sm:$0xff] }
 0x12a   : > { %v2090_v52 = vld [vmem:[#allocation2 + $0x121] sm:$0xff] }
 0x12b   : > { %4955 = vmatpush3.bf16.msra.mxu0 %v5389_v21  ;;  %v1470_v21 = vld [vmem:[#allocation2 + $0xaa] sm:$0xff] }
 0x12c   : > { %4877 = vmatmul.mubr.bf16.gmra.mxu0 %v5998_v1  ;;  %5036 = vmatprep.subr.bf16.mxu0 %v5996_v58  ;;  %v6096_v25 = vpack.c.bf16 %v1471_v2, %v1470_v21  ;;  %v5410_v21 = vld [vmem:[%s7098_s2 + $0x198] sm:$0xff]   ;;  %v5414_v2 = vld [vmem:[%s7098_s2 + $0x1e8] sm:$0xff]  }
 0x12d   : > { %4880 = vmatprep.mubr.bf16.mxu0 %v6000_v10  ;;  %4833 = vmatmul.mubr.bf16.gmra.mxu1 %v1016_v17 }
 0x12e   : > { %4836 = vmatprep.mubr.bf16.mxu1 %v1017_v29  ;;  %v5402_v29 = vld [vmem:[%s7098_s2 + $0x150] sm:$0xff]  }
 0x134   : > { %4881 = vmatmul.mubr.bf16.gmra.mxu0 %v6012_v35 }
 0x135   : > { %4884 = vmatprep.mubr.bf16.mxu0 %v6014_v44  ;;  %4837 = vmatmul.mubr.bf16.gmra.mxu1 %v1018_v26  ;;  %v6118_v26 = vpack.c.bf16 %v1475_v41, %v1474_v30  ;;  %v2083_v30 = vld [vmem:[#allocation2 + $0xc9] sm:$0xff]  ;;  %v5417_v41 = vld [vmem:[%s7098_s2 + $0x1d8] sm:$0xff]  }
 0x136   : > { %4840 = vmatprep.mubr.bf16.mxu1 %v1019_v36 }
 0x13c   : > { %4885 = vmatmul.mubr.bf16.gmra.mxu0 %v6025_v24 }
 0x13d   : > { %4888 = vmatprep.mubr.bf16.mxu0 %v6027_v13  ;;  %4841 = vmatmul.mubr.bf16.gmra.mxu1 %v6033_v11 }
 0x13e   : > { %4908 = vmatprep.mubr.bf16.mxu1 %v1488_v39  ;;  %v1482_v39 = vld [vmem:[#allocation2 + $0x13a] sm:$0xff] }
 0x13f   : > { %v6144_v54 = vpack.c.bf16 %v1483_v23, %v1482_v39  ;;  %v6235_v39 = vld [vmem:[#allocation2 + $0x109] sm:$0xff] }
 0x140   : > { %v2110_v23 = vpack.c.bf16 %v5845_v8, %v6235_v39 }
 0x144   : > { %4889 = vmatmul.mubr.bf16.gmra.mxu0 %v6038_v55 }
 0x145   : > { %4956 = vmatprep.mubr.bf16.mxu0 %v5856_v16  ;;  %4909 = vmatmul.mubr.bf16.vlgmr.msra.gmra.mxu1 %v6040_v33  ;;  %v5393_v16 = vld [vmem:[%s7098_s2 + $0x120] sm:$0xff]  }
 0x146   : > { %4989 = vmatpush3.bf16.msra.mxu1 %v5970_v12  ;;  %4912 = vmatprep.mubr.bf16.mxu1 %v6046_v28  ;;  %v5394_v12 = vld [vmem:[%s7098_s2 + $0x118] sm:$0xff]  }
 0x147   : > { %4990 = vmatprep.subr.bf16.mxu1 %v5391_v43 }
 0x14a   : > { %4991 = vmatpush3.bf16.msra.mxu1 %v5391_v43 }
 0x14b   : > { %4992 = vmatprep.subr.bf16.mxu1 %v5392_v56 }
 0x14c   : > { %4957 = vmatmul.mubr.bf16.vlgmr.msra.gmra.mxu0 %v5841_v7  ;;  %v1466_v7 = vld [vmem:[#allocation2 + $0x7a] sm:$0xff] }
 0x14d   : > { %4960 = vmatprep.mubr.bf16.mxu0 %v5918_v20  ;;  %4913 = vmatmul.mubr.bf16.gmra.mxu1 %v6055_v3  ;;  %v1468_v20 = vld [vmem:[#allocation2 + $0x92] sm:$0xff]  ;;  %v6076_v22 = vpack.c.bf16 %v1467_v15, %v1466_v7  ;;  %v5408_v7 = vld [vmem:[%s7098_s2 + $0x1a8] sm:$0xff]  }
 0x14e   : > { %4916 = vmatprep.mubr.bf16.mxu1 %v6061_v4  ;;  %4993 = vmatpush3.bf16.msra.mxu1 %v5392_v56  ;;  %v6082_v34 = vpack.c.bf16 %v1469_v19, %v1468_v20  ;;  %v2068_v56 = vld [vmem:[#allocation2 + $0x19] sm:$0xff]  ;;  %v2075_v15 = vld [vmem:[#allocation2 + $0x69] sm:$0xff]  ;;  %v2074_v20 = vld [vmem:[#allocation2 + $0x61] sm:$0xff] }
 0x14f   : > { %4994 = vmatprep.subr.bf16.mxu1 %v5393_v16  ;;  %5037 = vmatpush3.bf16.msra.mxu0 %v5996_v58  ;;  %v5403_v58 = vld [vmem:[%s7098_s2 + $0x100] sm:$0xff]   ;;  %v2100_v59 = vpack.c.bf16 %v2069_v45, %v2068_v56  ;;  %v6174_v19 = vpack.c.bf16 %v2075_v15, %v2074_v20 }
 0x150   : > { %5038 = vmatprep.subr.bf16.mxu0 %v5396_v6  ;;  %v2095_v45 = vld [vmem:[#allocation2 + $0x159] sm:$0xff] }
 0x152   : > { %4995 = vmatpush3.bf16.msra.mxu1 %v5393_v16  ;;  %v2070_v16 = vld [vmem:[#allocation2 + $0x31] sm:$0xff] }
 0x153   : > { %4996 = vmatprep.subr.bf16.mxu1 %v5394_v12  ;;  %5039 = vmatpush3.bf16.msra.mxu0 %v5396_v6  ;;  %v6159_v6 = vpack.c.bf16 %v2071_v49, %v2070_v16  ;;  %v2684_v49 = vld [vmem:[#allocation2 + $0x50] sm:$0xff] }
 0x154   : > { %4961 = vmatmul.mubr.bf16.gmra.mxu0 %v5907_v5  ;;  %5040 = vmatprep.subr.bf16.mxu0 %v5398_v14  ;;  %v5400_v5 = vld [vmem:[%s7098_s2 + $0x108] sm:$0xff]  }
 0x155   : > { %4964 = vmatprep.mubr.bf16.mxu0 %v5953_v60  ;;  %4917 = vmatmul.mubr.bf16.gmra.mxu1 %v6076_v22  ;;  %v1473_v60 = vld [vmem:[#allocation2 + $0xca] sm:$0xff] }
 0x156   : > { %4920 = vmatprep.mubr.bf16.mxu1 %v6082_v34  ;;  %4997 = vmatpush3.bf16.msra.mxu1 %v5394_v12  ;;  %v6102_v17 = vpack.c.bf16 %v1473_v60, %v1472_v18  ;;  %v2072_v12 = vld [vmem:[#allocation2 + $0x49] sm:$0xff] }
 0x157   : > { %4998 = vmatprep.subr.bf16.mxu1 %v5397_v31  ;;  %5041 = vmatpush3.bf16.msra.mxu0 %v5398_v14  ;;  %v2077_v14 = vld [vmem:[#allocation2 + $0x81] sm:$0xff]  ;;  %v2080_v60 = vld [vmem:[#allocation2 + $0xa9] sm:$0xff] }
 0x158   : > { %5042 = vmatprep.subr.bf16.mxu0 %v5399_v38 }
 0x15a   : > { %4999 = vmatpush3.bf16.msra.mxu1 %v5397_v31  ;;  %v2076_v31 = vld [vmem:[#allocation2 + $0x79] sm:$0xff] }
 0x15b   : > { %5043 = vmatpush3.bf16.msra.mxu0 %v5399_v38  ;;  %5000 = vmatprep.subr.bf16.mxu1 %v5400_v5  ;;  %v6180_v38 = vpack.c.bf16 %v2077_v14, %v2076_v31  ;;  %v5424_v14 = vld [vmem:[%s7098_s2 + $0x228] sm:$0xff]   ;;  %v2688_v31 = vld [vmem:[#allocation2 + $0x80] sm:$0xff] }
 0x15c   : > { %4965 = vmatmul.mubr.bf16.gmra.mxu0 %v5955_v0  ;;  %5044 = vmatprep.subr.bf16.mxu0 %v5401_v9  ;;  %v6113_v0 = vld [vmem:[%s7098_s2 + $0x1b8] sm:$0xff]  }
 0x15d   : > { %4968 = vmatprep.mubr.bf16.mxu0 %v5975_v27  ;;  %4921 = vmatmul.mubr.bf16.gmra.mxu1 %v6096_v25  ;;  %v1476_v27 = vld [vmem:[#allocation2 + $0xf2] sm:$0xff] }
 0x15e   : > { %4924 = vmatprep.mubr.bf16.mxu1 %v6102_v17  ;;  %5001 = vmatpush3.bf16.msra.mxu1 %v5400_v5  ;;  %v6122_v36 = vpack.c.bf16 %v1477_v37, %v1476_v27  ;;  %v5412_v5 = vld [vmem:[%s7098_s2 + $0x1f0] sm:$0xff]   ;;  %v2085_v27 = vld [vmem:[#allocation2 + $0xe1] sm:$0xff] }
 0x15f   : > { %5045 = vmatpush3.bf16.msra.mxu0 %v5401_v9  ;;  %5002 = vmatprep.subr.bf16.mxu1 %v5403_v58  ;;  %v2081_v9 = vld [vmem:[#allocation2 + $0xb1] sm:$0xff] }
 0x160   : > { %5046 = vmatprep.subr.bf16.mxu0 %v5402_v29 }
 0x162   : > { %5003 = vmatpush3.bf16.msra.mxu1 %v5403_v58  ;;  %v5413_v58 = vld [vmem:[%s7098_s2 + $0x190] sm:$0xff]  }
 0x163   : > { %5047 = vmatpush3.bf16.msra.mxu0 %v5402_v29  ;;  %5084 = vmatprep.subr.bf16.mxu1 %v6113_v0  ;;  %v6201_v29 = vpack.c.bf16 %v2081_v9, %v2080_v60 }
 0x164   : > { %4969 = vmatmul.mubr.bf16.gmra.mxu0 %v5977_v32  ;;  %5048 = vmatprep.subr.bf16.mxu0 %v5404_v42  ;;  %v6133_v32 = vld [vmem:[%s7098_s2 + $0x1f8] sm:$0xff]  }
 0x165   : > { %4972 = vmatprep.mubr.bf16.mxu0 %v5998_v1  ;;  %4925 = vmatmul.mubr.bf16.gmra.mxu1 %v6118_v26  ;;  %v6138_v1 = vpack.c.bf16 %v1481_v53, %v1480_v51  ;;  %v2087_v51 = vld [vmem:[#allocation2 + $0xf9] sm:$0xff]  ;;  %v5420_v53 = vld [vmem:[%s7098_s2 + $0x1c8] sm:$0xff]  }
 0x166   : > { %4928 = vmatprep.mubr.bf16.mxu1 %v6122_v36 }
 0x167   : > { %5049 = vmatpush3.bf16.msra.mxu0 %v5404_v42  ;;  %v2084_v42 = vld [vmem:[#allocation2 + $0xd9] sm:$0xff] }
 0x168   : > { %5050 = vmatprep.subr.bf16.mxu0 %v5405_v48  ;;  %v6221_v57 = vpack.c.bf16 %v2085_v27, %v2084_v42 }
 0x16b   : > { %5051 = vmatpush3.bf16.msra.mxu0 %v5405_v48  ;;  %v5419_v48 = vld [vmem:[%s7098_s2 + $0x180] sm:$0xff]  }
 0x16c   : > { %4973 = vmatmul.mubr.bf16.gmra.mxu0 %v6000_v10  ;;  %5132 = vmatprep.subr.bf16.mxu0 %v6133_v32  ;;  %v1486_v10 = vld [vmem:[#allocation2 + $0x16a] sm:$0xff] }
 0x16d   : > { %4976 = vmatprep.mubr.bf16.mxu0 %v6012_v35  ;;  %4929 = vmatmul.mubr.bf16.gmra.mxu1 %v6135_v62  ;;  %v1487_v35 = vld [vmem:[#allocation2 + $0x172] sm:$0xff] }
 0x16e   : > { %4932 = vmatprep.mubr.bf16.mxu1 %v6138_v1  ;;  %v6152_v43 = vpack.c.bf16 %v1487_v35, %v1486_v10  ;;  %v2091_v10 = vld [vmem:[#allocation2 + $0x129] sm:$0xff]  ;;  %v6247_v35 = vld [vmem:[#allocation2 + $0x139] sm:$0xff] }
 0x16f   : > { %v2112_v8 = vpack.c.bf16 %v5911_v46, %v6247_v35  ;;  %v2682_v46 = vld [vmem:[#allocation2 + $0x38] sm:$0xff] }
 0x174   : > { %4977 = vmatmul.mubr.bf16.gmra.mxu0 %v6014_v44  ;;  %v1792_v44 = vld [vmem:[#allocation2 + $0x180] sm:$0xff] }
 0x175   : > { %4980 = vmatprep.mubr.bf16.mxu0 %v6025_v24  ;;  %4933 = vmatmul.mubr.bf16.gmra.mxu1 %v6144_v54  ;;  %v1793_v24 = vld [vmem:[#allocation2 + $0x188] sm:$0xff] }
 0x176   : > { %4936 = vmatprep.mubr.bf16.mxu1 %v6147_v47  ;;  %v6157_v63 = vpack.c.bf16 %v1793_v24, %v1792_v44 }
 0x17c   : > { %4981 = vmatmul.mubr.bf16.gmra.mxu0 %v6027_v13  ;;  %v5407_v13 = vld [vmem:[%s7098_s2 + $0x1b0] sm:$0xff]  }
 0x17d   : > { %4984 = vmatprep.mubr.bf16.mxu0 %v6038_v55  ;;  %4937 = vmatmul.mubr.bf16.gmra.mxu1 %v6152_v43  ;;  %v6165_v55 = vpack.c.bf16 %v2073_v61, %v2072_v12  ;;  %v2686_v61 = vld [vmem:[#allocation2 + $0x68] sm:$0xff] }
 0x17e   : > { %5004 = vmatprep.mubr.bf16.mxu1 %v2100_v59  ;;  %v2099_v59 = vld [vmem:[#allocation2 + $0x189] sm:$0xff] }
 0x184   : > { %4985 = vmatmul.mubr.bf16.gmra.mxu0 %v6157_v63 }
 0x185   : > { %5052 = vmatprep.mubr.bf16.mxu0 %v6040_v33  ;;  %5005 = vmatmul.mubr.bf16.vlgmr.msra.gmra.mxu1 %v6159_v6  ;;  %v5409_v33 = vld [vmem:[%s7098_s2 + $0x1a0] sm:$0xff]  }
 0x186   : > { %5085 = vmatpush3.bf16.msra.mxu1 %v6113_v0  ;;  %5008 = vmatprep.mubr.bf16.mxu1 %v6165_v55  ;;  %v5415_v0 = vld [vmem:[%s7098_s2 + $0x1e0] sm:$0xff]  }
 0x187   : > { %5086 = vmatprep.subr.bf16.mxu1 %v5407_v13 }
 0x18a   : > { %5087 = vmatpush3.bf16.msra.mxu1 %v5407_v13  ;;  %v2685_v13 = vld [vmem:[#allocation2 + $0x60] sm:$0xff] }
 0x18b   : > { %5088 = vmatprep.subr.bf16.mxu1 %v5408_v7 }
 0x18c   : > { %5053 = vmatmul.mubr.bf16.vlgmr.msra.gmra.mxu0 %v6046_v28  ;;  %v2079_v28 = vld [vmem:[#allocation2 + $0x99] sm:$0xff] }
 0x18d   : > { %5056 = vmatprep.mubr.bf16.mxu0 %v6055_v3  ;;  %5009 = vmatmul.mubr.bf16.gmra.mxu1 %v6174_v19  ;;  %v2078_v3 = vld [vmem:[#allocation2 + $0x91] sm:$0xff] }
 0x18e   : > { %5012 = vmatprep.mubr.bf16.mxu1 %v6180_v38  ;;  %5089 = vmatpush3.bf16.msra.mxu1 %v5408_v7  ;;  %v6195_v18 = vpack.c.bf16 %v2079_v28, %v2078_v3  ;;  %v5423_v7 = vld [vmem:[%s7098_s2 + $0x230] sm:$0xff]  }
 0x18f   : > { %5090 = vmatprep.subr.bf16.mxu1 %v5409_v33  ;;  %5133 = vmatpush3.bf16.msra.mxu0 %v6133_v32  ;;  %v2086_v32 = vld [vmem:[#allocation2 + $0xf1] sm:$0xff] }
 0x190   : > { %5134 = vmatprep.subr.bf16.mxu0 %v5412_v5 }
 0x192   : > { %5091 = vmatpush3.bf16.msra.mxu1 %v5409_v33  ;;  %v2690_v33 = vld [vmem:[#allocation2 + $0x98] sm:$0xff] }
 0x193   : > { %5092 = vmatprep.subr.bf16.mxu1 %v5410_v21  ;;  %5135 = vmatpush3.bf16.msra.mxu0 %v5412_v5 }
 0x194   : > { %5057 = vmatmul.mubr.bf16.gmra.mxu0 %v6061_v4  ;;  %5136 = vmatprep.subr.bf16.mxu0 %v5414_v2  ;;  %v5416_v4 = vld [vmem:[%s7098_s2 + $0x188] sm:$0xff]  }
 0x195   : > { %5060 = vmatprep.mubr.bf16.mxu0 %v6076_v22  ;;  %5013 = vmatmul.mubr.bf16.gmra.mxu1 %v6195_v18  ;;  %v2082_v22 = vld [vmem:[#allocation2 + $0xc1] sm:$0xff] }
 0x196   : > { %5016 = vmatprep.mubr.bf16.mxu1 %v6201_v29  ;;  %5093 = vmatpush3.bf16.msra.mxu1 %v5410_v21  ;;  %v6215_v37 = vpack.c.bf16 %v2083_v30, %v2082_v22  ;;  %v2687_v21 = vld [vmem:[#allocation2 + $0x78] sm:$0xff] }
 0x197   : > { %5094 = vmatprep.subr.bf16.mxu1 %v5413_v58  ;;  %5137 = vmatpush3.bf16.msra.mxu0 %v5414_v2  ;;  %v2716_v28 = vpack.c.bf16 %v2688_v31, %v2687_v21  ;;  %v2689_v2 = vld [vmem:[#allocation2 + $0x90] sm:$0xff] }
 0x198   : > { %5138 = vmatprep.subr.bf16.mxu0 %v5415_v0  ;;  %v2717_v3 = vpack.c.bf16 %v2690_v33, %v2689_v2  ;;  %v2700_v21 = vld [vmem:[#allocation2 + $0x110] sm:$0xff]  ;;  %v2701_v2 = vld [vmem:[#allocation2 + $0x120] sm:$0xff] }
 0x19a   : > { %5095 = vmatpush3.bf16.msra.mxu1 %v5413_v58 }
 0x19b   : > { %5139 = vmatpush3.bf16.msra.mxu0 %v5415_v0  ;;  %5096 = vmatprep.subr.bf16.mxu1 %v5416_v4 }
 0x19c   : > { %5061 = vmatmul.mubr.bf16.gmra.mxu0 %v6082_v34  ;;  %5140 = vmatprep.subr.bf16.mxu0 %v5417_v41  ;;  %v5422_v34 = vld [vmem:[%s7098_s2 + $0x238] sm:$0xff]  }
 0x19d   : > { %5064 = vmatprep.mubr.bf16.mxu0 %v6096_v25  ;;  %5017 = vmatmul.mubr.bf16.gmra.mxu1 %v6215_v37  ;;  %v6237_v25 = vpack.c.bf16 %v2087_v51, %v2086_v32 }
 0x19e   : > { %5020 = vmatprep.mubr.bf16.mxu1 %v6221_v57  ;;  %5097 = vmatpush3.bf16.msra.mxu1 %v5416_v4 }
 0x19f   : > { %5141 = vmatpush3.bf16.msra.mxu0 %v5417_v41  ;;  %5098 = vmatprep.subr.bf16.mxu1 %v5419_v48  ;;  %v5426_v41 = vld [vmem:[%s7098_s2 + $0x218] sm:$0xff]  }
 0x1a0   : > { %5142 = vmatprep.subr.bf16.mxu0 %v5418_v50 }
 0x1a2   : > { %5099 = vmatpush3.bf16.msra.mxu1 %v5419_v48  ;;  %v2694_v48 = vld [vmem:[#allocation2 + $0xc8] sm:$0xff] }
 0x1a3   : > { %5143 = vmatpush3.bf16.msra.mxu0 %v5418_v50  ;;  %5180 = vmatprep.subr.bf16.mxu1 %v5422_v34  ;;  %v2691_v50 = vld [vmem:[#allocation2 + $0xa8] sm:$0xff] }
 0x1a4   : > { %5065 = vmatmul.mubr.bf16.gmra.mxu0 %v6102_v17  ;;  %5144 = vmatprep.subr.bf16.mxu0 %v5420_v53  ;;  %v6249_v17 = vpack.c.bf16 %v2091_v10, %v2090_v52 }
 0x1a5   : > { %5068 = vmatprep.mubr.bf16.mxu0 %v6118_v26  ;;  %5021 = vmatmul.mubr.bf16.gmra.mxu1 %v6237_v25  ;;  %v2094_v26 = vld [vmem:[#allocation2 + $0x151] sm:$0xff] }
 0x1a6   : > { %5024 = vmatprep.mubr.bf16.mxu1 %v2110_v23  ;;  %v6256_v56 = vpack.c.bf16 %v2095_v45, %v2094_v26  ;;  %v5427_v23 = vld [vmem:[%s7098_s2 + $0x210] sm:$0xff]  }
 0x1a7   : > { %5145 = vmatpush3.bf16.msra.mxu0 %v5420_v53  ;;  %v2693_v53 = vld [vmem:[#allocation2 + $0xc0] sm:$0xff] }
 0x1a8   : > { %5146 = vmatprep.subr.bf16.mxu0 %v5421_v40  ;;  %v2719_v52 = vpack.c.bf16 %v2694_v48, %v2693_v53  ;;  %v3006_v48 = vld [vmem:[#allocation2 + $0x111] sm:$0xff] }
 0x1ab   : > { %5147 = vmatpush3.bf16.msra.mxu0 %v5421_v40 }
 0x1ac   : > { %5069 = vmatmul.mubr.bf16.gmra.mxu0 %v6122_v36  ;;  %v2098_v36 = vld [vmem:[#allocation2 + $0x181] sm:$0xff] }
 0x1ad   : > { %5072 = vmatprep.mubr.bf16.mxu0 %v6135_v62  ;;  %5025 = vmatmul.mubr.bf16.gmra.mxu1 %v6249_v17  ;;  %v6262_v44 = vpack.c.bf16 %v2099_v59, %v2098_v36  ;;  %v2681_v62 = vld [vmem:[#allocation2 + $0x30] sm:$0xff]  ;;  %v5428_v59 = vld [vmem:[%s7098_s2 + $0x208] sm:$0xff]  }
 0x1ae   : > { %5028 = vmatprep.mubr.bf16.mxu1 %v2112_v8  ;;  %v2713_v24 = vpack.c.bf16 %v2682_v46, %v2681_v62  ;;  %v2696_v62 = vld [vmem:[#allocation2 + $0xe0] sm:$0xff] }
 0x1b4   : > { %5073 = vmatmul.mubr.bf16.gmra.mxu0 %v6138_v1  ;;  %v2404_v1 = vld [vmem:[#allocation2 + $0x182] sm:$0xff] }
 0x1b5   : > { %5076 = vmatprep.mubr.bf16.mxu0 %v6144_v54  ;;  %5029 = vmatmul.mubr.bf16.gmra.mxu1 %v6256_v56  ;;  %v2405_v54 = vld [vmem:[#allocation2 + $0x18a] sm:$0xff] }
 0x1b6   : > { %5032 = vmatprep.mubr.bf16.mxu1 %v6033_v11  ;;  %v6267_v16 = vpack.c.bf16 %v2405_v54, %v2404_v1  ;;  %v2683_v11 = vld [vmem:[#allocation2 + $0x48] sm:$0xff]  ;;  %v2698_v54 = vld [vmem:[#allocation2 + $0xf8] sm:$0xff] }
 0x1b7   : > { %v2714_v12 = vpack.c.bf16 %v2684_v49, %v2683_v11 }
 0x1bc   : > { %5077 = vmatmul.mubr.bf16.gmra.mxu0 %v6147_v47 }
 0x1bd   : > { %5080 = vmatprep.mubr.bf16.mxu0 %v6152_v43  ;;  %5033 = vmatmul.mubr.bf16.gmra.mxu1 %v6262_v44  ;;  %v2715_v43 = vpack.c.bf16 %v2686_v61, %v2685_v13  ;;  %v5429_v13 = vld [vmem:[%s7098_s2 + $0x200] sm:$0xff]  }
 0x1be   : > { %5100 = vmatprep.mubr.bf16.mxu1 %v2713_v24 }
 0x1c3   : > { %v4814_v47 = vpop.f32.mrf.mxu1 }
 0x1c4   : > { %5081 = vmatmul.mubr.bf16.gmra.mxu0 %v6267_v16 }
 0x1c5   : > { %5148 = vmatprep.mubr.bf16.mxu0 %v6159_v6  ;;  %5101 = vmatmul.mubr.bf16.vlgmr.msra.gmra.mxu1 %v2714_v12  ;;  %v1120_v15 = vpop.f32.mrf.mxu1  ;;  %v5425_v6 = vld [vmem:[%s7098_s2 + $0x220] sm:$0xff]  }
 0x1c6   : > { %5181 = vmatpush3.bf16.msra.mxu1 %v5422_v34  ;;  %5104 = vmatprep.mubr.bf16.mxu1 %v2715_v43 }
 0x1c7   : > { %5182 = vmatprep.subr.bf16.mxu1 %v5423_v7  ;;  %v4815_v20 = vpop.f32.mrf.mxu1 }
 0x1c9   : > { %v1123_v5 = vpop.f32.mrf.mxu1 }
 0x1ca   : > { %5183 = vmatpush3.bf16.msra.mxu1 %v5423_v7 }
 0x1cb   : > { %5184 = vmatprep.subr.bf16.mxu1 %v5424_v14  ;;  %v4862_v9 = vpop.f32.mrf.mxu0 }
 0x1cc   : > { %5149 = vmatmul.mubr.bf16.vlgmr.msra.gmra.mxu0 %v6165_v55  ;;  %v6281_v60 = vadd.f32 %v4862_v9, %v4814_v47  ;;  %v4818_v58 = vpop.f32.mrf.mxu1  ;;  %v2692_v55 = vld [vmem:[#allocation2 + $0xb0] sm:$0xff] }
 0x1cd   : > { %5152 = vmatprep.mubr.bf16.mxu0 %v6174_v19  ;;  %5105 = vmatmul.mubr.bf16.gmra.mxu1 %v2716_v28  ;;  %v1329_v0 = vpop.f32.mrf.mxu0  ;;  %v2718_v51 = vpack.c.bf16 %v2692_v55, %v2691_v50 }
 0x1ce   : > { %5108 = vmatprep.mubr.bf16.mxu1 %v2717_v3  ;;  %5185 = vmatpush3.bf16.msra.mxu1 %v5424_v14  ;;  %v6284_v4 = vadd.f32 %v1329_v0, %v1120_v15  ;;  %v1136_v30 = vpop.f32.mrf.mxu1 }
 0x1cf   : > { %5186 = vmatprep.subr.bf16.mxu1 %v5425_v6  ;;  %v4863_v42 = vpop.f32.mrf.mxu0 }
 0x1d0   : > { %v6289_v27 = vadd.f32 %v4863_v42, %v4815_v20  ;;  %v4819_v22 = vpop.f32.mrf.mxu1 }
 0x1d1   : > { %v1332_v19 = vpop.f32.mrf.mxu0 }
 0x1d2   : > { %5187 = vmatpush3.bf16.msra.mxu1 %v5425_v6  ;;  %v6291_v34 = vadd.f32 %v1332_v19, %v1123_v5  ;;  %v1139_v32 = vpop.f32.mrf.mxu1  ;;  %v2699_v5 = vld [vmem:[#allocation2 + $0x108] sm:$0xff] }
 0x1d3   : > { %5188 = vmatprep.subr.bf16.mxu1 %v5426_v41  ;;  %v2702_v6 = vld [vmem:[#allocation2 + $0x128] sm:$0xff] }
 0x1d4   : > { %v4866_v40 = vpop.f32.mrf.mxu0  ;;  %5153 = vmatmul.mubr.bf16.gmra.mxu0 %v6180_v38  ;;  %v2695_v38 = vld [vmem:[#allocation2 + $0xd8] sm:$0xff] }
 0x1d5   : > { %v6297_v10 = vadd.f32 %v4866_v40, %v4818_v58  ;;  %5156 = vmatprep.mubr.bf16.mxu0 %v6195_v18  ;;  %v4822_v8 = vpop.f32.mrf.mxu1  ;;  %5109 = vmatmul.mubr.bf16.gmra.mxu1 %v2718_v51  ;;  %v2697_v18 = vld [vmem:[#allocation2 + $0xf0] sm:$0xff]  ;;  %v2720_v12 = vpack.c.bf16 %v2696_v62, %v2695_v38  ;;  %v2722_v58 = vpack.c.bf16 %v2700_v21, %v2699_v5  ;;  %v2704_v51 = vld [vmem:[#allocation2 + $0x140] sm:$0xff]  ;;  %v2706_v40 = vld [vmem:[#allocation2 + $0x158] sm:$0xff] }
 0x1d6   : > { %v1345_v26 = vpop.f32.mrf.mxu0  ;;  %5112 = vmatprep.mubr.bf16.mxu1 %v2719_v52  ;;  %5189 = vmatpush3.bf16.msra.mxu1 %v5426_v41  ;;  %v2721_v47 = vpack.c.bf16 %v2698_v54, %v2697_v18  ;;  %v3010_v54 = vld [vmem:[#allocation2 + $0x141] sm:$0xff] }
 0x1d7   : > { %v6300_v45 = vadd.f32 %v1345_v26, %v1136_v30  ;;  %v1152_v36 = vpop.f32.mrf.mxu1  ;;  %5190 = vmatprep.subr.bf16.mxu1 %v5427_v23  ;;  %v2723_v30 = vpack.c.bf16 %v2702_v6, %v2701_v2  ;;  %v3013_v2 = vld [vmem:[#allocation2 + $0x169] sm:$0xff]  ;;  %v3014_v6 = vld [vmem:[#allocation2 + $0x171] sm:$0xff] }
 0x1d8   : > { %v4867_v46 = vpop.f32.mrf.mxu0 }
 0x1d9   : > { %v6305_v24 = vadd.f32 %v4867_v46, %v4819_v22  ;;  %v4823_v1 = vpop.f32.mrf.mxu1 }
 0x1da   : > { %v1348_v49 = vpop.f32.mrf.mxu0  ;;  %5191 = vmatpush3.bf16.msra.mxu1 %v5427_v23 }
 0x1db   : > { %v6307_v61 = vadd.f32 %v1348_v49, %v1139_v32  ;;  %v1155_v11 = vpop.f32.mrf.mxu1  ;;  %5192 = vmatprep.subr.bf16.mxu1 %v5428_v59  ;;  %v2703_v32 = vld [vmem:[#allocation2 + $0x138] sm:$0xff] }
 0x1dc   : > { %v4870_v7 = vpop.f32.mrf.mxu0  ;;  %5157 = vmatmul.mubr.bf16.gmra.mxu0 %v6201_v29 }
 0x1dd   : > { %v6313_v43 = vadd.f32 %v4870_v7, %v4822_v8  ;;  %5160 = vmatprep.mubr.bf16.mxu0 %v6215_v37  ;;  %v4826_v15 = vpop.f32.mrf.mxu1  ;;  %5113 = vmatmul.mubr.bf16.gmra.mxu1 %v2720_v12  ;;  %v3028_v8 = vpack.c.bf16 %v3006_v48, %v6235_v39  ;;  %v2708_v12 = vld [vmem:[#allocation2 + $0x170] sm:$0xff] }
 0x1de   : > { %v1361_v14 = vpop.f32.mrf.mxu0  ;;  %5116 = vmatprep.mubr.bf16.mxu1 %v2721_v47  ;;  %5193 = vmatpush3.bf16.msra.mxu1 %v5428_v59 }
 0x1df   : > { %v6316_v20 = vadd.f32 %v1361_v14, %v1152_v36  ;;  %v1168_v31 = vpop.f32.mrf.mxu1  ;;  %5194 = vmatprep.subr.bf16.mxu1 %v5429_v13  ;;  %v2724_v36 = vpack.c.bf16 %v2704_v51, %v2703_v32 }
 0x1e0   : > { %v4871_v33 = vpop.f32.mrf.mxu0 }
 0x1e1   : > { %v6318_v28 = vadd.f32 %v4871_v33, %v4823_v1  ;;  %v4827_v29 = vpop.f32.mrf.mxu1 }
 0x1e2   : > { %v1364_v9 = vpop.f32.mrf.mxu0  ;;  %5195 = vmatpush3.bf16.msra.mxu1 %v5429_v13 }
 0x1e3   : > { %v6320_v37 = vadd.f32 %v1364_v9, %v1155_v11  ;;  %v1171_v3 = vpop.f32.mrf.mxu1  ;;  %v2707_v11 = vld [vmem:[#allocation2 + $0x168] sm:$0xff] }
 0x1e4   : > { %v4874_v0 = vpop.f32.mrf.mxu0  ;;  %5161 = vmatmul.mubr.bf16.gmra.mxu0 %v6221_v57  ;;  %v2705_v57 = vld [vmem:[#allocation2 + $0x150] sm:$0xff] }
 0x1e5   : > { %v6323_v41 = vadd.f32 %v4874_v0, %v4826_v15  ;;  %5164 = vmatprep.mubr.bf16.mxu0 %v6237_v25  ;;  %v4830_v42 = vpop.f32.mrf.mxu1  ;;  %5117 = vmatmul.mubr.bf16.gmra.mxu1 %v2722_v58  ;;  %v2725_v46 = vpack.c.bf16 %v2706_v40, %v2705_v57  ;;  %v3030_v15 = vpack.c.bf16 %v3010_v54, %v6247_v35  ;;  %v5454_v0 = vld [vmem:[#allocation2] sm:$0xff] }
 0x1e6   : > { %v1377_v55 = vpop.f32.mrf.mxu0  ;;  %5120 = vmatprep.mubr.bf16.mxu1 %v2723_v30  ;;  %v2728_v30 = vpack.c.bf16 %v5454_v0, %v5454_v0  ;;  %v3018_v57 = vld [vmem:[#allocation2 + $0x1a1] sm:$0xff] }
 0x1e7   : > { %v6326_v22 = vadd.f32 %v1377_v55, %v1168_v31  ;;  %v1184_v19 = vpop.f32.mrf.mxu1  ;;  %v3294_v55 = vld [vmem:[#allocation2 + $0x3a] sm:$0xff]  ;;  %v3300_v0 = vld [vmem:[#allocation2 + $0x82] sm:$0xff] }
 0x1e8   : > { %v4875_v50 = vpop.f32.mrf.mxu0 }
 0x1e9   : > { %v6328_v53 = vadd.f32 %v4875_v50, %v4827_v29  ;;  %v4831_v23 = vpop.f32.mrf.mxu1 }
 0x1ea   : > { %v1380_v52 = vpop.f32.mrf.mxu0 }
 0x1eb   : > { %v6331_v25 = vadd.f32 %v1380_v52, %v1171_v3  ;;  %v6333_v26 = vpop.f32.mrf.mxu1 }
 0x1ec   : > { %v4878_v59 = vpop.f32.mrf.mxu0  ;;  %5165 = vmatmul.mubr.bf16.gmra.mxu0 %v3028_v8 }
 0x1ed   : > { %v6335_v38 = vadd.f32 %v4878_v59, %v4830_v42  ;;  %5168 = vmatprep.mubr.bf16.mxu0 %v6249_v17  ;;  %v4834_v62 = vpop.f32.mrf.mxu1  ;;  %5121 = vmatmul.mubr.bf16.gmra.mxu1 %v2724_v36  ;;  %v2726_v17 = vpack.c.bf16 %v2708_v12, %v2707_v11  ;;  %v3293_v42 = vld [vmem:[#allocation2 + $0x32] sm:$0xff] }
 0x1ee   : > { %v1393_v1 = vpop.f32.mrf.mxu0  ;;  %5124 = vmatprep.mubr.bf16.mxu1 %v2725_v46  ;;  %v3295_v46 = vld [vmem:[#allocation2 + $0x4a] sm:$0xff] }
 0x1ef   : > { %v6338_v18 = vadd.f32 %v1393_v1, %v1184_v19  ;;  %v1200_v39 = vpop.f32.mrf.mxu1 }
 0x1f0   : > { %v4879_v49 = vpop.f32.mrf.mxu0 }
 0x1f1   : > { %v6340_v13 = vadd.f32 %v4879_v49, %v4831_v23  ;;  %v4835_v7 = vpop.f32.mrf.mxu1  ;;  %v3017_v23 = vld [vmem:[#allocation2 + $0x199] sm:$0xff]  ;;  %v3298_v49 = vld [vmem:[#allocation2 + $0x6a] sm:$0xff] }
 0x1f2   : > { %v6342_v47 = vpop.f32.mrf.mxu0  ;;  %v3034_v59 = vpack.c.bf16 %v3018_v57, %v3017_v23 }
 0x1f3   : > { %v6345_v14 = vpop.f32.mrf.mxu1 }
 0x1f4   : > { %v4882_v31 = vpop.f32.mrf.mxu0  ;;  %5169 = vmatmul.mubr.bf16.gmra.mxu0 %v3030_v15 }
 0x1f5   : > { %v6347_v33 = vadd.f32 %v4882_v31, %v4834_v62  ;;  %5172 = vmatprep.mubr.bf16.mxu0 %v6256_v56  ;;  %v4838_v5 = vpop.f32.mrf.mxu1  ;;  %5125 = vmatmul.mubr.bf16.gmra.mxu1 %v2726_v17  ;;  %v3032_v56 = vpack.c.bf16 %v3014_v6, %v3013_v2  ;;  %v3296_v62 = vld [vmem:[#allocation2 + $0x52] sm:$0xff] }
 0x1f6   : > { %v1409_v21 = vpop.f32.mrf.mxu0  ;;  %5128 = vmatprep.mubr.bf16.mxu1 %v6157_v63  ;;  %v3325_v63 = vpack.c.bf16 %v3294_v55, %v3293_v42  ;;  %v3326_v12 = vpack.c.bf16 %v3296_v62, %v3295_v46  ;;  %v3301_v55 = vld [vmem:[#allocation2 + $0x92] sm:$0xff] }
 0x1f7   : > { %v6351_v29 = vadd.f32 %v1409_v21, %v1200_v39  ;;  %v1216_v9 = vpop.f32.mrf.mxu1  ;;  %v3297_v39 = vld [vmem:[#allocation2 + $0x62] sm:$0xff] }
 0x1f8   : > { %v4883_v35 = vpop.f32.mrf.mxu0  ;;  %v3327_v15 = vpack.c.bf16 %v3298_v49, %v3297_v39  ;;  %v3303_v39 = vld [vmem:[#allocation2 + $0xaa] sm:$0xff]  ;;  %v3304_v49 = vld [vmem:[#allocation2 + $0xb2] sm:$0xff] }
 0x1f9   : > { %v6353_v3 = vadd.f32 %v4883_v35, %v4835_v7  ;;  %v4839_v58 = vpop.f32.mrf.mxu1 }
 0x1fa   : > { %v6355_v48 = vpop.f32.mrf.mxu0 }
 0x1fb   : > { %v6357_v19 = vpop.f32.mrf.mxu1 }
 0x1fc   : > { %v4886_v50 = vpop.f32.mrf.mxu0  ;;  %5173 = vmatmul.mubr.bf16.gmra.mxu0 %v3032_v56  ;;  %v3302_v56 = vld [vmem:[#allocation2 + $0x9a] sm:$0xff] }
 0x1fd   : > { %v6359_v32 = vadd.f32 %v4886_v50, %v4838_v5  ;;  %5176 = vmatprep.mubr.bf16.mxu0 %v6262_v44  ;;  %v4842_v51 = vpop.f32.mrf.mxu1  ;;  %5129 = vmatmul.mubr.bf16.gmra.mxu1 %v2728_v30 }
 0x1fe   : > { %v1425_v40 = vpop.f32.mrf.mxu0  ;;  %5196 = vmatprep.mubr.bf16.mxu1 %v3325_v63 }
 0x1ff   : > { %v6362_v52 = vadd.f32 %v1425_v40, %v1216_v9  ;;  %v1232_v8 = vpop.f32.mrf.mxu1  ;;  %v3329_v40 = vpack.c.bf16 %v3302_v56, %v3301_v55 }
 0x200   : > { %v4887_v36 = vpop.f32.mrf.mxu0 }
 0x201   : > { %v6364_v1 = vadd.f32 %v4887_v36, %v4839_v58  ;;  %v4843_v54 = vpop.f32.mrf.mxu1  ;;  %v3299_v58 = vld [vmem:[#allocation2 + $0x7a] sm:$0xff] }
 0x202   : > { %v6366_v11 = vpop.f32.mrf.mxu0 }
 0x203   : > { %v6368_v44 = vpop.f32.mrf.mxu1 }
 0x204   : > { %v4890_v7 = vpop.f32.mrf.mxu0  ;;  %5177 = vmatmul.mubr.bf16.gmra.mxu0 %v3034_v59 }
 0x205   : > { %v6370_v17 = vadd.f32 %v4890_v7, %v4842_v51  ;;  %v4910_v31 = vpop.f32.mrf.mxu1  ;;  %5197 = vmatmul.mubr.bf16.vlgmr.msra.gmra.mxu1 %v3326_v12  ;;  %v3305_v7 = vld [vmem:[#allocation2 + $0xc2] sm:$0xff] }
 0x206   : > { %v1441_v5 = vpop.f32.mrf.mxu0  ;;  %v1732_v21 = vadd.f32 %v4910_v31, %v6281_v60  ;;  %5200 = vmatprep.mubr.bf16.mxu1 %v3327_v15  ;;  %v3328_v60 = vpack.c.bf16 %v3300_v0, %v3299_v58  ;;  %v3306_v15 = vld [vmem:[#allocation2 + $0xca] sm:$0xff] }
 0x207   : > { %v6373_v2 = vadd.f32 %v1441_v5, %v1232_v8  ;;  %v1603_v6 = vpop.f32.mrf.mxu1 }
 0x208   : > { %v4891_v9 = vpop.f32.mrf.mxu0  ;;  %v1730_v35 = vadd.f32 %v1603_v6, %v6284_v4 }
 0x209   : > { %v6376_v30 = vadd.f32 %v4891_v9, %v4843_v54  ;;  %v4911_v42 = vpop.f32.mrf.mxu1 }
 0x20a   : > { %v6378_v50 = vpop.f32.mrf.mxu0  ;;  %v1733_v63 = vadd.f32 %v4911_v42, %v6289_v27 }
 0x20b   : > { %v1606_v51 = vpop.f32.mrf.mxu1 }
 0x20c   : > { %v4958_v23 = vpop.f32.mrf.mxu0  ;;  %v6382_v57 = vadd.f32 %v1606_v51, %v6291_v34  ;;  %v3307_v51 = vld [vmem:[#allocation2 + $0xda] sm:$0xff] }
 0x20d   : > { %v6384_v8 = vadd.f32 %v4958_v23, %v1732_v21  ;;  %v4914_v4 = vpop.f32.mrf.mxu1  ;;  %5201 = vmatmul.mubr.bf16.gmra.mxu1 %v3328_v60  ;;  %v3308_v60 = vld [vmem:[#allocation2 + $0xe2] sm:$0xff] }
 0x20e   : > { %v1909_v36 = vpop.f32.mrf.mxu0  ;;  %v1736_v59 = vadd.f32 %v4914_v4, %v6297_v10  ;;  %5204 = vmatprep.mubr.bf16.mxu1 %v3329_v40  ;;  %v3330_v10 = vpack.c.bf16 %v3304_v49, %v3303_v39  ;;  %v3309_v40 = vld [vmem:[#allocation2 + $0xf2] sm:$0xff]  ;;  %v3310_v4 = vld [vmem:[#allocation2 + $0xfa] sm:$0xff] }
 0x20f   : > { %v6387_v46 = vadd.f32 %v1909_v36, %v1730_v35  ;;  %v1619_v62 = vpop.f32.mrf.mxu1  ;;  %v3331_v35 = vpack.c.bf16 %v3306_v15, %v3305_v7  ;;  %v3333_v39 = vpack.c.bf16 %v3310_v4, %v3309_v40  ;;  %v5431_v4 = vld [vmem:[%s7099_s3 + $0x30] sm:$0xff]  }
 0x210   : > { %v4959_v54 = vpop.f32.mrf.mxu0  ;;  %v1734_v27 = vadd.f32 %v1619_v62, %v6300_v45 }
 0x211   : > { %v6390_v12 = vadd.f32 %v4959_v54, %v1733_v63  ;;  %v4915_v34 = vpop.f32.mrf.mxu1 }
 0x212   : > { %v6392_v31 = vpop.f32.mrf.mxu0  ;;  %v1737_v5 = vadd.f32 %v4915_v34, %v6305_v24  ;;  %v5430_v34 = vld [vmem:[%s7099_s3 + $0x38] sm:$0xff]  }
 0x213   : > { %v1622_v21 = vpop.f32.mrf.mxu1  ;;  %5228 = vmatprep.subr.bf16.mxu0 %v5430_v34 }
 0x214   : > { %v4962_v6 = vpop.f32.mrf.mxu0  ;;  %v6396_v9 = vadd.f32 %v1622_v21, %v6307_v61  ;;  %5229 = vmatpush3.bf16.msra.mxu0 %v5430_v34 }
 0x215   : > { %v6398_v58 = vadd.f32 %v4962_v6, %v1736_v59  ;;  %v4918_v45 = vpop.f32.mrf.mxu1  ;;  %5205 = vmatmul.mubr.bf16.gmra.mxu1 %v3330_v10  ;;  %v3311_v10 = vld [vmem:[#allocation2 + $0x10a] sm:$0xff]  ;;  %v3312_v6 = vld [vmem:[#allocation2 + $0x112] sm:$0xff]  ;;  %5230 = vmatprep.subr.bf16.mxu0 %v5431_v4 }
 0x216   : > { %v1925_v0 = vpop.f32.mrf.mxu0  ;;  %v1740_v42 = vadd.f32 %v4918_v45, %v6313_v43  ;;  %5208 = vmatprep.mubr.bf16.mxu1 %v3331_v35  ;;  %v3332_v43 = vpack.c.bf16 %v3308_v60, %v3307_v51 }
 0x217   : > { %v6401_v55 = vadd.f32 %v1925_v0, %v1734_v27  ;;  %v1635_v56 = vpop.f32.mrf.mxu1  ;;  %v3313_v0 = vld [vmem:[#allocation2 + $0x122] sm:$0xff] }
 0x218   : > { %v4963_v63 = vpop.f32.mrf.mxu0  ;;  %v1738_v24 = vadd.f32 %v1635_v56, %v6316_v20  ;;  %5231 = vmatpush3.bf16.msra.mxu0 %v5431_v4  ;;  %v3320_v4 = vld [vmem:[#allocation2 + $0x172] sm:$0xff] }
 0x219   : > { %v6404_v23 = vadd.f32 %v4963_v63, %v1737_v5  ;;  %v4919_v61 = vpop.f32.mrf.mxu1 }
 0x21a   : > { %v6406_v36 = vpop.f32.mrf.mxu0  ;;  %v1741_v59 = vadd.f32 %v4919_v61, %v6318_v28 }
 0x21b   : > { %v1638_v62 = vpop.f32.mrf.mxu1 }
 0x21c   : > { %v4966_v54 = vpop.f32.mrf.mxu0  ;;  %v6410_v27 = vadd.f32 %v1638_v62, %v6320_v37 }
 0x21d   : > { %v6412_v49 = vadd.f32 %v4966_v54, %v1740_v42  ;;  %v4922_v20 = vpop.f32.mrf.mxu1  ;;  %5209 = vmatmul.mubr.bf16.gmra.mxu1 %v3332_v43  ;;  %v3314_v42 = vld [vmem:[#allocation2 + $0x12a] sm:$0xff] }
 0x21e   : > { %v1941_v7 = vpop.f32.mrf.mxu0  ;;  %v1744_v15 = vadd.f32 %v4922_v20, %v6323_v41  ;;  %5212 = vmatprep.mubr.bf16.mxu1 %v3333_v39  ;;  %v3335_v61 = vpack.c.bf16 %v3314_v42, %v3313_v0  ;;  %v3315_v39 = vld [vmem:[#allocation2 + $0x13a] sm:$0xff]  ;;  %v3316_v20 = vld [vmem:[#allocation2 + $0x142] sm:$0xff] }
 0x21f   : > { %v6418_v28 = vadd.f32 %v1941_v7, %v1738_v24  ;;  %v1651_v5 = vpop.f32.mrf.mxu1  ;;  %v3334_v24 = vpack.c.bf16 %v3312_v6, %v3311_v10  ;;  %v3336_v6 = vpack.c.bf16 %v3316_v20, %v3315_v39 }
 0x220   : > { %v4967_v21 = vpop.f32.mrf.mxu0  ;;  %v1742_v37 = vadd.f32 %v1651_v5, %v6326_v22  ;;  %v3318_v5 = vld [vmem:[#allocation2 + $0x15a] sm:$0xff] }
 0x221   : > { %v6421_v35 = vadd.f32 %v4967_v21, %v1741_v59  ;;  %v4923_v45 = vpop.f32.mrf.mxu1  ;;  %v1397_v21 = vadd.f32 %v6342_v47, %v6333_v26 }
 0x222   : > { %v6423_v56 = vpop.f32.mrf.mxu0  ;;  %v1745_v41 = vadd.f32 %v4923_v45, %v6328_v53 }
 0x223   : > { %v1654_v63 = vpop.f32.mrf.mxu1 }
 0x224   : > { %v4970_v51 = vpop.f32.mrf.mxu0  ;;  %v6427_v60 = vadd.f32 %v1654_v63, %v6331_v25 }
 0x225   : > { %v6429_v22 = vadd.f32 %v4970_v51, %v1744_v15  ;;  %v4926_v40 = vpop.f32.mrf.mxu1  ;;  %5213 = vmatmul.mubr.bf16.gmra.mxu1 %v3334_v24  ;;  %v3317_v15 = vld [vmem:[#allocation2 + $0x152] sm:$0xff] }
 0x226   : > { %v1957_v59 = vpop.f32.mrf.mxu0  ;;  %v1748_v62 = vadd.f32 %v4926_v40, %v6335_v38  ;;  %5216 = vmatprep.mubr.bf16.mxu1 %v3335_v61  ;;  %v3319_v40 = vld [vmem:[#allocation2 + $0x16a] sm:$0xff] }
 0x227   : > { %v6435_v53 = vadd.f32 %v1957_v59, %v1742_v37  ;;  %v1667_v43 = vpop.f32.mrf.mxu1  ;;  %v3338_v20 = vpack.c.bf16 %v3320_v4, %v3319_v40 }
 0x228   : > { %v4971_v54 = vpop.f32.mrf.mxu0  ;;  %v1746_v25 = vadd.f32 %v1667_v43, %v6338_v18  ;;  %v3337_v18 = vpack.c.bf16 %v3318_v5, %v3317_v15  ;;  %v1413_v43 = vadd.f32 %v6355_v48, %v6345_v14  ;;  %v3324_v48 = vld [vmem:[#allocation2 + $0x1a2] sm:$0xff] }
 0x229   : > { %v6438_v34 = vadd.f32 %v4971_v54, %v1745_v41  ;;  %v4927_v7 = vpop.f32.mrf.mxu1  ;;  %v5432_v41 = vld [vmem:[%s7099_s3 + $0x28] sm:$0xff]  }
 0x22a   : > { %v6442_v38 = vpop.f32.mrf.mxu0  ;;  %v1749_v37 = vadd.f32 %v4927_v7, %v6340_v13  ;;  %5232 = vmatprep.subr.bf16.mxu0 %v5432_v41 }
 0x22b   : > { %v1670_v10 = vpop.f32.mrf.mxu1  ;;  %5233 = vmatpush3.bf16.msra.mxu0 %v5432_v41 }
 0x22c   : > { %v4974_v45 = vpop.f32.mrf.mxu0  ;;  %v1747_v0 = vadd.f32 %v1670_v10, %v1397_v21  ;;  %v5433_v21 = vld [vmem:[%s7099_s3 + $0x20] sm:$0xff]  }
 0x22d   : > { %v6445_v42 = vadd.f32 %v4974_v45, %v1748_v62  ;;  %v4930_v63 = vpop.f32.mrf.mxu1  ;;  %5217 = vmatmul.mubr.bf16.gmra.mxu1 %v3336_v6  ;;  %5234 = vmatprep.subr.bf16.mxu0 %v5433_v21 }
 0x22e   : > { %v1973_v24 = vpop.f32.mrf.mxu0  ;;  %v1752_v26 = vadd.f32 %v4930_v63, %v6347_v33  ;;  %5220 = vmatprep.mubr.bf16.mxu1 %v3337_v18 }
 0x22f   : > { %v6451_v47 = vadd.f32 %v1973_v24, %v1746_v25  ;;  %v1683_v13 = vpop.f32.mrf.mxu1  ;;  %5235 = vmatpush3.bf16.msra.mxu0 %v5433_v21  ;;  %v1429_v24 = vadd.f32 %v6366_v11, %v6357_v19  ;;  %v5435_v21 = vld [vmem:[%s7099_s3 + $0x10] sm:$0xff]  }
 0x230   : > { %v4975_v51 = vpop.f32.mrf.mxu0  ;;  %v1750_v61 = vadd.f32 %v1683_v13, %v6351_v29 }
 0x231   : > { %v6454_v59 = vadd.f32 %v4975_v51, %v1749_v37  ;;  %v4931_v62 = vpop.f32.mrf.mxu1 }
 0x232   : > { %v1976_v54 = vpop.f32.mrf.mxu0  ;;  %v1753_v33 = vadd.f32 %v4931_v62, %v6353_v3  ;;  %v3323_v3 = vld [vmem:[#allocation2 + $0x19a] sm:$0xff] }
 0x233   : > { %v6459_v39 = vadd.f32 %v1976_v54, %v1747_v0  ;;  %v1686_v25 = vpop.f32.mrf.mxu1  ;;  %v3340_v41 = vpack.c.bf16 %v3324_v48, %v3323_v3 }
 0x234   : > { %v4978_v7 = vpop.f32.mrf.mxu0  ;;  %v1751_v15 = vadd.f32 %v1686_v25, %v1413_v43 }
 0x235   : > { %v6461_v5 = vadd.f32 %v4978_v7, %v1752_v26  ;;  %v4934_v29 = vpop.f32.mrf.mxu1  ;;  %5221 = vmatmul.mubr.bf16.gmra.mxu1 %v3338_v20  ;;  %v1445_v20 = vadd.f32 %v6378_v50, %v6368_v44 }
 0x236   : > { %v1989_v37 = vpop.f32.mrf.mxu0  ;;  %v1756_v14 = vadd.f32 %v4934_v29, %v6359_v32  ;;  %5224 = vmatprep.mubr.bf16.mxu1 %v6267_v16 }
 0x237   : > { %v6468_v10 = vadd.f32 %v1989_v37, %v1750_v61  ;;  %v1699_v6 = vpop.f32.mrf.mxu1 }
 0x238   : > { %v4979_v45 = vpop.f32.mrf.mxu0  ;;  %v1754_v0 = vadd.f32 %v1699_v6, %v6362_v52  ;;  %v5434_v52 = vld [vmem:[%s7099_s3 + $0x18] sm:$0xff]  }
 0x239   : > { %v6471_v18 = vadd.f32 %v4979_v45, %v1753_v33  ;;  %v4935_v63 = vpop.f32.mrf.mxu1  ;;  %5236 = vmatprep.subr.bf16.mxu0 %v5434_v52 }
 0x23a   : > { %v1992_v32 = vpop.f32.mrf.mxu0  ;;  %v1757_v16 = vadd.f32 %v4935_v63, %v6364_v1  ;;  %5237 = vmatpush3.bf16.msra.mxu0 %v5434_v52 }
 0x23b   : > { %v6476_v26 = vadd.f32 %v1992_v32, %v1751_v15  ;;  %v1702_v13 = vpop.f32.mrf.mxu1  ;;  %5238 = vmatprep.subr.bf16.mxu0 %v5435_v21 }
 0x23c   : > { %v4982_v51 = vpop.f32.mrf.mxu0  ;;  %v1755_v61 = vadd.f32 %v1702_v13, %v1429_v24 }
 0x23d   : > { %v6478_v40 = vadd.f32 %v4982_v51, %v1756_v14  ;;  %v4938_v4 = vpop.f32.mrf.mxu1  ;;  %5225 = vmatmul.mubr.bf16.gmra.mxu1 %v3340_v41  ;;  %v2037_v41 = vadd.f32 %v6392_v31, %v6382_v57 }
 0x23e   : > { %v2005_v62 = vpop.f32.mrf.mxu0  ;;  %v1760_v43 = vadd.f32 %v4938_v4, %v6370_v17  ;;  %5239 = vmatpush3.bf16.msra.mxu0 %v5435_v21 }
 0x23f   : > { %v6484_v19 = vadd.f32 %v2005_v62, %v1754_v0  ;;  %v1715_v11 = vpop.f32.mrf.mxu1 }
 0x240   : > { %v4983_v1 = vpop.f32.mrf.mxu0  ;;  %v1758_v54 = vadd.f32 %v1715_v11, %v6373_v2 }
 0x241   : > { %v6487_v33 = vadd.f32 %v4983_v1, %v1757_v16  ;;  %v4939_v25 = vpop.f32.mrf.mxu1  ;;  %v2041_v1 = vadd.f32 %v6406_v36, %v6396_v9 }
 0x242   : > { %v2008_v7 = vpop.f32.mrf.mxu0  ;;  %v1761_v15 = vadd.f32 %v4939_v25, %v6376_v30 }
 0x243   : > { %v6492_v29 = vadd.f32 %v2008_v7, %v1755_v61  ;;  %v1718_v17 = vpop.f32.mrf.mxu1 }
 0x244   : > { %v4986_v37 = vpop.f32.mrf.mxu0  ;;  %v1759_v14 = vadd.f32 %v1718_v17, %v1445_v20 }
 0x245   : > { %v6497_v2 = vadd.f32 %v4986_v37, %v1760_v43  ;;  %v5006_v3 = vpop.f32.mrf.mxu1 }
 0x246   : > { %v2021_v48 = vpop.f32.mrf.mxu0  ;;  %v2344_v6 = vadd.f32 %v5006_v3, %v6384_v8 }
 0x247   : > { %v6500_v44 = vadd.f32 %v2021_v48, %v1758_v54  ;;  %v2215_v30 = vpop.f32.mrf.mxu1 }
 0x248   : > { %v4987_v50 = vpop.f32.mrf.mxu0  ;;  %v2342_v45 = vadd.f32 %v2215_v30, %v6387_v46  ;;  %v5436_v46 = vld [vmem:[%s7099_s3 + $0x8] sm:$0xff]  }
 0x249   : > { %v6503_v0 = vadd.f32 %v4987_v50, %v1761_v15  ;;  %v5007_v63 = vpop.f32.mrf.mxu1  ;;  %5240 = vmatprep.subr.bf16.mxu0 %v5436_v46  ;;  %v5437_v15 = vld [vmem:[%s7099_s3] sm:$0xff]  }
 0x24a   : > { %v2024_v24 = vpop.f32.mrf.mxu0  ;;  %v6508_v32 = vadd.f32 %v5007_v63, %v6390_v12  ;;  %5241 = vmatpush3.bf16.msra.mxu0 %v5436_v46 }
 0x24b   : > { %v6510_v16 = vadd.f32 %v2024_v24, %v1759_v14  ;;  %v2218_v8 = vpop.f32.mrf.mxu1  ;;  %5242 = vmatprep.subr.bf16.mxu0 %v5437_v15 }
 0x24c   : > { %v5054_v13 = vpop.f32.mrf.mxu0  ;;  %v6512_v51 = vadd.f32 %v2218_v8, %v2037_v41 }
 0x24d   : > { %v6517_v61 = vadd.f32 %v5054_v13, %v2344_v6  ;;  %v5010_v4 = vpop.f32.mrf.mxu1  ;;  %v2045_v6 = vadd.f32 %v6423_v56, %v6410_v27 }
 0x24e   : > { %v2521_v52 = vpop.f32.mrf.mxu0  ;;  %v2348_v57 = vadd.f32 %v5010_v4, %v6398_v58  ;;  %5243 = vmatpush3.bf16.msra.mxu0 %v5437_v15 }
 0x24f   : > { %v6520_v31 = vadd.f32 %v2521_v52, %v2342_v45  ;;  %v2231_v12 = vpop.f32.mrf.mxu1 }
 0x250   : > { %v6522_v62 = vpop.f32.mrf.mxu0  ;;  %v2346_v43 = vadd.f32 %v2231_v12, %v6401_v55 }
 0x251   : > { %v5011_v11 = vpop.f32.mrf.mxu1 }
 0x252   : > { %v6527_v54 = vpop.f32.mrf.mxu0  ;;  %v2349_v25 = vadd.f32 %v5011_v11, %v6404_v23 }
 0x253   : > { %v2234_v20 = vpop.f32.mrf.mxu1 }
 0x254   : > { %v5058_v7 = vpop.f32.mrf.mxu0  ;;  %v6530_v58 = vadd.f32 %v2234_v20, %v2041_v1 }
 0x255   : > { %v6535_v17 = vadd.f32 %v5058_v7, %v2348_v57  ;;  %v5014_v21 = vpop.f32.mrf.mxu1 }
 0x256   : > { %v2537_v55 = vpop.f32.mrf.mxu0  ;;  %v2352_v37 = vadd.f32 %v5014_v21, %v6412_v49 }
 0x257   : > { %v6538_v9 = vadd.f32 %v2537_v55, %v2346_v43  ;;  %v2247_v36 = vpop.f32.mrf.mxu1 }
 0x258   : > { %v5059_v23 = vpop.f32.mrf.mxu0  ;;  %v2350_v14 = vadd.f32 %v2247_v36, %v6418_v28 }
 0x259   : > { %v6541_v3 = vadd.f32 %v5059_v23, %v2349_v25  ;;  %v5015_v48 = vpop.f32.mrf.mxu1 }
 0x25a   : > { %v6545_v30 = vpop.f32.mrf.mxu0  ;;  %v2353_v50 = vadd.f32 %v5015_v48, %v6421_v35  ;;  %v2049_v35 = vadd.f32 %v6442_v38, %v6427_v60 }
 0x25b   : > { %v2250_v45 = vpop.f32.mrf.mxu1 }
 0x25c   : > { %v5062_v49 = vpop.f32.mrf.mxu0  ;;  %v6548_v63 = vadd.f32 %v2250_v45, %v2045_v6 }
 0x25d   : > { %v6550_v41 = vadd.f32 %v5062_v49, %v2352_v37  ;;  %v5018_v24 = vpop.f32.mrf.mxu1 }
 0x25e   : > { %v2553_v8 = vpop.f32.mrf.mxu0  ;;  %v2356_v28 = vadd.f32 %v5018_v24, %v6429_v22 }
 0x25f   : > { %v6553_v13 = vadd.f32 %v2553_v8, %v2350_v14  ;;  %v2263_v46 = vpop.f32.mrf.mxu1 }
 0x260   : > { %v5063_v4 = vpop.f32.mrf.mxu0  ;;  %v2354_v27 = vadd.f32 %v2263_v46, %v6435_v53 }
 0x261   : > { %v6556_v56 = vadd.f32 %v5063_v4, %v2353_v50  ;;  %v5019_v52 = vpop.f32.mrf.mxu1 }
 0x262   : > { %v6560_v57 = vpop.f32.mrf.mxu0  ;;  %v2357_v12 = vadd.f32 %v5019_v52, %v6438_v34 }
 0x263   : > { %v2266_v43 = vpop.f32.mrf.mxu1 }
 0x264   : > { %v5066_v11 = vpop.f32.mrf.mxu0  ;;  %v6563_v1 = vadd.f32 %v2266_v43, %v2049_v35 }
 0x265   : > { %v6565_v22 = vadd.f32 %v5066_v11, %v2356_v28  ;;  %v5022_v25 = vpop.f32.mrf.mxu1 }
 0x266   : > { %v2569_v20 = vpop.f32.mrf.mxu0  ;;  %v2360_v53 = vadd.f32 %v5022_v25, %v6445_v42 }
 0x267   : > { %v6568_v7 = vadd.f32 %v2569_v20, %v2354_v27  ;;  %v2279_v15 = vpop.f32.mrf.mxu1 }
 0x268   : > { %v5067_v21 = vpop.f32.mrf.mxu0  ;;  %v2358_v60 = vadd.f32 %v2279_v15, %v6451_v47 }
 0x269   : > { %v6571_v38 = vadd.f32 %v5067_v21, %v2357_v12  ;;  %v5023_v55 = vpop.f32.mrf.mxu1 }
 0x26a   : > { %v6573_v34 = vpop.f32.mrf.mxu0  ;;  %v2361_v37 = vadd.f32 %v5023_v55, %v6454_v59 }
 0x26b   : > { %v2282_v36 = vpop.f32.mrf.mxu1 }
 0x26c   : > { %v5070_v23 = vpop.f32.mrf.mxu0  ;;  %v6577_v14 = vadd.f32 %v2282_v36, %v6459_v39 }
 0x26d   : > { %v6579_v48 = vadd.f32 %v5070_v23, %v2360_v53  ;;  %v5026_v42 = vpop.f32.mrf.mxu1 }
 0x26e   : > { %v2585_v6 = vpop.f32.mrf.mxu0  ;;  %v2364_v50 = vadd.f32 %v5026_v42, %v6461_v5 }
 0x26f   : > { %v6582_v45 = vadd.f32 %v2585_v6, %v2358_v60  ;;  %v2295_v47 = vpop.f32.mrf.mxu1 }
 0x270   : > { %v5071_v49 = vpop.f32.mrf.mxu0  ;;  %v2362_v24 = vadd.f32 %v2295_v47, %v6468_v10 }
 0x271   : > { %v6585_v8 = vadd.f32 %v5071_v49, %v2361_v37  ;;  %v5027_v59 = vpop.f32.mrf.mxu1 }
 0x272   : > { %v6587_v28 = vpop.f32.mrf.mxu0  ;;  %v2365_v39 = vadd.f32 %v5027_v59, %v6471_v18 }
 0x273   : > { %v2298_v46 = vpop.f32.mrf.mxu1 }
 0x274   : > { %v5074_v4 = vpop.f32.mrf.mxu0  ;;  %v6591_v27 = vadd.f32 %v2298_v46, %v6476_v26 }
 0x275   : > { %v6593_v52 = vadd.f32 %v5074_v4, %v2364_v50  ;;  %v5030_v5 = vpop.f32.mrf.mxu1 }
 0x276   : > { %7109 = vst [vmem:[#allocation6_spill] sm:$0xff] %v6591_v27  ;;  %v2601_v35 = vpop.f32.mrf.mxu0  ;;  %v2368_v12 = vadd.f32 %v5030_v5, %v6478_v40 }
 0x277   : > { %v6596_v43 = vadd.f32 %v2601_v35, %v2362_v24  ;;  %v2311_v10 = vpop.f32.mrf.mxu1 }
 0x278   : > { %v5075_v11 = vpop.f32.mrf.mxu0  ;;  %v2366_v25 = vadd.f32 %v2311_v10, %v6484_v19 }
 0x279   : > { %v6599_v20 = vadd.f32 %v5075_v11, %v2365_v39  ;;  %v5031_v18 = vpop.f32.mrf.mxu1 }
 0x27a   : > { %v6601_v53 = vpop.f32.mrf.mxu0  ;;  %v2369_v26 = vadd.f32 %v5031_v18, %v6487_v33 }
 0x27b   : > { %7110 = vst [vmem:[#allocation7_spill] sm:$0xff] %v6601_v53  ;;  %v2314_v15 = vpop.f32.mrf.mxu1 }
 0x27c   : > { %v5078_v21 = vpop.f32.mrf.mxu0  ;;  %v6605_v60 = vadd.f32 %v2314_v15, %v6492_v29 }
 0x27d   : > { %v6607_v55 = vadd.f32 %v5078_v21, %v2368_v12  ;;  %v5034_v40 = vpop.f32.mrf.mxu1 }
 0x27e   : > { %7111 = vst [vmem:[#allocation8_spill] sm:$0xff] %v6605_v60  ;;  %v2617_v37 = vpop.f32.mrf.mxu0  ;;  %v2372_v36 = vadd.f32 %v5034_v40, %v6497_v2 }
 0x27f   : > { %v6610_v23 = vadd.f32 %v2617_v37, %v2366_v25  ;;  %v2327_v19 = vpop.f32.mrf.mxu1 }
 0x280   : > { %v5079_v42 = vpop.f32.mrf.mxu0  ;;  %v2370_v6 = vadd.f32 %v2327_v19, %v6500_v44 }
 0x281   : > { %v6613_v50 = vadd.f32 %v5079_v42, %v2369_v26  ;;  %v5035_v33 = vpop.f32.mrf.mxu1 }
 0x282   : > { %v6615_v47 = vpop.f32.mrf.mxu0  ;;  %v2373_v29 = vadd.f32 %v5035_v33, %v6503_v0 }
 0x283   : > { %7112 = vst [vmem:[#allocation9_spill] sm:$0xff] %v6615_v47  ;;  %v2330_v49 = vpop.f32.mrf.mxu1 }
 0x284   : > { %v5082_v24 = vpop.f32.mrf.mxu0  ;;  %v6619_v59 = vadd.f32 %v2330_v49, %v6510_v16 }
 0x285   : > { %v6621_v39 = vadd.f32 %v5082_v24, %v2372_v36  ;;  %v5102_v2 = vpop.f32.mrf.mxu1 }
 0x286   : > { %7113 = vst [vmem:[#allocation10_spill] sm:$0xff] %v6619_v59  ;;  %v2633_v46 = vpop.f32.mrf.mxu0  ;;  %v6624_v4 = vadd.f32 %v5102_v2, %v6517_v61 }
 0x287   : > { %v6626_v44 = vadd.f32 %v2633_v46, %v2370_v6  ;;  %v2828_v5 = vpop.f32.mrf.mxu1 }
 0x288   : > { %v5083_v35 = vpop.f32.mrf.mxu0  ;;  %v6629_v12 = vadd.f32 %v2828_v5, %v6520_v31 }
 0x289   : > { %v6631_v0 = vadd.f32 %v5083_v35, %v2373_v29  ;;  %v6633_v10 = vpop.f32.mrf.mxu1 }
 0x28a   : > { %v6635_v16 = vpop.f32.mrf.mxu0 }
 0x28b   : > { %7114 = vst [vmem:[#allocation11_spill] sm:$0xff] %v6635_v16  ;;  %v6637_v11 = vpop.f32.mrf.mxu1 }
 0x28c   : > { %v6639_v25 = vpop.f32.mrf.mxu0 }
 0x28d   : > { %v5106_v18 = vpop.f32.mrf.mxu1 }
 0x28e   : > { %v6641_v61 = vpop.f32.mrf.mxu0  ;;  %v6644_v26 = vadd.f32 %v5106_v18, %v6535_v17 }
 0x28f   : > { %v2844_v15 = vpop.f32.mrf.mxu1 }
 0x290   : > { %v6646_v21 = vpop.f32.mrf.mxu0  ;;  %v6649_v31 = vadd.f32 %v2844_v15, %v6538_v9 }
 0x291   : > { %v5107_v40 = vpop.f32.mrf.mxu1 }
 0x292   : > { %v6651_v37 = vpop.f32.mrf.mxu0  ;;  %v6654_v36 = vadd.f32 %v5107_v40, %v6541_v3 }
 0x293   : > { %v6656_v19 = vpop.f32.mrf.mxu1 }
 0x294   : > { %v6658_v42 = vpop.f32.mrf.mxu0 }
 0x295   : > { %v5110_v6 = vpop.f32.mrf.mxu1 }
 0x296   : > { %v6660_v33 = vpop.f32.mrf.mxu0  ;;  %v6663_v17 = vadd.f32 %v5110_v6, %v6550_v41 }
 0x297   : > { %v2860_v29 = vpop.f32.mrf.mxu1 }
 0x298   : > { %v6666_v9 = vadd.f32 %v2860_v29, %v6553_v13  ;;  %v6668_v24 = vpop.f32.mrf.mxu0 }
 0x299   : > { %v5111_v49 = vpop.f32.mrf.mxu1 }
 0x29a   : > { %v6671_v3 = vadd.f32 %v5111_v49, %v6556_v56  ;;  %v6675_v5 = vpop.f32.mrf.mxu0 }
 0x29b   : > { %v6673_v2 = vpop.f32.mrf.mxu1 }
 0x29c   : > { %v6683_v15 = vpop.f32.mrf.mxu0 }
 0x29d   : > { %v5114_v46 = vpop.f32.mrf.mxu1 }
 0x29e   : > { %v6678_v35 = vadd.f32 %v5114_v46, %v6565_v22  ;;  %v6690_v29 = vpop.f32.mrf.mxu0 }
 0x29f   : > { %v2876_v41 = vpop.f32.mrf.mxu1 }
 0x2a0   : > { %v6681_v18 = vadd.f32 %v2876_v41, %v6568_v7  ;;  %v6698_v41 = vpop.f32.mrf.mxu0 }
 0x2a1   : > { %v5115_v13 = vpop.f32.mrf.mxu1 }
 0x2a2   : > { %v6686_v40 = vadd.f32 %v5115_v13, %v6571_v38  ;;  %v6705_v59 = vpop.f32.mrf.mxu0 }
 0x2a3   : > { %v6688_v56 = vpop.f32.mrf.mxu1 }
 0x2a5   : > { %v5118_v6 = vpop.f32.mrf.mxu1 }
 0x2a6   : > { %v6693_v49 = vadd.f32 %v5118_v6, %v6579_v48 }
 0x2a7   : > { %v2892_v22 = vpop.f32.mrf.mxu1 }
 0x2a8   : > { %v6696_v46 = vadd.f32 %v2892_v22, %v6582_v45  ;;  %v6713_v22 = vpop.f32.mrf.mxu0 }
 0x2a9   : > { %v5119_v7 = vpop.f32.mrf.mxu1 }
 0x2aa   : > { %v6701_v16 = vadd.f32 %v5119_v7, %v6585_v8  ;;  %v6720_v53 = vpop.f32.mrf.mxu0 }
 0x2ab   : > { %v6703_v38 = vpop.f32.mrf.mxu1 }
 0x2ad   : > { %v5122_v13 = vpop.f32.mrf.mxu1 }
 0x2ae   : > { %v6708_v47 = vadd.f32 %v5122_v13, %v6593_v52 }
 0x2af   : > { %v2908_v48 = vpop.f32.mrf.mxu1 }
 0x2b0   : > { %v6711_v6 = vadd.f32 %v2908_v48, %v6596_v43  ;;  %v6728_v48 = vpop.f32.mrf.mxu0 }
 0x2b1   : > { %v5123_v45 = vpop.f32.mrf.mxu1 }
 0x2b2   : > { %7115 = vst [vmem:[#allocation12_spill] sm:$0xff] %v6711_v6  ;;  %v6716_v60 = vadd.f32 %v5123_v45, %v6599_v20 }
 0x2b3   : > { %v6718_v8 = vpop.f32.mrf.mxu1 }
 0x2b4   : > { %7116 = vst [vmem:[#allocation13_spill] sm:$0xff] %v6716_v60  ;;  %7117 = vst [vmem:[#allocation14_spill] sm:$0xff] %v6718_v8  ;;  %v6735_v60 = vpop.f32.mrf.mxu0 }
 0x2b5   : > { %v5126_v7 = vpop.f32.mrf.mxu1 }
 0x2b6   : > { %v6723_v27 = vadd.f32 %v5126_v7, %v6607_v55 }
 0x2b7   : > { %v2924_v52 = vpop.f32.mrf.mxu1 }
 0x2b8   : > { %v6726_v13 = vadd.f32 %v2924_v52, %v6610_v23  ;;  %v6743_v52 = vpop.f32.mrf.mxu0 }
 0x2b9   : > { %v5127_v43 = vpop.f32.mrf.mxu1 }
 0x2ba   : > { %7118 = vst [vmem:[#allocation15_spill] sm:$0xff] %v6726_v13  ;;  %v6731_v6 = vadd.f32 %v5127_v43, %v6613_v50  ;;  %v2651_v43 = vadd.f32 %v6522_v62, %v6508_v32 }
 0x2bb   : > { %v6733_v20 = vpop.f32.mrf.mxu1 }
 0x2bc   : > { %7119 = vst [vmem:[#allocation16_spill] sm:$0xff] %v6731_v6  ;;  %v3263_v6 = vadd.f32 %v6639_v25, %v6624_v4 }
 0x2bd   : > { %v5130_v45 = vpop.f32.mrf.mxu1 }
 0x2be   : > { %v6738_v8 = vadd.f32 %v5130_v45, %v6621_v39  ;;  %v2649_v45 = vadd.f32 %v6527_v54, %v6512_v51  ;;  %v6772_v51 = vld [vmem:[%s7103_s7] ss:$0 sm:$0xff] }
 0x2bf   : > { %v2940_v55 = vpop.f32.mrf.mxu1 }
 0x2c0   : > { %v6741_v7 = vadd.f32 %v2940_v55, %v6626_v44  ;;  %v6757_v44 = vld [vmem:[%s7102_s6] ss:$0 sm:$0xff]  ;;  %v2958_v55 = vadd.f32 %v6633_v10, %v2651_v43  ;;  %v2956_v25 = vadd.f32 %v6637_v11, %v2649_v45  ;;  %v3267_v11 = vadd.f32 %v6658_v42, %v6644_v26 }
 0x2c1   : > { %v5131_v23 = vpop.f32.mrf.mxu1 }
 0x2c2   : > { %v6746_v13 = vadd.f32 %v5131_v23, %v6631_v0  ;;  %v3261_v0 = vadd.f32 %v6641_v61, %v6629_v12  ;;  %v6764_v23 = vpop.f32.mrf.mxu0  ;;  %v3264_v4 = vadd.f32 %v6646_v21, %v2958_v55  ;;  %v3262_v12 = vadd.f32 %v6651_v37, %v2956_v25 }
 0x2c3   : > { %v6748_v50 = vpop.f32.mrf.mxu1  ;;  %v3265_v37 = vadd.f32 %v6660_v33, %v6649_v31  ;;  %v3268_v31 = vadd.f32 %v6668_v24, %v6654_v36  ;;  %v2657_v36 = vadd.f32 %v6560_v57, %v6548_v63 }
 0x2c4   : > { %7120 = vst [vmem:[#allocation17_spill] sm:$0xff] %v6746_v13  ;;  %7121 = vst [vmem:[#allocation18_spill] sm:$0xff] %v6748_v50  ;;  %v6775_v10 = vpop.f32.mrf.mxu0 }
 0x2c5   : > { %v5198_v39 = vpop.f32.mrf.mxu1 }
 0x2c6   : > { %v3569_v32 = vadd.f32 %v5198_v39, %v3263_v6 }
 0x2c7   : > { %v3440_v62 = vpop.f32.mrf.mxu1 }
 0x2c8   : > { %v3608_v13 = vmul.f32 %v6757_v44, %v3569_v32  ;;  %v3567_v50 = vadd.f32 %v3440_v62, %v3261_v0  ;;  %v2653_v0 = vadd.f32 %v6545_v30, %v6530_v58  ;;  %v6786_v32 = vpop.f32.mrf.mxu0 }
 0x2c9   : > { %v5199_v54 = vpop.f32.mrf.mxu1 }
 0x2ca   : > { %v3606_v61 = vmul.f32 %v6757_v44, %v3567_v50  ;;  %v3570_v6 = vadd.f32 %v5199_v54, %v3264_v4  ;;  %v3647_v21 = vadd.f32 %v6772_v51, %v3608_v13  ;;  %v2960_v13 = vadd.f32 %v6656_v19, %v2653_v0 }
 0x2cb   : > { %v3443_v43 = vpop.f32.mrf.mxu1  ;;  %v3271_v0 = vadd.f32 %v6683_v15, %v6663_v17  ;;  %v2964_v17 = vadd.f32 %v6673_v2, %v2657_v36 }
 0x2cc   : > { %v3609_v39 = vmul.f32 %v6757_v44, %v3570_v6  ;;  %v3568_v45 = vadd.f32 %v3443_v43, %v3262_v12  ;;  %v3645_v50 = vadd.f32 %v6772_v51, %v3606_v61  ;;  %v3679_v25 = vmax.f32 %v3647_v21, 0.0  ;;  %v6797_v6 = vpop.f32.mrf.mxu0 }
 0x2cd   : > { %v5202_v55 = vpop.f32.mrf.mxu1  ;;  %v3266_v61 = vadd.f32 %v6675_v5, %v2960_v13 }
 0x2ce   : > { %v3648_v62 = vadd.f32 %v6772_v51, %v3609_v39  ;;  %v3607_v26 = vmul.f32 %v6757_v44, %v3568_v45  ;;  %v3573_v42 = vadd.f32 %v5202_v55, %v3267_v11  ;;  %v3677_v43 = vmax.f32 %v3645_v50, 0.0 }
 0x2cf   : > { %v3456_v4 = vpop.f32.mrf.mxu1  ;;  %v3269_v50 = vadd.f32 %v6690_v29, %v6666_v9 }
 0x2d0   : > { %v3680_v54 = vmax.f32 %v3648_v62, 0.0  ;;  %v3646_v58 = vadd.f32 %v6772_v51, %v3607_v26  ;;  %v3571_v30 = vadd.f32 %v3456_v4, %v3265_v37  ;;  %v3612_v33 = vmul.f32 %v6757_v44, %v3573_v42  ;;  %v6808_v26 = vpop.f32.mrf.mxu0 }
 0x2d1   : > { %v5203_v12 = vpop.f32.mrf.mxu1  ;;  %v3272_v4 = vadd.f32 %v6698_v41, %v6671_v3  ;;  %v3275_v3 = vadd.f32 %v6713_v22, %v6678_v35 }
 0x2d2   : > { %v3710_v11 = vpack.c.bf16 %v3680_v54, %v3679_v25  ;;  %v3678_v39 = vmax.f32 %v3646_v58, 0.0  ;;  %v3610_v19 = vmul.f32 %v6757_v44, %v3571_v30  ;;  %v3574_v21 = vadd.f32 %v5203_v12, %v3268_v31  ;;  %v6819_v2 = vpop.f32.mrf.mxu0 }
 0x2d3   : > { %v3459_v45 = vpop.f32.mrf.mxu1  ;;  %v3651_v24 = vadd.f32 %v6772_v51, %v3612_v33  ;;  %v3270_v31 = vadd.f32 %v6705_v59, %v2964_v17  ;;  %v2661_v59 = vadd.f32 %v6573_v34, %v6563_v1 }
 0x2d4   : > { %v3572_v37 = vadd.f32 %v3459_v45, %v3266_v61  ;;  %v3709_v55 = vpack.c.bf16 %v3678_v39, %v3677_v43  ;;  %v3613_v5 = vmul.f32 %v6757_v44, %v3574_v21  ;;  %v3649_v15 = vadd.f32 %v6772_v51, %v3610_v19 }
 0x2d5   : > { %v5206_v62 = vpop.f32.mrf.mxu1  ;;  %v3683_v54 = vmax.f32 %v3651_v24, 0.0  ;;  %v3273_v45 = vadd.f32 %v6720_v53, %v6681_v18  ;;  %v3276_v18 = vadd.f32 %v6728_v48, %v6686_v40  ;;  %v2665_v40 = vadd.f32 %v6587_v28, %v6577_v14 }
 0x2d6   : > { %v3611_v42 = vmul.f32 %v6757_v44, %v3572_v37  ;;  %v3577_v13 = vadd.f32 %v5206_v62, %v3271_v0  ;;  %5244 = vmatprep.mubr.bf16.mxu0 %v3709_v55  ;;  %v3652_v63 = vadd.f32 %v6772_v51, %v3613_v5  ;;  %v3681_v43 = vmax.f32 %v3649_v15, 0.0  ;;  %v6830_v55 = vpop.f32.mrf.mxu0 }
 0x2d7   : > { %v3472_v57 = vpop.f32.mrf.mxu1  ;;  %5245 = vmatmul.mubr.bf16.vlgmr.msra.gmra.mxu0 %v3710_v11  ;;  %v2968_v5 = vadd.f32 %v6688_v56, %v2661_v59 }
 0x2d8   : > { %v3650_v25 = vadd.f32 %v6772_v51, %v3611_v42  ;;  %v3616_v9 = vmul.f32 %v6757_v44, %v3577_v13  ;;  %v3575_v29 = vadd.f32 %v3472_v57, %v3269_v50  ;;  %v3684_v58 = vmax.f32 %v3652_v63, 0.0  ;;  %v6841_v15 = vpop.f32.mrf.mxu0 }
 0x2d9   : > { %v5207_v30 = vpop.f32.mrf.mxu1  ;;  %v3274_v17 = vadd.f32 %v6735_v60, %v2968_v5  ;;  %v7123_v5 = vld [vmem:[#allocation7_spill] sm:$0xff] }
 0x2da   : > { %v3682_v33 = vmax.f32 %v3650_v25, 0.0  ;;  %v3614_v12 = vmul.f32 %v6757_v44, %v3575_v29  ;;  %v3578_v61 = vadd.f32 %v5207_v30, %v3272_v4  ;;  %v3712_v11 = vpack.c.bf16 %v3684_v58, %v3683_v54 }
 0x2db   : > { %v3475_v39 = vpop.f32.mrf.mxu1  ;;  %v3655_v41 = vadd.f32 %v6772_v51, %v3616_v9  ;;  %v3279_v29 = vadd.f32 %v6743_v52, %v6693_v49  ;;  %v2972_v49 = vadd.f32 %v6703_v38, %v2665_v40 }
 0x2dc   : > { %v3617_v19 = vmul.f32 %v6757_v44, %v3578_v61  ;;  %v3576_v21 = vadd.f32 %v3475_v39, %v3270_v31  ;;  %v3711_v37 = vpack.c.bf16 %v3682_v33, %v3681_v43  ;;  %v3653_v36 = vadd.f32 %v6772_v51, %v3614_v12  ;;  %v6852_v33 = vpop.f32.mrf.mxu0 }
 0x2dd   : > { %v5210_v0 = vpop.f32.mrf.mxu1  ;;  %v3687_v50 = vmax.f32 %v3655_v41, 0.0  ;;  %v3277_v31 = vadd.f32 %v6764_v23, %v6696_v46  ;;  %v3280_v43 = vadd.f32 %v6775_v10, %v6701_v16  ;;  %v3283_v16 = vadd.f32 %v6797_v6, %v6708_v47 }
 0x2de   : > { %v3656_v24 = vadd.f32 %v6772_v51, %v3617_v19  ;;  %v3615_v35 = vmul.f32 %v6757_v44, %v3576_v21  ;;  %v3581_v22 = vadd.f32 %v5210_v0, %v3275_v3  ;;  %5248 = vmatprep.mubr.bf16.mxu0 %v3711_v37  ;;  %v3685_v63 = vmax.f32 %v3653_v36, 0.0  ;;  %v5175_v38 = vpop.f32.mrf.mxu0 }
 0x2df   : > { %v3488_v62 = vpop.f32.mrf.mxu1  ;;  %5249 = vmatmul.mubr.bf16.gmra.mxu0 %v3712_v11  ;;  %v3278_v19 = vadd.f32 %v6786_v32, %v2972_v49  ;;  %v7124_v32 = vld [vmem:[#allocation12_spill] sm:$0xff]  ;;  %v3287_v49 = vadd.f32 %v6841_v15, %v6723_v27 }
 0x2e0   : > { %v3688_v1 = vmax.f32 %v3656_v24, 0.0  ;;  %v3654_v34 = vadd.f32 %v6772_v51, %v3615_v35  ;;  %v3579_v53 = vadd.f32 %v3488_v62, %v3273_v45  ;;  %v3620_v42 = vmul.f32 %v6757_v44, %v3581_v22  ;;  %v7122_v22 = vld [vmem:[#allocation6_spill] sm:$0xff] }
 0x2e1   : > { %v5211_v13 = vpop.f32.mrf.mxu1  ;;  %v2669_v62 = vadd.f32 %v7123_v5, %v7122_v22 }
 0x2e2   : > { %v3714_v56 = vpack.c.bf16 %v3688_v1, %v3687_v50  ;;  %v3686_v57 = vmax.f32 %v3654_v34, 0.0  ;;  %v3618_v4 = vmul.f32 %v6757_v44, %v3579_v53  ;;  %v3582_v25 = vadd.f32 %v5211_v13, %v3276_v18  ;;  %v3233_v53 = vpop.f32.mrf.mxu0  ;;  %v7125_v13 = vld [vmem:[#allocation14_spill] sm:$0xff] }
 0x2e3   : > { %v3491_v9 = vpop.f32.mrf.mxu1  ;;  %v3659_v48 = vadd.f32 %v6772_v51, %v3620_v42  ;;  %v3281_v50 = vadd.f32 %v6808_v26, %v7124_v32  ;;  %v7126_v26 = vld [vmem:[#allocation13_spill] sm:$0xff] }
 0x2e4   : > { %v3580_v54 = vadd.f32 %v3491_v9, %v3274_v17  ;;  %v3713_v58 = vpack.c.bf16 %v3686_v57, %v3685_v63  ;;  %v3621_v60 = vmul.f32 %v6757_v44, %v3582_v25  ;;  %v3657_v52 = vadd.f32 %v6772_v51, %v3618_v4  ;;  %v5178_v40 = vpop.f32.mrf.mxu0 }
 0x2e5   : > { %v5214_v30 = vpop.f32.mrf.mxu1  ;;  %v3691_v39 = vmax.f32 %v3659_v48, 0.0  ;;  %v2976_v17 = vadd.f32 %v7125_v13, %v2669_v62  ;;  %v3284_v9 = vadd.f32 %v6819_v2, %v7126_v26  ;;  %v7128_v2 = vld [vmem:[#allocation9_spill] sm:$0xff]  ;;  %v7133_v26 = vld [vmem:[#allocation18_spill] sm:$0xff] }
 0x2e6   : > { %v3619_v12 = vmul.f32 %v6757_v44, %v3580_v54  ;;  %v3585_v61 = vadd.f32 %v5214_v30, %v3279_v29  ;;  %5252 = vmatprep.mubr.bf16.mxu0 %v3713_v58  ;;  %v3660_v14 = vadd.f32 %v6772_v51, %v3621_v60  ;;  %v3689_v0 = vmax.f32 %v3657_v52, 0.0 }
 0x2e7   : > { %v3504_v28 = vpop.f32.mrf.mxu1  ;;  %5253 = vmatmul.mubr.bf16.gmra.mxu0 %v3714_v56  ;;  %v3282_v58 = vadd.f32 %v6830_v55, %v2976_v17 }
 0x2e8   : > { %v3658_v11 = vadd.f32 %v6772_v51, %v3619_v12  ;;  %v3624_v46 = vmul.f32 %v6757_v44, %v3585_v61  ;;  %v3583_v23 = vadd.f32 %v3504_v28, %v3277_v31  ;;  %v3692_v3 = vmax.f32 %v3660_v14, 0.0  ;;  %v7127_v28 = vld [vmem:[#allocation8_spill] sm:$0xff] }
 0x2e9   : > { %v5215_v41 = vpop.f32.mrf.mxu1 }
 0x2ea   : > { %v3690_v21 = vmax.f32 %v3658_v11, 0.0  ;;  %v3622_v59 = vmul.f32 %v6757_v44, %v3583_v23  ;;  %v3586_v45 = vadd.f32 %v5215_v41, %v3280_v43  ;;  %v3716_v37 = vpack.c.bf16 %v3692_v3, %v3691_v39  ;;  %v7129_v23 = vld [vmem:[#allocation15_spill] sm:$0xff]  ;;  %v3246_v3 = vpop.f32.mrf.mxu0 }
 0x2eb   : > { %v3507_v36 = vpop.f32.mrf.mxu1  ;;  %v3663_v10 = vadd.f32 %v6772_v51, %v3624_v46  ;;  %v2673_v43 = vadd.f32 %v7128_v2, %v7127_v28  ;;  %v3285_v39 = vadd.f32 %v6852_v33, %v7129_v23 }
 0x2ec   : > { %v3625_v24 = vmul.f32 %v6757_v44, %v3586_v45  ;;  %v3584_v35 = vadd.f32 %v3507_v36, %v3278_v19  ;;  %v3715_v34 = vpack.c.bf16 %v3690_v21, %v3689_v0  ;;  %v3661_v18 = vadd.f32 %v6772_v51, %v3622_v59  ;;  %v7130_v45 = vld [vmem:[#allocation16_spill] sm:$0xff]  ;;  %v5179_v22 = vpop.f32.mrf.mxu0 }
 0x2ed   : > { %v5218_v1 = vpop.f32.mrf.mxu1  ;;  %v3695_v56 = vmax.f32 %v3663_v10, 0.0  ;;  %v2980_v27 = vadd.f32 %v6733_v20, %v2673_v43  ;;  %v3288_v0 = vadd.f32 %v5175_v38, %v7130_v45  ;;  %v3291_v38 = vadd.f32 %v5178_v40, %v6738_v8 }
 0x2ee   : > { %v3664_v42 = vadd.f32 %v6772_v51, %v3625_v24  ;;  %v3623_v47 = vmul.f32 %v6757_v44, %v3584_v35  ;;  %v3589_v6 = vadd.f32 %v5218_v1, %v3283_v16  ;;  %5256 = vmatprep.mubr.bf16.mxu0 %v3715_v34  ;;  %v3693_v48 = vmax.f32 %v3661_v18, 0.0 }
 0x2ef   : > { %v3520_v63 = vpop.f32.mrf.mxu1  ;;  %5257 = vmatmul.mubr.bf16.gmra.mxu0 %v3716_v37  ;;  %v3286_v35 = vadd.f32 %v3233_v53, %v2980_v27  ;;  %v3289_v53 = vadd.f32 %v3246_v3, %v6741_v7  ;;  %v7134_v7 = vld [vmem:[#allocation17_spill] sm:$0xff] }
 0x2f0   : > { %v3696_v57 = vmax.f32 %v3664_v42, 0.0  ;;  %v3662_v4 = vadd.f32 %v6772_v51, %v3623_v47  ;;  %v3587_v25 = vadd.f32 %v3520_v63, %v3281_v50  ;;  %v3628_v29 = vmul.f32 %v6757_v44, %v3589_v6  ;;  %v7131_v47 = vld [vmem:[#allocation10_spill] sm:$0xff]  ;;  %v7132_v6 = vld [vmem:[#allocation11_spill] sm:$0xff] }
 0x2f1   : > { %v5219_v54 = vpop.f32.mrf.mxu1  ;;  %v2677_v13 = vadd.f32 %v7132_v6, %v7131_v47 }
 0x2f2   : > { %v3718_v60 = vpack.c.bf16 %v3696_v57, %v3695_v56  ;;  %v3694_v30 = vmax.f32 %v3662_v4, 0.0  ;;  %v3626_v31 = vmul.f32 %v6757_v44, %v3587_v25  ;;  %v3590_v12 = vadd.f32 %v5219_v54, %v3284_v9  ;;  %v3249_v56 = vpop.f32.mrf.mxu0 }
 0x2f3   : > { %v3523_v61 = vpop.f32.mrf.mxu1  ;;  %v3667_v11 = vadd.f32 %v6772_v51, %v3628_v29  ;;  %v2984_v9 = vadd.f32 %v7133_v26, %v2677_v13  ;;  %v5458_v26 = vld [vmem:[%s5655_s21 + $0x10] sm:$0xff]  }
 0x2f4   : > { %v3588_v52 = vadd.f32 %v3523_v61, %v3282_v58  ;;  %v3717_v14 = vpack.c.bf16 %v3694_v30, %v3693_v48  ;;  %v3629_v55 = vmul.f32 %v6757_v44, %v3590_v12  ;;  %v3665_v15 = vadd.f32 %v6772_v51, %v3626_v31 }
 0x2f5   : > { %v5222_v46 = vpop.f32.mrf.mxu1  ;;  %v3699_v33 = vmax.f32 %v3667_v11, 0.0  ;;  %v3290_v30 = vadd.f32 %v3249_v56, %v2984_v9  ;;  %v4032_v9 = vunpack.c.l.bf16 %v5458_v26 }
 0x2f6   : > { %v3627_v41 = vmul.f32 %v6757_v44, %v3588_v52  ;;  %v3593_v19 = vadd.f32 %v5222_v46, %v3287_v49  ;;  %5260 = vmatprep.mubr.bf16.mxu0 %v3717_v14  ;;  %v3668_v21 = vadd.f32 %v6772_v51, %v3629_v55  ;;  %v3697_v32 = vmax.f32 %v3665_v15, 0.0 }
 0x2f7   : > { %v3536_v59 = vpop.f32.mrf.mxu1  ;;  %5261 = vmatmul.mubr.bf16.gmra.mxu0 %v3718_v60  ;;  %v3292_v60 = vadd.f32 %v5179_v22, %v7134_v7 }
 0x2f8   : > { %v3666_v37 = vadd.f32 %v6772_v51, %v3627_v41  ;;  %v3632_v36 = vmul.f32 %v6757_v44, %v3593_v19  ;;  %v3591_v16 = vadd.f32 %v3536_v59, %v3285_v39  ;;  %v3700_v10 = vmax.f32 %v3668_v21, 0.0 }
 0x2f9   : > { %v5223_v24 = vpop.f32.mrf.mxu1 }
 0x2fa   : > { %v3698_v5 = vmax.f32 %v3666_v37, 0.0  ;;  %v3630_v20 = vmul.f32 %v6757_v44, %v3591_v16  ;;  %v3594_v62 = vadd.f32 %v5223_v24, %v3288_v0  ;;  %v3720_v50 = vpack.c.bf16 %v3700_v10, %v3699_v33  ;;  %v5455_v37 = vld [vmem:[%s5655_s21 + $0x8] sm:$0xff]   ;;  %v5456_v10 = vld [vmem:[%s5655_s21] sm:$0xff]  }
 0x2fb   : > { %v3539_v1 = vpop.f32.mrf.mxu1  ;;  %v3671_v34 = vadd.f32 %v6772_v51, %v3632_v36  ;;  %v4030_v36 = vunpack.c.l.bf16 %v5455_v37  ;;  %v4028_v24 = vunpack.c.l.bf16 %v5456_v10 }
 0x2fc   : > { %v3633_v18 = vmul.f32 %v6757_v44, %v3594_v62  ;;  %v3592_v42 = vadd.f32 %v3539_v1, %v3286_v35  ;;  %v3719_v63 = vpack.c.bf16 %v3698_v5, %v3697_v32  ;;  %v3669_v57 = vadd.f32 %v6772_v51, %v3630_v20 }
 0x2fd   : > { %v5226_v17 = vpop.f32.mrf.mxu1  ;;  %v3703_v54 = vmax.f32 %v3671_v34, 0.0  ;;  %v4031_v20 = vunpack.c.h.bf16 %v5455_v37  ;;  %v4029_v1 = vunpack.c.h.bf16 %v5456_v10 }
 0x2fe   : > { %v3672_v4 = vadd.f32 %v6772_v51, %v3633_v18  ;;  %v3631_v25 = vmul.f32 %v6757_v44, %v3592_v42  ;;  %v3597_v8 = vadd.f32 %v5226_v17, %v3291_v38  ;;  %5264 = vmatprep.mubr.bf16.mxu0 %v3719_v63  ;;  %v3701_v61 = vmax.f32 %v3669_v57, 0.0  ;;  %v5457_v63 = vld [vmem:[%s5655_s21 + $0x18] sm:$0xff]  }
 0x2ff   : > { %v3552_v29 = vpop.f32.mrf.mxu1  ;;  %5265 = vmatmul.mubr.bf16.gmra.mxu0 %v3720_v50  ;;  %v4034_v56 = vunpack.c.l.bf16 %v5457_v63 }
 0x300   : > { %v3704_v58 = vmax.f32 %v3672_v4, 0.0  ;;  %v3670_v40 = vadd.f32 %v6772_v51, %v3631_v25  ;;  %v3595_v48 = vadd.f32 %v3552_v29, %v3289_v53  ;;  %v3636_v31 = vmul.f32 %v6757_v44, %v3597_v8 }
 0x301   : > { %v5227_v12 = vpop.f32.mrf.mxu1 }
 0x302   : > { %v3722_v49 = vpack.c.bf16 %v3704_v58, %v3703_v54  ;;  %v3702_v52 = vmax.f32 %v3670_v40, 0.0  ;;  %v3634_v14 = vmul.f32 %v6757_v44, %v3595_v48  ;;  %v3598_v28 = vadd.f32 %v5227_v12, %v3292_v60 }
 0x303   : > { %v3555_v2 = vpop.f32.mrf.mxu1  ;;  %v3675_v55 = vadd.f32 %v6772_v51, %v3636_v31  ;;  %v4035_v48 = vunpack.c.h.bf16 %v5457_v63  ;;  %v4033_v31 = vunpack.c.h.bf16 %v5458_v26 }
 0x304   : > { %v3596_v43 = vadd.f32 %v3555_v2, %v3290_v30  ;;  %v3721_v11 = vpack.c.bf16 %v3702_v52, %v3701_v61  ;;  %v3637_v46 = vmul.f32 %v6757_v44, %v3598_v28  ;;  %v3673_v23 = vadd.f32 %v6772_v51, %v3634_v14  ;;  %v5459_v28 = vld [vmem:[%s5655_s21 + $0x28] sm:$0xff]  }
 0x305   : > { %v3707_v19 = vmax.f32 %v3675_v55, 0.0  ;;  %v4038_v2 = vunpack.c.l.bf16 %v5459_v28 }
 0x306   : > { %v3635_v39 = vmul.f32 %v6757_v44, %v3596_v43  ;;  %5268 = vmatprep.mubr.bf16.mxu0 %v3721_v11  ;;  %v3676_v3 = vadd.f32 %v6772_v51, %v3637_v46  ;;  %v3705_v15 = vmax.f32 %v3673_v23, 0.0  ;;  %v6921_v44 = vld [vmem:[%s7104_s8] ss:$0 sm:$0xff] }
 0x307   : > { %5269 = vmatmul.mubr.bf16.gmra.mxu0 %v3722_v49 }
 0x308   : > { %v3674_v41 = vadd.f32 %v6772_v51, %v3635_v39  ;;  %v3708_v27 = vmax.f32 %v3676_v3, 0.0  ;;  %v6927_v51 = vld [vmem:[%s7105_s9] ss:$0 sm:$0xff] }
 0x309   : > { %v5460_v39 = vld [vmem:[%s5655_s21 + $0x20] sm:$0xff]  }
 0x30a   : > { %v3706_v21 = vmax.f32 %v3674_v41, 0.0  ;;  %v3724_v59 = vpack.c.bf16 %v3708_v27, %v3707_v19  ;;  %v4036_v3 = vunpack.c.l.bf16 %v5460_v39 }
 0x30c   : > { %v3723_v45 = vpack.c.bf16 %v3706_v21, %v3705_v15 }
 0x30e   : > { %5272 = vmatprep.mubr.bf16.mxu0 %v3723_v45 }
 0x30f   : > { %5273 = vmatmul.mubr.bf16.gmra.mxu0 %v3724_v59  ;;  %v4039_v59 = vunpack.c.h.bf16 %v5459_v28 }
 0x397   : > { %v5246_v0 = vpop.f32.mrf.mxu0 }
 0x398   : > { %v3959_v16 = vmul.f32 %v5246_v0, %v6921_v44 }
 0x399   : > { %v3823_v33 = vpop.f32.mrf.mxu0 }
 0x39a   : > { %v3998_v35 = vadd.f32 %v6927_v51, %v3959_v16  ;;  %v3957_v22 = vmul.f32 %v6921_v44, %v3823_v33  ;;  %v4037_v33 = vunpack.c.h.bf16 %v5460_v39 }
 0x39b   : > { %v5247_v5 = vpop.f32.mrf.mxu0 }
 0x39c   : > { %v4062_v62 = vadd.f32 %v4030_v36, %v3998_v35  ;;  %v3996_v32 = vadd.f32 %v6927_v51, %v3957_v22  ;;  %v3960_v50 = vmul.f32 %v5247_v5, %v6921_v44 }
 0x39d   : > { %v3826_v38 = vpop.f32.mrf.mxu0 }
 0x39e   : > { %v4094_v34 = vmax.f32 %v4062_v62, 0.0  ;;  %v4060_v18 = vadd.f32 %v4028_v24, %v3996_v32  ;;  %v3999_v42 = vadd.f32 %v6927_v51, %v3960_v50  ;;  %v3958_v47 = vmul.f32 %v6921_v44, %v3826_v38 }
 0x39f   : > { %v5250_v17 = vpop.f32.mrf.mxu0 }
 0x3a0   : > { %4126 = vst [vmem:[%s6940_s29 + $0x10] sm:$0xff] %v4094_v34  ;;  %v4092_v6 = vmax.f32 %v4060_v18, 0.0  ;;  %v4063_v13 = vadd.f32 %v4031_v20, %v3999_v42  ;;  %v3997_v53 = vadd.f32 %v6927_v51, %v3958_v47  ;;  %v3963_v57 = vmul.f32 %v5250_v17, %v6921_v44  ;;  %v5461_v20 = vld [vmem:[%s5655_s21 + $0x38] sm:$0xff]   ;;  %v5462_v18 = vld [vmem:[%s5655_s21 + $0x30] sm:$0xff]  }
 0x3a1   : > { %v3839_v8 = vpop.f32.mrf.mxu0  ;;  %v4042_v62 = vunpack.c.l.bf16 %v5461_v20  ;;  %v4040_v42 = vunpack.c.l.bf16 %v5462_v18  ;;  %v4043_v63 = vunpack.c.h.bf16 %v5461_v20  ;;  %v4041_v26 = vunpack.c.h.bf16 %v5462_v18 }
 0x3a2   : > { %4124 = vst [vmem:[%s6940_s29] sm:$0xff] %v4092_v6  ;;  %v4095_v4 = vmax.f32 %v4063_v13, 0.0  ;;  %v4061_v25 = vadd.f32 %v4029_v1, %v3997_v53  ;;  %v4002_v29 = vadd.f32 %v6927_v51, %v3963_v57  ;;  %v3961_v54 = vmul.f32 %v6921_v44, %v3839_v8 }
 0x3a3   : > { %v5251_v40 = vpop.f32.mrf.mxu0 }
 0x3a4   : > { %4127 = vst [vmem:[%s6940_s29 + $0x18] sm:$0xff] %v4095_v4  ;;  %v4093_v58 = vmax.f32 %v4061_v25, 0.0  ;;  %v4066_v7 = vadd.f32 %v4034_v56, %v4002_v29  ;;  %v4000_v60 = vadd.f32 %v6927_v51, %v3961_v54  ;;  %v3964_v30 = vmul.f32 %v5251_v40, %v6921_v44 }
 0x3a5   : > { %v3842_v12 = vpop.f32.mrf.mxu0 }
 0x3a6   : > { %4125 = vst [vmem:[%s6940_s29 + $0x8] sm:$0xff] %v4093_v58  ;;  %v4098_v61 = vmax.f32 %v4066_v7, 0.0  ;;  %v4064_v49 = vadd.f32 %v4032_v9, %v4000_v60  ;;  %v4003_v52 = vadd.f32 %v6927_v51, %v3964_v30  ;;  %v3962_v14 = vmul.f32 %v6921_v44, %v3842_v12 }
 0x3a7   : > { %v5254_v43 = vpop.f32.mrf.mxu0 }
 0x3a8   : > { %4130 = vst [vmem:[%s6940_s29 + $0x30] sm:$0xff] %v4098_v61  ;;  %v4096_v11 = vmax.f32 %v4064_v49, 0.0  ;;  %v4067_v55 = vadd.f32 %v4035_v48, %v4003_v52  ;;  %v4001_v46 = vadd.f32 %v6927_v51, %v3962_v14  ;;  %v3967_v23 = vmul.f32 %v5254_v43, %v6921_v44  ;;  %v5463_v48 = vld [vmem:[%s5655_s21 + $0x48] sm:$0xff]   ;;  %v5464_v49 = vld [vmem:[%s5655_s21 + $0x40] sm:$0xff]  }
 0x3a9   : > { %v3855_v41 = vpop.f32.mrf.mxu0  ;;  %v4046_v7 = vunpack.c.l.bf16 %v5463_v48  ;;  %v4044_v52 = vunpack.c.l.bf16 %v5464_v49 }
 0x3aa   : > { %4128 = vst [vmem:[%s6940_s29 + $0x20] sm:$0xff] %v4096_v11  ;;  %v4099_v19 = vmax.f32 %v4067_v55, 0.0  ;;  %v4065_v27 = vadd.f32 %v4033_v31, %v4001_v46  ;;  %v4006_v15 = vadd.f32 %v6927_v51, %v3967_v23  ;;  %v3965_v21 = vmul.f32 %v6921_v44, %v3855_v41 }
 0x3ab   : > { %v5255_v45 = vpop.f32.mrf.mxu0  ;;  %v4047_v55 = vunpack.c.h.bf16 %v5463_v48 }
 0x3ac   : > { %4131 = vst [vmem:[%s6940_s29 + $0x38] sm:$0xff] %v4099_v19  ;;  %v4097_v0 = vmax.f32 %v4065_v27, 0.0  ;;  %v4070_v37 = vadd.f32 %v4038_v2, %v4006_v15  ;;  %v4004_v36 = vadd.f32 %v6927_v51, %v3965_v21  ;;  %v3968_v16 = vmul.f32 %v5255_v45, %v6921_v44 }
 0x3ad   : > { %v3858_v10 = vpop.f32.mrf.mxu0  ;;  %v4045_v19 = vunpack.c.h.bf16 %v5464_v49 }
 0x3ae   : > { %4129 = vst [vmem:[%s6940_s29 + $0x28] sm:$0xff] %v4097_v0  ;;  %v4102_v24 = vmax.f32 %v4070_v37, 0.0  ;;  %v4068_v35 = vadd.f32 %v4036_v3, %v4004_v36  ;;  %v4007_v22 = vadd.f32 %v6927_v51, %v3968_v16  ;;  %v3966_v5 = vmul.f32 %v6921_v44, %v3858_v10  ;;  %v5465_v0 = vld [vmem:[%s5655_s21 + $0x58] sm:$0xff]  }
 0x3af   : > { %v5258_v32 = vpop.f32.mrf.mxu0  ;;  %v4050_v37 = vunpack.c.l.bf16 %v5465_v0 }
 0x3b0   : > { %4134 = vst [vmem:[%s6940_s29 + $0x50] sm:$0xff] %v4102_v24  ;;  %v4100_v50 = vmax.f32 %v4068_v35, 0.0  ;;  %v4071_v1 = vadd.f32 %v4039_v59, %v4007_v22  ;;  %v4005_v38 = vadd.f32 %v6927_v51, %v3966_v5  ;;  %v3971_v34 = vmul.f32 %v5258_v32, %v6921_v44  ;;  %v5466_v35 = vld [vmem:[%s5655_s21 + $0x50] sm:$0xff]  }
 0x3b1   : > { %v3871_v47 = vpop.f32.mrf.mxu0  ;;  %v4048_v22 = vunpack.c.l.bf16 %v5466_v35 }
 0x3b2   : > { %4132 = vst [vmem:[%s6940_s29 + $0x40] sm:$0xff] %v4100_v50  ;;  %v4103_v6 = vmax.f32 %v4071_v1, 0.0  ;;  %v4069_v13 = vadd.f32 %v4037_v33, %v4005_v38  ;;  %v4010_v53 = vadd.f32 %v6927_v51, %v3971_v34  ;;  %v3969_v17 = vmul.f32 %v6921_v44, %v3871_v47 }
 0x3b3   : > { %v5259_v56 = vpop.f32.mrf.mxu0  ;;  %v4051_v1 = vunpack.c.h.bf16 %v5465_v0 }
 0x3b4   : > { %4135 = vst [vmem:[%s6940_s29 + $0x58] sm:$0xff] %v4103_v6  ;;  %v4101_v57 = vmax.f32 %v4069_v13, 0.0  ;;  %v4074_v4 = vadd.f32 %v4042_v62, %v4010_v53  ;;  %v4008_v25 = vadd.f32 %v6927_v51, %v3969_v17  ;;  %v3972_v8 = vmul.f32 %v5259_v56, %v6921_v44 }
 0x3b5   : > { %v3874_v9 = vpop.f32.mrf.mxu0  ;;  %v4049_v6 = vunpack.c.h.bf16 %v5466_v35 }
 0x3b6   : > { %4133 = vst [vmem:[%s6940_s29 + $0x48] sm:$0xff] %v4101_v57  ;;  %v4106_v29 = vmax.f32 %v4074_v4, 0.0  ;;  %v4072_v54 = vadd.f32 %v4040_v42, %v4008_v25  ;;  %v4011_v58 = vadd.f32 %v6927_v51, %v3972_v8  ;;  %v3970_v40 = vmul.f32 %v6921_v44, %v3874_v9  ;;  %v5467_v57 = vld [vmem:[%s5655_s21 + $0x68] sm:$0xff]  }
 0x3b7   : > { %v5262_v60 = vpop.f32.mrf.mxu0  ;;  %v4054_v4 = vunpack.c.l.bf16 %v5467_v57 }
 0x3b8   : > { %4138 = vst [vmem:[%s6940_s29 + $0x70] sm:$0xff] %v4106_v29  ;;  %v4104_v30 = vmax.f32 %v4072_v54, 0.0  ;;  %v4075_v31 = vadd.f32 %v4043_v63, %v4011_v58  ;;  %v4009_v12 = vadd.f32 %v6927_v51, %v3970_v40  ;;  %v3975_v61 = vmul.f32 %v5262_v60, %v6921_v44  ;;  %v5468_v54 = vld [vmem:[%s5655_s21 + $0x60] sm:$0xff]  }
 0x3b9   : > { %v3887_v14 = vpop.f32.mrf.mxu0  ;;  %v4052_v58 = vunpack.c.l.bf16 %v5468_v54 }
 0x3ba   : > { %4136 = vst [vmem:[%s6940_s29 + $0x60] sm:$0xff] %v4104_v30  ;;  %v4107_v28 = vmax.f32 %v4075_v31, 0.0  ;;  %v4073_v2 = vadd.f32 %v4041_v26, %v4009_v12  ;;  %v4014_v43 = vadd.f32 %v6927_v51, %v3975_v61  ;;  %v3973_v11 = vmul.f32 %v6921_v44, %v3887_v14 }
 0x3bb   : > { %v5263_v46 = vpop.f32.mrf.mxu0  ;;  %v4055_v31 = vunpack.c.h.bf16 %v5467_v57 }
 0x3bc   : > { %4139 = vst [vmem:[%s6940_s29 + $0x78] sm:$0xff] %v4107_v28  ;;  %v4105_v23 = vmax.f32 %v4073_v2, 0.0  ;;  %v4078_v39 = vadd.f32 %v4046_v7, %v4014_v43  ;;  %v4012_v3 = vadd.f32 %v6927_v51, %v3973_v11  ;;  %v3976_v41 = vmul.f32 %v5263_v46, %v6921_v44 }
 0x3bd   : > { %v3890_v27 = vpop.f32.mrf.mxu0  ;;  %v4053_v28 = vunpack.c.h.bf16 %v5468_v54 }
 0x3be   : > { %4137 = vst [vmem:[%s6940_s29 + $0x68] sm:$0xff] %v4105_v23  ;;  %v4110_v15 = vmax.f32 %v4078_v39, 0.0  ;;  %v4076_v21 = vadd.f32 %v4044_v52, %v4012_v3  ;;  %v4015_v59 = vadd.f32 %v6927_v51, %v3976_v41  ;;  %v3974_v45 = vmul.f32 %v6921_v44, %v3890_v27  ;;  %v5469_v23 = vld [vmem:[%s5655_s21 + $0x78] sm:$0xff]  }
 0x3bf   : > { %v5266_v36 = vpop.f32.mrf.mxu0  ;;  %v4058_v39 = vunpack.c.l.bf16 %v5469_v23 }
 0x3c0   : > { %4142 = vst [vmem:[%s6940_s29 + $0x90] sm:$0xff] %v4110_v15  ;;  %v4108_v16 = vmax.f32 %v4076_v21, 0.0  ;;  %v4079_v33 = vadd.f32 %v4047_v55, %v4015_v59  ;;  %v4013_v10 = vadd.f32 %v6927_v51, %v3974_v45  ;;  %v3979_v24 = vmul.f32 %v5266_v36, %v6921_v44  ;;  %v5470_v21 = vld [vmem:[%s5655_s21 + $0x70] sm:$0xff]   ;;  %s4483_s21 = sshll.u32 %s5614_s17, 12  ;;  %s5471_s17 = scalar_lea.vmem %s7050_s30, 4096 }
 0x3c1   : > { %v3903_v5 = vpop.f32.mrf.mxu0  ;;  %v4056_v59 = vunpack.c.l.bf16 %v5470_v21  ;;  %s7048_s18 = scalar_lea.hbm %s7106_s10, %s4483_s21  ;;  %p5472_p11 = scmp.ne.s32.totalorder %s7050_s30, %s5471_s17 }
 0x3c2   : > { %4140 = vst [vmem:[%s6940_s29 + $0x80] sm:$0xff] %v4108_v16  ;;  %v4111_v20 = vmax.f32 %v4079_v33, 0.0  ;;  %v4077_v62 = vadd.f32 %v4045_v19, %v4013_v10  ;;  %v4018_v32 = vadd.f32 %v6927_v51, %v3979_v24  ;;  %v3977_v50 = vmul.f32 %v6921_v44, %v3903_v5  ;;  %p5479_p1 = scmp.lt.s32.totalorder %s5477_s28, %s5471_s17 }
 0x3c3   : > { %v5267_v38 = vpop.f32.mrf.mxu0  ;;  %v4059_v33 = vunpack.c.h.bf16 %v5469_v23  ;;  %p5473_p12 = pnand %p5472_p11, %p5631_p5 }
 0x3c4   : > { %4143 = vst [vmem:[%s6940_s29 + $0x98] sm:$0xff] %v4111_v20  ;;  %v4109_v34 = vmax.f32 %v4077_v62, 0.0  ;;  %v4082_v18 = vadd.f32 %v4050_v37, %v4018_v32  ;;  %v4016_v42 = vadd.f32 %v6927_v51, %v3977_v50  ;;  %v3980_v47 = vmul.f32 %v5267_v38, %v6921_v44  ;;  %p5480_p2 = por %p5479_p1, %p5478_p0 }
 0x3c5   : > { %v3906_v13 = vpop.f32.mrf.mxu0  ;;  %v4057_v20 = vunpack.c.h.bf16 %v5470_v21  ;;  %p5474_p13 = pneg %p5473_p12 }
 0x3c6   : > { %4141 = vst [vmem:[%s6940_s29 + $0x88] sm:$0xff] %v4109_v34  ;;  %v4114_v53 = vmax.f32 %v4082_v18, 0.0  ;;  %v4080_v17 = vadd.f32 %v4048_v22, %v4016_v42  ;;  %v4019_v63 = vadd.f32 %v6927_v51, %v3980_v47  ;;  %v3978_v56 = vmul.f32 %v6921_v44, %v3906_v13 }
 0x3c7   : > { %v5270_v25 = vpop.f32.mrf.mxu0  ;;  %p5481_p3 = pnand %p5480_p2, %p5474_p13 }
 0x3c8   : > { %4146 = vst [vmem:[%s6940_s29 + $0xb0] sm:$0xff] %v4114_v53  ;;  %v4112_v8 = vmax.f32 %v4080_v17, 0.0  ;;  %v4083_v26 = vadd.f32 %v4051_v1, %v4019_v63  ;;  %v4017_v9 = vadd.f32 %v6927_v51, %v3978_v56  ;;  %v3983_v29 = vmul.f32 %v5270_v25, %v6921_v44 }
 0x3c9   : > { %v3919_v40 = vpop.f32.mrf.mxu0 }
 0x3ca   : > { %4144 = vst [vmem:[%s6940_s29 + $0xa0] sm:$0xff] %v4112_v8  ;;  %v4115_v48 = vmax.f32 %v4083_v26, 0.0  ;;  %v4081_v7 = vadd.f32 %v4049_v6, %v4017_v9  ;;  %v4022_v60 = vadd.f32 %v6927_v51, %v3983_v29  ;;  %v3981_v30 = vmul.f32 %v6921_v44, %v3919_v40 }
 0x3cb   : > { %v5271_v12 = vpop.f32.mrf.mxu0 }
 0x3cc   : > { %4147 = vst [vmem:[%s6940_s29 + $0xb8] sm:$0xff] %v4115_v48  ;;  %v4113_v61 = vmax.f32 %v4081_v7, 0.0  ;;  %v4086_v49 = vadd.f32 %v4054_v4, %v4022_v60  ;;  %v4020_v52 = vadd.f32 %v6927_v51, %v3981_v30  ;;  %v3984_v14 = vmul.f32 %v5271_v12, %v6921_v44 }
 0x3cd   : > { %v3922_v2 = vpop.f32.mrf.mxu0 }
 0x3ce   : > { %4145 = vst [vmem:[%s6940_s29 + $0xa8] sm:$0xff] %v4113_v61  ;;  %v4118_v43 = vmax.f32 %v4086_v49, 0.0  ;;  %v4084_v11 = vadd.f32 %v4052_v58, %v4020_v52  ;;  %v4023_v55 = vadd.f32 %v6927_v51, %v3984_v14  ;;  %v3982_v46 = vmul.f32 %v6921_v44, %v3922_v2 }
 0x3cf   : > { %v5274_v3 = vpop.f32.mrf.mxu0 }
 0x3d0   : > { %4150 = vst [vmem:[%s6940_s29 + $0xd0] sm:$0xff] %v4118_v43  ;;  %v4116_v41 = vmax.f32 %v4084_v11, 0.0  ;;  %v4087_v19 = vadd.f32 %v4055_v31, %v4023_v55  ;;  %v4021_v27 = vadd.f32 %v6927_v51, %v3982_v46  ;;  %v3987_v15 = vmul.f32 %v5274_v3, %v6921_v44 }
 0x3d1   : > { %v3935_v45 = vpop.f32.mrf.mxu0 }
 0x3d2   : > { %4148 = vst [vmem:[%s6940_s29 + $0xc0] sm:$0xff] %v4116_v41  ;;  %v4119_v0 = vmax.f32 %v4087_v19, 0.0  ;;  %v4085_v37 = vadd.f32 %v4053_v28, %v4021_v27  ;;  %v4026_v36 = vadd.f32 %v6927_v51, %v3987_v15  ;;  %v3985_v16 = vmul.f32 %v6921_v44, %v3935_v45 }
 0x3d3   : > { %v5275_v10 = vpop.f32.mrf.mxu0 }
 0x3d4   : > { %4151 = vst [vmem:[%s6940_s29 + $0xd8] sm:$0xff] %v4119_v0  ;;  %v4117_v24 = vmax.f32 %v4085_v37, 0.0  ;;  %v4090_v35 = vadd.f32 %v4058_v39, %v4026_v36  ;;  %v4024_v22 = vadd.f32 %v6927_v51, %v3985_v16  ;;  %v3988_v5 = vmul.f32 %v5275_v10, %v6921_v44 }
 0x3d5   : > { %v3938_v62 = vpop.f32.mrf.mxu0 }
 0x3d6   : > { %4149 = vst [vmem:[%s6940_s29 + $0xc8] sm:$0xff] %v4117_v24  ;;  %v4122_v32 = vmax.f32 %v4090_v35, 0.0  ;;  %v4088_v50 = vadd.f32 %v4056_v59, %v4024_v22  ;;  %v4027_v1 = vadd.f32 %v6927_v51, %v3988_v5  ;;  %v3986_v38 = vmul.f32 %v6921_v44, %v3938_v62 }
 0x3d8   : > { %4154 = vst [vmem:[%s6940_s29 + $0xf0] sm:$0xff] %v4122_v32  ;;  %v4120_v34 = vmax.f32 %v4088_v50, 0.0  ;;  %v4091_v18 = vadd.f32 %v4059_v33, %v4027_v1  ;;  %v4025_v42 = vadd.f32 %v6927_v51, %v3986_v38 }
 0x3da   : > { %4152 = vst [vmem:[%s6940_s29 + $0xe0] sm:$0xff] %v4120_v34  ;;  %v4123_v47 = vmax.f32 %v4091_v18, 0.0  ;;  %v4089_v6 = vadd.f32 %v4057_v20, %v4025_v42 }
 0x3dc   : > { %4155 = vst [vmem:[%s6940_s29 + $0xf8] sm:$0xff] %v4123_v47  ;;  %v4121_v44 = vmax.f32 %v4089_v6, 0.0 }
 0x3de   : > { %4153 = vst [vmem:[%s6940_s29 + $0xe8] sm:$0xff] %v4121_v44 }
 0x3df   : > { %5484 = shalt.err (!%p5481_p3)
}
 0x3e0   : > { %s5485_s25 = scalar_lea.hbm %s7048_s18, 4096  ;;  %s5489_s11 = scalar_lea.hbm %s7106_s10, 8192 }
 0x3e1   : > { %p5486_p4 = scmp.ne.s32.totalorder %s7048_s18, %s5485_s25  ;;  %p5490_p9 = scmp.lt.s32.totalorder %s7048_s18, %s7106_s10 }
 0x3e2   : > { %p5491_p10 = scmp.lt.s32.totalorder %s5489_s11, %s5485_s25 }
 0x3e3   : > { %p5487_p7 = pnand %p5486_p4, %p5631_p5 }
 0x3e4   : > { %p5492_p11 = por %p5491_p10, %p5490_p9 }
 0x3e5   : > { %p5488_p8 = pneg %p5487_p7 }
 0x3e7   : > { %p5493_p12 = pnand %p5492_p11, %p5488_p8 }
 0x3e9   : > { %5496 = shalt.err (!%p5493_p12)
}
 0x3ea   : > { %s5536_s17 = smov 128   ;;  %s5537_s27 = smov 8  }
 0x3eb   : > { %5292 = dma.vmem_to_hbm [thread:$0]  (%p5631_p5), %s7050_s30, 4096, %s7048_s18, %s7056_s20, %s5536_s17, %s5536_s17, %s5537_s27  }
 0x3ec PF: > { %p5298_p13 = scmp.ge.s32.totalorder %s5531_s16, 2  ;;  %s4185_s28 = sand.u32 1, %s5519_s13  }
 0x3ed   : > { %s4186_s25 = scalar_lea.sflag [#allocation4], %s4185_s28 }
 0x3ee   : > { %p5295_p0 = pnand %p5298_p13, %p5635_p6 }
 0x3f0   : > { %p5296_p1 = pneg %p5295_p0 }
 0x3f2   : > { %5514 = dma.done.wait (%p5296_p1), %s4186_s25, 4096  }
 0x3f3   : > { %5516 = vsyncadd (%p5296_p1), %s4186_s25, 4294963200  ;;  %p20_p2 = scmp.ge.s32.totalorder %s5618_s19, 4   ;;  %s7135_s13 = smov %s5523_s14 }
 0x3f4   : > { %s7136_s14 = smov %s5527_s15  ;;  %s7137_s15 = smov %s5629_s22 }
 0x3f5   : > { %s7138_s16 = smov %s5618_s19  ;;  %22 = sbr.rel (!%p20_p2) target bundleno = 3 (0x3), region = 105 }
 0x3fa   :  { %4191 = vsyncpa [#allocation4], 1 }
 0x3fb   :  { %4193 = vsyncpa [#allocation4 + $0x1], 1 }

</bundles_post_ra>
